<compile_context>
chip_gen: v7x
topology: tpu7x:2x2x1
jax: 0.10.0
libtpu: 0.0.40
codegen_flags: <defaults>
</compile_context>

<pallas_src>
import functools

import jax
import jax.numpy as jnp
from jax import lax
from jax.experimental import pallas as pl
from jax.experimental.pallas import tpu as pltpu


# ---------------------------------------------------------------------------
# helpers
# ---------------------------------------------------------------------------
def _round_up(n, m):
    return ((n + m - 1) // m) * m


_SQRT_HALF = 0.7071067811865476
_SQRT_2_OVER_PI = 0.7978845608028654


def _erf_approx(x):
    # Abramowitz & Stegun 7.1.26 rational approximation, |err| <= 1.5e-7.
    # (Mosaic has no erf primitive; preserves torch.nn.GELU() erf semantics.)
    a1, a2, a3, a4, a5 = (0.254829592, -0.284496736, 1.421413741,
                          -1.453152027, 1.061405429)
    p = 0.3275911
    ax = jnp.abs(x)
    t = 1.0 / (1.0 + p * ax)
    poly = ((((a5 * t + a4) * t + a3) * t + a2) * t + a1) * t
    y = 1.0 - poly * jnp.exp(-ax * ax)
    return jnp.where(x >= 0, y, -y)


def _gelu(x, mode):
    if mode == "tanh":
        # tanh runs on the EUP (its own VLIW slot) -> VALU-light hot path.
        return 0.5 * x * (1.0 + jnp.tanh(_SQRT_2_OVER_PI *
                                         (x + 0.044715 * x * x * x)))
    # "erf": torch.nn.GELU() default semantics.
    return 0.5 * x * (1.0 + _erf_approx(x * _SQRT_HALF))


# ---------------------------------------------------------------------------
# fused ParallelConvNeXtBlock kernel
#   x_ref     : (1, tile, C)        current time tile (channels_last)
#   halo_ref  : (1, 1, 2*pad, C)    left|right conv halo rows for this tile
#   dww_ref   : (nblk, k_max, C)    depthwise taps (zero-padded to common k_max)
#   dwb/lnw/lnb/b2/gamma : (nblk, 1, C);  w1: (nblk, C, H) bf16;  b1: (nblk,1,H)
#   w2        : (nblk, H, C) bf16
#   o_ref     : (1, tile, C)
#   win_ref   : VMEM scratch (tile + 2*pad_a, C), pad_a = round_up(pad, 8)
# ---------------------------------------------------------------------------
def _parallel_convnext_kernel(x_ref, halo_ref, dww_ref, dwb_ref, lnw_ref,
                              lnb_ref, w1_ref, b1_ref, w2_ref, b2_ref,
                              gamma_ref, o_ref, win_ref, *, dilation, eps,
                              gelu_mode):
    f32 = jnp.float32
    tile, C = o_ref.shape[1], o_ref.shape[2]
    nblk, k_max, _ = dww_ref.shape
    pad = dilation * (k_max - 1) // 2
    pad_a = (win_ref.shape[0] - tile) // 2          # 8-aligned left offset
    mm_dtype = w1_ref.dtype

    # ----- assemble conv window (halo | center | halo) in VMEM scratch --------
    xc = x_ref[0]                                    # (tile, C) center rows
    win_ref[pl.ds(pad_a, tile), :] = xc              # bulk store, 8-aligned
    if pad > 0:
        halo = halo_ref[0, 0]                        # (2*pad, C)
        win_ref[pl.ds(pad_a - pad, pad), :] = halo[0:pad, :]
        win_ref[pl.ds(pad_a + tile, pad), :] = halo[pad:2 * pad, :]

    # ----- depthwise convs: each shifted tap slice loaded once and reused by
    # every branch (cuts tap load traffic nblk-fold) ---------------------------
    dw_w = dww_ref[...].astype(f32)                  # (nblk, k_max, C)
    convs = [jnp.zeros((tile, C), f32) for _ in range(nblk)]
    for o in range(k_max):                           # static, small
        xs = win_ref[pl.ds(pad_a - pad + o * dilation, tile), :].astype(f32)
        for i in range(nblk):
            convs[i] = convs[i] + xs * dw_w[i, o:o + 1, :]

    # ----- per-branch LayerNorm -> Linear -> GELU -> Linear -> gamma ----------
    acc = xc.astype(f32)                             # residual term
    for i in range(nblk):
        conv = convs[i] + dwb_ref[i].astype(f32)     # (tile, C)
        mean = jnp.mean(conv, axis=-1, keepdims=True)
        xm = conv - mean
        var = jnp.mean(xm * xm, axis=-1, keepdims=True)      # biased variance
        y = xm * lax.rsqrt(var + eps)
        y = y * lnw_ref[i].astype(f32) + lnb_ref[i].astype(f32)

        # MXU pointwise MLP: bf16 operands, f32 accumulation.
        h = jnp.dot(y.astype(mm_dtype), w1_ref[i], preferred_element_type=f32)
        h = _gelu(h + b1_ref[i].astype(f32), gelu_mode)
        o2 = jnp.dot(h.astype(mm_dtype), w2_ref[i], preferred_element_type=f32)
        o2 = o2 + b2_ref[i].astype(f32)

        acc = acc + o2 * gamma_ref[i].astype(f32)    # layer scale + accumulate

    o_ref[0] = acc.astype(o_ref.dtype)


# ---------------------------------------------------------------------------
# wrapper
# ---------------------------------------------------------------------------
def parallel_convnext_block(x, stacked_params, *, dilation=1, eps=1e-6,
                            tile_t=512, matmul_dtype=jnp.bfloat16,
                            gelu_mode="tanh", channels_last=False,
                            interpret=False):
    """ParallelConvNeXtBlock forward.

    x: (B, C, T) if channels_last=False (PyTorch layout), else (B, T, C)
       (pass channels_last=True to skip the wrapper transposes entirely).
    stacked_params: (dww, dwb, lnw, lnb, w1, b1, w2, b2, gamma) with
       dww (nblk,k_max,C) depthwise taps (smaller kernels zero-padded centred),
       dwb/lnw/lnb/b2/gamma (nblk,1,C), w1 (nblk,C,H), b1 (nblk,1,H),
       w2 (nblk,H,C).
    """
    dww, dwb, lnw, lnb, w1, b1, w2, b2, gamma = stacked_params
    x_cl = x if channels_last else jnp.transpose(x, (0, 2, 1))   # (B, T, C)
    B, T, C = x_cl.shape
    nblk, k_max, _ = dww.shape
    H = w1.shape[-1]
    pad = dilation * (k_max - 1) // 2
    pad_a = _round_up(pad, 8) if pad > 0 else 0
    halo_w = 2 * pad if pad > 0 else 8

    tile = min(_round_up(tile_t, 8), _round_up(T, 8))
    T_round = _round_up(T, tile)
    nT = T_round // tile

    # Tail-round the sequence with zeros (at most `pad` of them act as the
    # conv's right zero-padding; the rest only feed discarded rows).
    x_t = jnp.pad(x_cl, ((0, 0), (0, T_round - T), (0, 0)))

    # Tiny per-tile halo side array (B, nT, 2*pad, C): keeps resident VMEM
    # independent of T while x itself streams through plain blocked windows.
    if pad > 0:
        xp = jnp.pad(x_t, ((0, 0), (pad, pad), (0, 0)))
        starts = jnp.arange(nT) * tile
        idx_l = starts[:, None] + jnp.arange(pad)[None, :]
        idx_r = starts[:, None] + (tile + pad) + jnp.arange(pad)[None, :]
        halos = jnp.concatenate([xp[:, idx_l], xp[:, idx_r]], axis=2)
    else:
        halos = jnp.zeros((B, nT, halo_w, C), x_t.dtype)

    # Pointwise-MLP weights stream in bf16 (half the DMA bytes / VMEM); the
    # kernel still accumulates in f32.  (Callers may pre-cast and store bf16.)
    params = (dww, dwb, lnw, lnb,
              w1.astype(matmul_dtype), b1, w2.astype(matmul_dtype), b2, gamma)

    kernel = functools.partial(_parallel_convnext_kernel, dilation=dilation,
                               eps=eps, gelu_mode=gelu_mode)

    itemsize = x_t.dtype.itemsize
    param_bytes = sum(int(p.size) * p.dtype.itemsize for p in params)

    def _run(single_buffer_weights):
        wkw = ({"pipeline_mode": pl.Buffered(1)}
               if single_buffer_weights else {})

        def const_spec(shape):
            n = len(shape)
            return pl.BlockSpec(shape, lambda b, t, _n=n: (0,) * _n, **wkw)

        in_specs = [
            pl.BlockSpec((1, tile, C), lambda b, t: (b, t, 0)),           # x
            pl.BlockSpec((1, 1, halo_w, C), lambda b, t: (b, t, 0, 0)),   # halos
        ] + [const_spec(p.shape) for p in params]                         # weights

        # Explicit VMEM budget: blocks (double-buffered) + weights + scratch
        # + headroom for the (tile,H)/(tile,C) f32 intermediates.
        n_wbuf = 1 if single_buffer_weights else 2
        est = (2 * tile * C * itemsize
               + 2 * halo_w * C * itemsize
               + 2 * tile * C * itemsize
               + n_wbuf * param_bytes
               + (tile + 2 * pad_a) * C * itemsize
               + 2 * tile * H * 4
               + (nblk + 4) * tile * C * 4)
        vmem_limit = int(min(max(est * 5 // 4, 32 << 20), 128 << 20))

        grid_spec = pltpu.PrefetchScalarGridSpec(
            num_scalar_prefetch=0,
            grid=(B, nT),
            in_specs=in_specs,
            out_specs=pl.BlockSpec((1, tile, C), lambda b, t: (b, t, 0)),
            scratch_shapes=[pltpu.VMEM((tile + 2 * pad_a, C), x_t.dtype)],
        )
        return pl.pallas_call(
            kernel,
            out_shape=jax.ShapeDtypeStruct((B, T_round, C), x.dtype),
            grid_spec=grid_spec,
            compiler_params=pltpu.CompilerParams(
                dimension_semantics=("parallel", "parallel"),
                vmem_limit_bytes=vmem_limit),
            interpret=interpret,
        )(x_t, halos, *params)

    try:
        out = _run(True)            # single-buffered grid-invariant weights
    except Exception:               # pipeline_mode unsupported -> default 2-deep
        out = _run(False)

    out = out[:, :T, :]             # drop rounded tail rows
    return out if channels_last else jnp.transpose(out, (0, 2, 1))


# ---------------------------------------------------------------------------
# pure-JAX reference (PyTorch forward semantics, per-branch kernel sizes)
# ---------------------------------------------------------------------------
def _ref_parallel_convnext(x, per_block_params, *, dilation=1, eps=1e-6,
                           approx_gelu=True):
    hp = lax.Precision.HIGHEST
    xf = x.astype(jnp.float32)
    x_cl = jnp.transpose(xf, (0, 2, 1))              # (B, T, C)
    T = x_cl.shape[1]
    total = x_cl
    for (dw_w, dw_b, ln_w, ln_b, w1, b1, w2, b2, gamma) in per_block_params:
        k = dw_w.shape[0]
        pad = dilation * (k - 1) // 2
        xp = jnp.pad(x_cl, ((0, 0), (pad, pad), (0, 0)))
        conv = jnp.zeros_like(x_cl)
        for j in range(k):
            conv = conv + xp[:, j * dilation:j * dilation + T, :] * dw_w[j][None, None, :]
        conv = conv + dw_b[None, None, :]
        mean = jnp.mean(conv, axis=-1, keepdims=True)
        var = jnp.mean((conv - mean) ** 2, axis=-1, keepdims=True)
        y = (conv - mean) / jnp.sqrt(var + eps)
        y = y * ln_w + ln_b
        h = jnp.einsum("btc,ch->bth", y, w1, precision=hp) + b1
        h = jax.nn.gelu(h, approximate=approx_gelu)
        o = jnp.einsum("bth,hc->btc", h, w2, precision=hp) + b2
        total = total + o * gamma
    return jnp.transpose(total, (0, 2, 1)).astype(x.dtype)


# ---------------------------------------------------------------------------
# test
# ---------------------------------------------------------------------------
if __name__ == "__main__":
    key = jax.random.PRNGKey(0)

    # Small but lane-dense shapes: C a multiple of 128 keeps output stores
    # unmasked and the MXU fed (real vocoder dims are C >= 128 anyway).
    B, C, T = 2, 128, 72                 # T deliberately not a tile multiple
    kernel_sizes = [3, 7]
    dilation = 1
    mlp_ratio = 4.0
    H = int(mlp_ratio * C)
    eps = 1e-6

    assert all(k % 2 == 1 for k in kernel_sizes), "odd kernel sizes expected"
    nblk = len(kernel_sizes)
    k_max = max(kernel_sizes)

    keys = jax.random.split(key, 1 + nblk)
    x = jax.random.normal(keys[0], (B, C, T), jnp.float32)

    per_block = []
    for bi, k in enumerate(kernel_sizes):
        kk = jax.random.split(keys[1 + bi], 9)
        dw_w = 0.3 * jax.random.normal(kk[0], (k, C), jnp.float32)
        dw_b = 0.1 * jax.random.normal(kk[1], (C,), jnp.float32)
        ln_w = 1.0 + 0.1 * jax.random.normal(kk[2], (C,), jnp.float32)
        ln_b = 0.1 * jax.random.normal(kk[3], (C,), jnp.float32)
        w1 = jax.random.normal(kk[4], (C, H), jnp.float32) / jnp.sqrt(float(C))
        b1 = 0.1 * jax.random.normal(kk[5], (H,), jnp.float32)
        w2 = jax.random.normal(kk[6], (H, C), jnp.float32) / jnp.sqrt(float(H))
        b2 = 0.1 * jax.random.normal(kk[7], (C,), jnp.float32)
        gamma = 0.5 + 0.1 * jax.random.normal(kk[8], (C,), jnp.float32)
        per_block.append((dw_w, dw_b, ln_w, ln_b, w1, b1, w2, b2, gamma))

    # Zero-pad smaller depthwise kernels (centred) to the common k_max so all
    # branches share the same tap offsets (requires odd kernel sizes).
    def _pad_taps(w, k):
        p = (k_max - k) // 2
        return jnp.pad(w, ((p, p), (0, 0)))

    stacked = (
        jnp.stack([_pad_taps(pb[0], ks) for pb, ks in zip(per_block, kernel_sizes)]),
        jnp.stack([pb[1][None, :] for pb in per_block]),   # dw bias   (nblk,1,C)
        jnp.stack([pb[2][None, :] for pb in per_block]),   # ln weight
        jnp.stack([pb[3][None, :] for pb in per_block]),   # ln bias
        jnp.stack([pb[4] for pb in per_block]),            # w1 (nblk,C,H)
        jnp.stack([pb[5][None, :] for pb in per_block]),   # b1 (nblk,1,H)
        jnp.stack([pb[6] for pb in per_block]),            # w2 (nblk,H,C)
        jnp.stack([pb[7][None, :] for pb in per_block]),   # b2
        jnp.stack([pb[8][None, :] for pb in per_block]),   # gamma
    )

    # (a) performance config: bf16 matmuls + tanh GELU, multi-tile path
    #     (tile_t=32 -> 3 time tiles, halo + padded-tail path exercised).
    r_tanh = _ref_parallel_convnext(x, per_block, dilation=dilation, eps=eps,
                                    approx_gelu=True)
    y = parallel_convnext_block(x, stacked, dilation=dilation, eps=eps,
                                tile_t=32)
    y = jax.block_until_ready(y)
    assert y.shape == (B, C, T)
    err = float(jnp.max(jnp.abs(y - r_tanh)))
    assert jnp.allclose(y, r_tanh, atol=8e-2, rtol=8e-2), (
        f"bf16/tanh path mismatch, max abs err = {err}")

    # (b) exact-semantics config: f32 matmuls + erf GELU (torch.nn.GELU()),
    #     single time tile (default tile_t covers the whole sequence).
    r_erf = _ref_parallel_convnext(x, per_block, dilation=dilation, eps=eps,
                                   approx_gelu=False)
    y2 = parallel_convnext_block(x, stacked, dilation=dilation, eps=eps,
                                 matmul_dtype=jnp.float32, gelu_mode="erf")
    y2 = jax.block_until_ready(y2)
    err2 = float(jnp.max(jnp.abs(y2 - r_erf)))
    assert jnp.allclose(y2, r_erf, atol=2e-3, rtol=2e-3), (
        f"f32/erf path mismatch, max abs err = {err2}")

    print("KERNEL_OK")
</pallas_src>

<mosaic_0001>
module attributes {stable_mosaic.version = 11 : i64} {
  func.func @_parallel_convnext_kernel(%arg0: i32, %arg1: i32, %arg2: memref<1x32x128xf32, #tpu.memory_space<vmem>>, %arg3: memref<1x1x6x128xf32, #tpu.memory_space<vmem>>, %arg4: memref<2x7x128xf32, #tpu.memory_space<vmem>>, %arg5: memref<2x1x128xf32, #tpu.memory_space<vmem>>, %arg6: memref<2x1x128xf32, #tpu.memory_space<vmem>>, %arg7: memref<2x1x128xf32, #tpu.memory_space<vmem>>, %arg8: memref<2x128x512xbf16, #tpu.memory_space<vmem>>, %arg9: memref<2x1x512xf32, #tpu.memory_space<vmem>>, %arg10: memref<2x512x128xbf16, #tpu.memory_space<vmem>>, %arg11: memref<2x1x128xf32, #tpu.memory_space<vmem>>, %arg12: memref<2x1x128xf32, #tpu.memory_space<vmem>>, %arg13: memref<1x32x128xf32, #tpu.memory_space<vmem>>, %arg14: memref<48x128xf32, #tpu.memory_space<vmem>>) attributes {dimension_semantics = [#tpu.dimension_semantics<parallel>, #tpu.dimension_semantics<parallel>], iteration_bounds = array<i64: 2, 3>, scalar_prefetch = 0 : i64, scratch_operands = 1 : i64, tpu.core_type = #tpu.core_type<tc>, window_params = [{transform_indices = @transform_0, window_bounds = array<i64: 1, 32, 128>}, {transform_indices = @transform_1, window_bounds = array<i64: 1, 1, 6, 128>}, {pipeline_mode = #tpu.pipeline_mode<synchronous>, transform_indices = @transform_2, window_bounds = array<i64: 2, 7, 128>}, {pipeline_mode = #tpu.pipeline_mode<synchronous>, transform_indices = @transform_3, window_bounds = array<i64: 2, 1, 128>}, {pipeline_mode = #tpu.pipeline_mode<synchronous>, transform_indices = @transform_4, window_bounds = array<i64: 2, 1, 128>}, {pipeline_mode = #tpu.pipeline_mode<synchronous>, transform_indices = @transform_5, window_bounds = array<i64: 2, 1, 128>}, {pipeline_mode = #tpu.pipeline_mode<synchronous>, transform_indices = @transform_6, window_bounds = array<i64: 2, 128, 512>}, {pipeline_mode = #tpu.pipeline_mode<synchronous>, transform_indices = @transform_7, window_bounds = array<i64: 2, 1, 512>}, {pipeline_mode = #tpu.pipeline_mode<synchronous>, transform_indices = @transform_8, window_bounds = array<i64: 2, 512, 128>}, {pipeline_mode = #tpu.pipeline_mode<synchronous>, transform_indices = @transform_9, window_bounds = array<i64: 2, 1, 128>}, {pipeline_mode = #tpu.pipeline_mode<synchronous>, transform_indices = @transform_10, window_bounds = array<i64: 2, 1, 128>}, {transform_indices = @transform_11, window_bounds = array<i64: 1, 32, 128>}]} {
    %c0 = arith.constant 0 : index
    %c0_0 = arith.constant 0 : index
    %c0_1 = arith.constant 0 : index
    %0 = vector.load %arg2[%c0, %c0_0, %c0_1] : memref<1x32x128xf32, #tpu.memory_space<vmem>>, vector<1x32x128xf32>
    %1 = vector.shape_cast %0 : vector<1x32x128xf32> to vector<32x128xf32>
    %c8 = arith.constant 8 : index
    %c0_2 = arith.constant 0 : index
    %2 = vector.load %arg14[%c8, %c0_2] : memref<48x128xf32, #tpu.memory_space<vmem>>, vector<32x128xf32>
    tpu.vector_store %arg14[%c8, %c0_2], %1 {strides = array<i32>} : memref<48x128xf32, #tpu.memory_space<vmem>>, vector<32x128xf32>,
    %c0_3 = arith.constant 0 : index
    %c0_4 = arith.constant 0 : index
    %c0_5 = arith.constant 0 : index
    %c0_6 = arith.constant 0 : index
    %3 = vector.load %arg3[%c0_3, %c0_4, %c0_5, %c0_6] : memref<1x1x6x128xf32, #tpu.memory_space<vmem>>, vector<1x1x6x128xf32>
    %4 = vector.shape_cast %3 : vector<1x1x6x128xf32> to vector<6x128xf32>
    %5 = vector.extract_strided_slice %4 {offsets = [0, 0], sizes = [3, 128], strides = [1, 1]} : vector<6x128xf32> to vector<3x128xf32>
    %c5 = arith.constant 5 : index
    %c0_7 = arith.constant 0 : index
    %6 = vector.load %arg14[%c5, %c0_7] : memref<48x128xf32, #tpu.memory_space<vmem>>, vector<3x128xf32>
    tpu.vector_store %arg14[%c5, %c0_7], %5 {strides = array<i32>} : memref<48x128xf32, #tpu.memory_space<vmem>>, vector<3x128xf32>,
    %7 = vector.extract_strided_slice %4 {offsets = [3, 0], sizes = [3, 128], strides = [1, 1]} : vector<6x128xf32> to vector<3x128xf32>
    %c40 = arith.constant 40 : index
    %c0_8 = arith.constant 0 : index
    %8 = vector.load %arg14[%c40, %c0_8] : memref<48x128xf32, #tpu.memory_space<vmem>>, vector<3x128xf32>
    tpu.vector_store %arg14[%c40, %c0_8], %7 {strides = array<i32>} : memref<48x128xf32, #tpu.memory_space<vmem>>, vector<3x128xf32>,
    %c0_9 = arith.constant 0 : index
    %c0_10 = arith.constant 0 : index
    %c0_11 = arith.constant 0 : index
    %9 = vector.load %arg4[%c0_9, %c0_10, %c0_11] : memref<2x7x128xf32, #tpu.memory_space<vmem>>, vector<2x7x128xf32>
    %cst = arith.constant 0.000000e+00 : f32
    %10 = vector.broadcast %cst : f32 to vector<32x128xf32>
    %cst_12 = arith.constant 0.000000e+00 : f32
    %11 = vector.broadcast %cst_12 : f32 to vector<32x128xf32>
    %c5_13 = arith.constant 5 : index
    %c0_14 = arith.constant 0 : index
    %12 = vector.load %arg14[%c5_13, %c0_14] : memref<48x128xf32, #tpu.memory_space<vmem>>, vector<32x128xf32>
    %13 = vector.extract_strided_slice %9 {offsets = [0, 0, 0], sizes = [1, 1, 128], strides = [1, 1, 1]} : vector<2x7x128xf32> to vector<1x1x128xf32>
    %14 = vector.shape_cast %13 : vector<1x1x128xf32> to vector<1x128xf32>
    %15 = vector.broadcast %14 : vector<1x128xf32> to vector<32x128xf32>
    %16 = arith.mulf %12, %15 : vector<32x128xf32>
    %17 = arith.addf %10, %16 : vector<32x128xf32>
    %18 = vector.extract_strided_slice %9 {offsets = [1, 0, 0], sizes = [1, 1, 128], strides = [1, 1, 1]} : vector<2x7x128xf32> to vector<1x1x128xf32>
    %19 = vector.shape_cast %18 : vector<1x1x128xf32> to vector<1x128xf32>
    %20 = vector.broadcast %19 : vector<1x128xf32> to vector<32x128xf32>
    %21 = arith.mulf %12, %20 : vector<32x128xf32>
    %22 = arith.addf %11, %21 : vector<32x128xf32>
    %c6 = arith.constant 6 : index
    %c0_15 = arith.constant 0 : index
    %23 = vector.load %arg14[%c6, %c0_15] : memref<48x128xf32, #tpu.memory_space<vmem>>, vector<32x128xf32>
    %24 = vector.extract_strided_slice %9 {offsets = [0, 1, 0], sizes = [1, 1, 128], strides = [1, 1, 1]} : vector<2x7x128xf32> to vector<1x1x128xf32>
    %25 = vector.shape_cast %24 : vector<1x1x128xf32> to vector<1x128xf32>
    %26 = vector.broadcast %25 : vector<1x128xf32> to vector<32x128xf32>
    %27 = arith.mulf %23, %26 : vector<32x128xf32>
    %28 = arith.addf %17, %27 : vector<32x128xf32>
    %29 = vector.extract_strided_slice %9 {offsets = [1, 1, 0], sizes = [1, 1, 128], strides = [1, 1, 1]} : vector<2x7x128xf32> to vector<1x1x128xf32>
    %30 = vector.shape_cast %29 : vector<1x1x128xf32> to vector<1x128xf32>
    %31 = vector.broadcast %30 : vector<1x128xf32> to vector<32x128xf32>
    %32 = arith.mulf %23, %31 : vector<32x128xf32>
    %33 = arith.addf %22, %32 : vector<32x128xf32>
    %c7 = arith.constant 7 : index
    %c0_16 = arith.constant 0 : index
    %34 = vector.load %arg14[%c7, %c0_16] : memref<48x128xf32, #tpu.memory_space<vmem>>, vector<32x128xf32>
    %35 = vector.extract_strided_slice %9 {offsets = [0, 2, 0], sizes = [1, 1, 128], strides = [1, 1, 1]} : vector<2x7x128xf32> to vector<1x1x128xf32>
    %36 = vector.shape_cast %35 : vector<1x1x128xf32> to vector<1x128xf32>
    %37 = vector.broadcast %36 : vector<1x128xf32> to vector<32x128xf32>
    %38 = arith.mulf %34, %37 : vector<32x128xf32>
    %39 = arith.addf %28, %38 : vector<32x128xf32>
    %40 = vector.extract_strided_slice %9 {offsets = [1, 2, 0], sizes = [1, 1, 128], strides = [1, 1, 1]} : vector<2x7x128xf32> to vector<1x1x128xf32>
    %41 = vector.shape_cast %40 : vector<1x1x128xf32> to vector<1x128xf32>
    %42 = vector.broadcast %41 : vector<1x128xf32> to vector<32x128xf32>
    %43 = arith.mulf %34, %42 : vector<32x128xf32>
    %44 = arith.addf %33, %43 : vector<32x128xf32>
    %c8_17 = arith.constant 8 : index
    %c0_18 = arith.constant 0 : index
    %45 = vector.load %arg14[%c8_17, %c0_18] : memref<48x128xf32, #tpu.memory_space<vmem>>, vector<32x128xf32>
    %46 = vector.extract_strided_slice %9 {offsets = [0, 3, 0], sizes = [1, 1, 128], strides = [1, 1, 1]} : vector<2x7x128xf32> to vector<1x1x128xf32>
    %47 = vector.shape_cast %46 : vector<1x1x128xf32> to vector<1x128xf32>
    %48 = vector.broadcast %47 : vector<1x128xf32> to vector<32x128xf32>
    %49 = arith.mulf %45, %48 : vector<32x128xf32>
    %50 = arith.addf %39, %49 : vector<32x128xf32>
    %51 = vector.extract_strided_slice %9 {offsets = [1, 3, 0], sizes = [1, 1, 128], strides = [1, 1, 1]} : vector<2x7x128xf32> to vector<1x1x128xf32>
    %52 = vector.shape_cast %51 : vector<1x1x128xf32> to vector<1x128xf32>
    %53 = vector.broadcast %52 : vector<1x128xf32> to vector<32x128xf32>
    %54 = arith.mulf %45, %53 : vector<32x128xf32>
    %55 = arith.addf %44, %54 : vector<32x128xf32>
    %c9 = arith.constant 9 : index
    %c0_19 = arith.constant 0 : index
    %56 = vector.load %arg14[%c9, %c0_19] : memref<48x128xf32, #tpu.memory_space<vmem>>, vector<32x128xf32>
    %57 = vector.extract_strided_slice %9 {offsets = [0, 4, 0], sizes = [1, 1, 128], strides = [1, 1, 1]} : vector<2x7x128xf32> to vector<1x1x128xf32>
    %58 = vector.shape_cast %57 : vector<1x1x128xf32> to vector<1x128xf32>
    %59 = vector.broadcast %58 : vector<1x128xf32> to vector<32x128xf32>
    %60 = arith.mulf %56, %59 : vector<32x128xf32>
    %61 = arith.addf %50, %60 : vector<32x128xf32>
    %62 = vector.extract_strided_slice %9 {offsets = [1, 4, 0], sizes = [1, 1, 128], strides = [1, 1, 1]} : vector<2x7x128xf32> to vector<1x1x128xf32>
    %63 = vector.shape_cast %62 : vector<1x1x128xf32> to vector<1x128xf32>
    %64 = vector.broadcast %63 : vector<1x128xf32> to vector<32x128xf32>
    %65 = arith.mulf %56, %64 : vector<32x128xf32>
    %66 = arith.addf %55, %65 : vector<32x128xf32>
    %c10 = arith.constant 10 : index
    %c0_20 = arith.constant 0 : index
    %67 = vector.load %arg14[%c10, %c0_20] : memref<48x128xf32, #tpu.memory_space<vmem>>, vector<32x128xf32>
    %68 = vector.extract_strided_slice %9 {offsets = [0, 5, 0], sizes = [1, 1, 128], strides = [1, 1, 1]} : vector<2x7x128xf32> to vector<1x1x128xf32>
    %69 = vector.shape_cast %68 : vector<1x1x128xf32> to vector<1x128xf32>
    %70 = vector.broadcast %69 : vector<1x128xf32> to vector<32x128xf32>
    %71 = arith.mulf %67, %70 : vector<32x128xf32>
    %72 = arith.addf %61, %71 : vector<32x128xf32>
    %73 = vector.extract_strided_slice %9 {offsets = [1, 5, 0], sizes = [1, 1, 128], strides = [1, 1, 1]} : vector<2x7x128xf32> to vector<1x1x128xf32>
    %74 = vector.shape_cast %73 : vector<1x1x128xf32> to vector<1x128xf32>
    %75 = vector.broadcast %74 : vector<1x128xf32> to vector<32x128xf32>
    %76 = arith.mulf %67, %75 : vector<32x128xf32>
    %77 = arith.addf %66, %76 : vector<32x128xf32>
    %c11 = arith.constant 11 : index
    %c0_21 = arith.constant 0 : index
    %78 = vector.load %arg14[%c11, %c0_21] : memref<48x128xf32, #tpu.memory_space<vmem>>, vector<32x128xf32>
    %79 = vector.extract_strided_slice %9 {offsets = [0, 6, 0], sizes = [1, 1, 128], strides = [1, 1, 1]} : vector<2x7x128xf32> to vector<1x1x128xf32>
    %80 = vector.shape_cast %79 : vector<1x1x128xf32> to vector<1x128xf32>
    %81 = vector.broadcast %80 : vector<1x128xf32> to vector<32x128xf32>
    %82 = arith.mulf %78, %81 : vector<32x128xf32>
    %83 = arith.addf %72, %82 : vector<32x128xf32>
    %84 = vector.extract_strided_slice %9 {offsets = [1, 6, 0], sizes = [1, 1, 128], strides = [1, 1, 1]} : vector<2x7x128xf32> to vector<1x1x128xf32>
    %85 = vector.shape_cast %84 : vector<1x1x128xf32> to vector<1x128xf32>
    %86 = vector.broadcast %85 : vector<1x128xf32> to vector<32x128xf32>
    %87 = arith.mulf %78, %86 : vector<32x128xf32>
    %88 = arith.addf %77, %87 : vector<32x128xf32>
    %c0_22 = arith.constant 0 : index
    %c0_23 = arith.constant 0 : index
    %c0_24 = arith.constant 0 : index
    %89 = vector.load %arg5[%c0_22, %c0_23, %c0_24] : memref<2x1x128xf32, #tpu.memory_space<vmem>>, vector<1x1x128xf32>
    %90 = vector.shape_cast %89 : vector<1x1x128xf32> to vector<1x128xf32>
    %91 = vector.broadcast %90 : vector<1x128xf32> to vector<32x128xf32>
    %92 = arith.addf %83, %91 : vector<32x128xf32>
    %cst_25 = arith.constant dense<0.000000e+00> : vector<32xf32>
    %93 = vector.multi_reduction <add>, %92, %cst_25 [1] : vector<32x128xf32> to vector<32xf32>
    %94 = vector.shape_cast %93 : vector<32xf32> to vector<32x1xf32>
    %cst_26 = arith.constant 1.280000e+02 : f32
    %95 = vector.broadcast %cst_26 : f32 to vector<32x1xf32>
    %96 = arith.divf %94, %95 : vector<32x1xf32>
    %97 = vector.broadcast %96 : vector<32x1xf32> to vector<32x128xf32>
    %98 = arith.subf %92, %97 : vector<32x128xf32>
    %99 = arith.mulf %98, %98 : vector<32x128xf32>
    %cst_27 = arith.constant dense<0.000000e+00> : vector<32xf32>
    %100 = vector.multi_reduction <add>, %99, %cst_27 [1] : vector<32x128xf32> to vector<32xf32>
    %101 = vector.shape_cast %100 : vector<32xf32> to vector<32x1xf32>
    %cst_28 = arith.constant 1.280000e+02 : f32
    %102 = vector.broadcast %cst_28 : f32 to vector<32x1xf32>
    %103 = arith.divf %101, %102 : vector<32x1xf32>
    %cst_29 = arith.constant 9.99999997E-7 : f32
    %104 = vector.broadcast %cst_29 : f32 to vector<32x1xf32>
    %105 = arith.addf %103, %104 : vector<32x1xf32>
    %106 = math.rsqrt %105 : vector<32x1xf32>
    %107 = vector.broadcast %106 : vector<32x1xf32> to vector<32x128xf32>
    %108 = arith.mulf %98, %107 : vector<32x128xf32>
    %c0_30 = arith.constant 0 : index
    %c0_31 = arith.constant 0 : index
    %c0_32 = arith.constant 0 : index
    %109 = vector.load %arg6[%c0_30, %c0_31, %c0_32] : memref<2x1x128xf32, #tpu.memory_space<vmem>>, vector<1x1x128xf32>
    %110 = vector.shape_cast %109 : vector<1x1x128xf32> to vector<1x128xf32>
    %111 = vector.broadcast %110 : vector<1x128xf32> to vector<32x128xf32>
    %112 = arith.mulf %108, %111 : vector<32x128xf32>
    %c0_33 = arith.constant 0 : index
    %c0_34 = arith.constant 0 : index
    %c0_35 = arith.constant 0 : index
    %113 = vector.load %arg7[%c0_33, %c0_34, %c0_35] : memref<2x1x128xf32, #tpu.memory_space<vmem>>, vector<1x1x128xf32>
    %114 = vector.shape_cast %113 : vector<1x1x128xf32> to vector<1x128xf32>
    %115 = vector.broadcast %114 : vector<1x128xf32> to vector<32x128xf32>
    %116 = arith.addf %112, %115 : vector<32x128xf32>
    %117 = arith.truncf %116 : vector<32x128xf32> to vector<32x128xbf16>
    %c0_36 = arith.constant 0 : index
    %c0_37 = arith.constant 0 : index
    %c0_38 = arith.constant 0 : index
    %118 = vector.load %arg8[%c0_36, %c0_37, %c0_38] : memref<2x128x512xbf16, #tpu.memory_space<vmem>>, vector<1x128x512xbf16>
    %119 = vector.shape_cast %118 : vector<1x128x512xbf16> to vector<128x512xbf16>
    %cst_39 = arith.constant dense<0.000000e+00> : vector<32x512xf32>
    %120 = tpu.matmul %117, %119, %cst_39 {dimension_numbers = #tpu.dot_dimension_numbers<[1], [0], [0], [1], [0, 0, 1, 1], [], []>} : vector<32x128xbf16>, vector<128x512xbf16>, vector<32x512xf32> -> vector<32x512xf32>
    %c0_40 = arith.constant 0 : index
    %c0_41 = arith.constant 0 : index
    %c0_42 = arith.constant 0 : index
    %121 = vector.load %arg9[%c0_40, %c0_41, %c0_42] : memref<2x1x512xf32, #tpu.memory_space<vmem>>, vector<1x1x512xf32>
    %122 = vector.shape_cast %121 : vector<1x1x512xf32> to vector<1x512xf32>
    %123 = vector.broadcast %122 : vector<1x512xf32> to vector<32x512xf32>
    %124 = arith.addf %120, %123 : vector<32x512xf32>
    %cst_43 = arith.constant 5.000000e-01 : f32
    %125 = vector.broadcast %cst_43 : f32 to vector<32x512xf32>
    %126 = arith.mulf %125, %124 : vector<32x512xf32>
    %cst_44 = arith.constant 4.471500e-02 : f32
    %127 = vector.broadcast %cst_44 : f32 to vector<32x512xf32>
    %128 = arith.mulf %127, %124 : vector<32x512xf32>
    %129 = arith.mulf %128, %124 : vector<32x512xf32>
    %130 = arith.mulf %129, %124 : vector<32x512xf32>
    %131 = arith.addf %124, %130 : vector<32x512xf32>
    %cst_45 = arith.constant 0.797884583 : f32
    %132 = vector.broadcast %cst_45 : f32 to vector<32x512xf32>
    %133 = arith.mulf %132, %131 : vector<32x512xf32>
    %134 = math.tanh %133 : vector<32x512xf32>
    %cst_46 = arith.constant 1.000000e+00 : f32
    %135 = vector.broadcast %cst_46 : f32 to vector<32x512xf32>
    %136 = arith.addf %135, %134 : vector<32x512xf32>
    %137 = arith.mulf %126, %136 : vector<32x512xf32>
    %138 = arith.truncf %137 : vector<32x512xf32> to vector<32x512xbf16>
    %c0_47 = arith.constant 0 : index
    %c0_48 = arith.constant 0 : index
    %c0_49 = arith.constant 0 : index
    %139 = vector.load %arg10[%c0_47, %c0_48, %c0_49] : memref<2x512x128xbf16, #tpu.memory_space<vmem>>, vector<1x512x128xbf16>
    %140 = vector.shape_cast %139 : vector<1x512x128xbf16> to vector<512x128xbf16>
    %cst_50 = arith.constant dense<0.000000e+00> : vector<32x128xf32>
    %141 = tpu.matmul %138, %140, %cst_50 {dimension_numbers = #tpu.dot_dimension_numbers<[1], [0], [0], [1], [0, 0, 1, 1], [], []>} : vector<32x512xbf16>, vector<512x128xbf16>, vector<32x128xf32> -> vector<32x128xf32>
    %c0_51 = arith.constant 0 : index
    %c0_52 = arith.constant 0 : index
    %c0_53 = arith.constant 0 : index
    %142 = vector.load %arg11[%c0_51, %c0_52, %c0_53] : memref<2x1x128xf32, #tpu.memory_space<vmem>>, vector<1x1x128xf32>
    %143 = vector.shape_cast %142 : vector<1x1x128xf32> to vector<1x128xf32>
    %144 = vector.broadcast %143 : vector<1x128xf32> to vector<32x128xf32>
    %145 = arith.addf %141, %144 : vector<32x128xf32>
    %c0_54 = arith.constant 0 : index
    %c0_55 = arith.constant 0 : index
    %c0_56 = arith.constant 0 : index
    %146 = vector.load %arg12[%c0_54, %c0_55, %c0_56] : memref<2x1x128xf32, #tpu.memory_space<vmem>>, vector<1x1x128xf32>
    %147 = vector.shape_cast %146 : vector<1x1x128xf32> to vector<1x128xf32>
    %148 = vector.broadcast %147 : vector<1x128xf32> to vector<32x128xf32>
    %149 = arith.mulf %145, %148 : vector<32x128xf32>
    %150 = arith.addf %1, %149 : vector<32x128xf32>
    %c1 = arith.constant 1 : index
    %c0_57 = arith.constant 0 : index
    %c0_58 = arith.constant 0 : index
    %151 = vector.load %arg5[%c1, %c0_57, %c0_58] : memref<2x1x128xf32, #tpu.memory_space<vmem>>, vector<1x1x128xf32>
    %152 = vector.shape_cast %151 : vector<1x1x128xf32> to vector<1x128xf32>
    %153 = vector.broadcast %152 : vector<1x128xf32> to vector<32x128xf32>
    %154 = arith.addf %88, %153 : vector<32x128xf32>
    %cst_59 = arith.constant dense<0.000000e+00> : vector<32xf32>
    %155 = vector.multi_reduction <add>, %154, %cst_59 [1] : vector<32x128xf32> to vector<32xf32>
    %156 = vector.shape_cast %155 : vector<32xf32> to vector<32x1xf32>
    %cst_60 = arith.constant 1.280000e+02 : f32
    %157 = vector.broadcast %cst_60 : f32 to vector<32x1xf32>
    %158 = arith.divf %156, %157 : vector<32x1xf32>
    %159 = vector.broadcast %158 : vector<32x1xf32> to vector<32x128xf32>
    %160 = arith.subf %154, %159 : vector<32x128xf32>
    %161 = arith.mulf %160, %160 : vector<32x128xf32>
    %cst_61 = arith.constant dense<0.000000e+00> : vector<32xf32>
    %162 = vector.multi_reduction <add>, %161, %cst_61 [1] : vector<32x128xf32> to vector<32xf32>
    %163 = vector.shape_cast %162 : vector<32xf32> to vector<32x1xf32>
    %cst_62 = arith.constant 1.280000e+02 : f32
    %164 = vector.broadcast %cst_62 : f32 to vector<32x1xf32>
    %165 = arith.divf %163, %164 : vector<32x1xf32>
    %cst_63 = arith.constant 9.99999997E-7 : f32
    %166 = vector.broadcast %cst_63 : f32 to vector<32x1xf32>
    %167 = arith.addf %165, %166 : vector<32x1xf32>
    %168 = math.rsqrt %167 : vector<32x1xf32>
    %169 = vector.broadcast %168 : vector<32x1xf32> to vector<32x128xf32>
    %170 = arith.mulf %160, %169 : vector<32x128xf32>
    %c1_64 = arith.constant 1 : index
    %c0_65 = arith.constant 0 : index
    %c0_66 = arith.constant 0 : index
    %171 = vector.load %arg6[%c1_64, %c0_65, %c0_66] : memref<2x1x128xf32, #tpu.memory_space<vmem>>, vector<1x1x128xf32>
    %172 = vector.shape_cast %171 : vector<1x1x128xf32> to vector<1x128xf32>
    %173 = vector.broadcast %172 : vector<1x128xf32> to vector<32x128xf32>
    %174 = arith.mulf %170, %173 : vector<32x128xf32>
    %c1_67 = arith.constant 1 : index
    %c0_68 = arith.constant 0 : index
    %c0_69 = arith.constant 0 : index
    %175 = vector.load %arg7[%c1_67, %c0_68, %c0_69] : memref<2x1x128xf32, #tpu.memory_space<vmem>>, vector<1x1x128xf32>
    %176 = vector.shape_cast %175 : vector<1x1x128xf32> to vector<1x128xf32>
    %177 = vector.broadcast %176 : vector<1x128xf32> to vector<32x128xf32>
    %178 = arith.addf %174, %177 : vector<32x128xf32>
    %179 = arith.truncf %178 : vector<32x128xf32> to vector<32x128xbf16>
    %c1_70 = arith.constant 1 : index
    %c0_71 = arith.constant 0 : index
    %c0_72 = arith.constant 0 : index
    %180 = vector.load %arg8[%c1_70, %c0_71, %c0_72] : memref<2x128x512xbf16, #tpu.memory_space<vmem>>, vector<1x128x512xbf16>
    %181 = vector.shape_cast %180 : vector<1x128x512xbf16> to vector<128x512xbf16>
    %cst_73 = arith.constant dense<0.000000e+00> : vector<32x512xf32>
    %182 = tpu.matmul %179, %181, %cst_73 {dimension_numbers = #tpu.dot_dimension_numbers<[1], [0], [0], [1], [0, 0, 1, 1], [], []>} : vector<32x128xbf16>, vector<128x512xbf16>, vector<32x512xf32> -> vector<32x512xf32>
    %c1_74 = arith.constant 1 : index
    %c0_75 = arith.constant 0 : index
    %c0_76 = arith.constant 0 : index
    %183 = vector.load %arg9[%c1_74, %c0_75, %c0_76] : memref<2x1x512xf32, #tpu.memory_space<vmem>>, vector<1x1x512xf32>
    %184 = vector.shape_cast %183 : vector<1x1x512xf32> to vector<1x512xf32>
    %185 = vector.broadcast %184 : vector<1x512xf32> to vector<32x512xf32>
    %186 = arith.addf %182, %185 : vector<32x512xf32>
    %cst_77 = arith.constant 5.000000e-01 : f32
    %187 = vector.broadcast %cst_77 : f32 to vector<32x512xf32>
    %188 = arith.mulf %187, %186 : vector<32x512xf32>
    %cst_78 = arith.constant 4.471500e-02 : f32
    %189 = vector.broadcast %cst_78 : f32 to vector<32x512xf32>
    %190 = arith.mulf %189, %186 : vector<32x512xf32>
    %191 = arith.mulf %190, %186 : vector<32x512xf32>
    %192 = arith.mulf %191, %186 : vector<32x512xf32>
    %193 = arith.addf %186, %192 : vector<32x512xf32>
    %cst_79 = arith.constant 0.797884583 : f32
    %194 = vector.broadcast %cst_79 : f32 to vector<32x512xf32>
    %195 = arith.mulf %194, %193 : vector<32x512xf32>
    %196 = math.tanh %195 : vector<32x512xf32>
    %cst_80 = arith.constant 1.000000e+00 : f32
    %197 = vector.broadcast %cst_80 : f32 to vector<32x512xf32>
    %198 = arith.addf %197, %196 : vector<32x512xf32>
    %199 = arith.mulf %188, %198 : vector<32x512xf32>
    %200 = arith.truncf %199 : vector<32x512xf32> to vector<32x512xbf16>
    %c1_81 = arith.constant 1 : index
    %c0_82 = arith.constant 0 : index
    %c0_83 = arith.constant 0 : index
    %201 = vector.load %arg10[%c1_81, %c0_82, %c0_83] : memref<2x512x128xbf16, #tpu.memory_space<vmem>>, vector<1x512x128xbf16>
    %202 = vector.shape_cast %201 : vector<1x512x128xbf16> to vector<512x128xbf16>
    %cst_84 = arith.constant dense<0.000000e+00> : vector<32x128xf32>
    %203 = tpu.matmul %200, %202, %cst_84 {dimension_numbers = #tpu.dot_dimension_numbers<[1], [0], [0], [1], [0, 0, 1, 1], [], []>} : vector<32x512xbf16>, vector<512x128xbf16>, vector<32x128xf32> -> vector<32x128xf32>
    %c1_85 = arith.constant 1 : index
    %c0_86 = arith.constant 0 : index
    %c0_87 = arith.constant 0 : index
    %204 = vector.load %arg11[%c1_85, %c0_86, %c0_87] : memref<2x1x128xf32, #tpu.memory_space<vmem>>, vector<1x1x128xf32>
    %205 = vector.shape_cast %204 : vector<1x1x128xf32> to vector<1x128xf32>
    %206 = vector.broadcast %205 : vector<1x128xf32> to vector<32x128xf32>
    %207 = arith.addf %203, %206 : vector<32x128xf32>
    %c1_88 = arith.constant 1 : index
    %c0_89 = arith.constant 0 : index
    %c0_90 = arith.constant 0 : index
    %208 = vector.load %arg12[%c1_88, %c0_89, %c0_90] : memref<2x1x128xf32, #tpu.memory_space<vmem>>, vector<1x1x128xf32>
    %209 = vector.shape_cast %208 : vector<1x1x128xf32> to vector<1x128xf32>
    %210 = vector.broadcast %209 : vector<1x128xf32> to vector<32x128xf32>
    %211 = arith.mulf %207, %210 : vector<32x128xf32>
    %212 = arith.addf %150, %211 : vector<32x128xf32>
    %c0_91 = arith.constant 0 : index
    %c0_92 = arith.constant 0 : index
    %c0_93 = arith.constant 0 : index
    %213 = vector.load %arg13[%c0_91, %c0_92, %c0_93] : memref<1x32x128xf32, #tpu.memory_space<vmem>>, vector<1x32x128xf32>
    %214 = vector.shape_cast %213 : vector<1x32x128xf32> to vector<32x128xf32>
    %215 = vector.shape_cast %212 : vector<32x128xf32> to vector<1x32x128xf32>
    tpu.vector_store %arg13[%c0_91, %c0_92, %c0_93], %215 {strides = array<i32>} : memref<1x32x128xf32, #tpu.memory_space<vmem>>, vector<1x32x128xf32>,
    return
  }
  func.func @transform_0(%arg0: i32, %arg1: i32) -> (i32, i32, i32) {
    %c0_i32 = arith.constant 0 : i32
    %c0_i32_0 = arith.constant 0 : i32
    return %arg0, %arg1, %c0_i32 : i32, i32, i32
  }
  func.func @transform_1(%arg0: i32, %arg1: i32) -> (i32, i32, i32, i32) {
    %c0_i32 = arith.constant 0 : i32
    %c0_i32_0 = arith.constant 0 : i32
    %c0_i32_1 = arith.constant 0 : i32
    return %arg0, %arg1, %c0_i32, %c0_i32_0 : i32, i32, i32, i32
  }
  func.func @transform_2(%arg0: i32, %arg1: i32) -> (i32, i32, i32) {
    %c0_i32 = arith.constant 0 : i32
    %c0_i32_0 = arith.constant 0 : i32
    %c0_i32_1 = arith.constant 0 : i32
    %c0_i32_2 = arith.constant 0 : i32
    return %c0_i32, %c0_i32_0, %c0_i32_1 : i32, i32, i32
  }
  func.func @transform_3(%arg0: i32, %arg1: i32) -> (i32, i32, i32) {
    %c0_i32 = arith.constant 0 : i32
    %c0_i32_0 = arith.constant 0 : i32
    %c0_i32_1 = arith.constant 0 : i32
    %c0_i32_2 = arith.constant 0 : i32
    return %c0_i32, %c0_i32_0, %c0_i32_1 : i32, i32, i32
  }
  func.func @transform_4(%arg0: i32, %arg1: i32) -> (i32, i32, i32) {
    %c0_i32 = arith.constant 0 : i32
    %c0_i32_0 = arith.constant 0 : i32
    %c0_i32_1 = arith.constant 0 : i32
    %c0_i32_2 = arith.constant 0 : i32
    return %c0_i32, %c0_i32_0, %c0_i32_1 : i32, i32, i32
  }
  func.func @transform_5(%arg0: i32, %arg1: i32) -> (i32, i32, i32) {
    %c0_i32 = arith.constant 0 : i32
    %c0_i32_0 = arith.constant 0 : i32
    %c0_i32_1 = arith.constant 0 : i32
    %c0_i32_2 = arith.constant 0 : i32
    return %c0_i32, %c0_i32_0, %c0_i32_1 : i32, i32, i32
  }
  func.func @transform_6(%arg0: i32, %arg1: i32) -> (i32, i32, i32) {
    %c0_i32 = arith.constant 0 : i32
    %c0_i32_0 = arith.constant 0 : i32
    %c0_i32_1 = arith.constant 0 : i32
    %c0_i32_2 = arith.constant 0 : i32
    return %c0_i32, %c0_i32_0, %c0_i32_1 : i32, i32, i32
  }
  func.func @transform_7(%arg0: i32, %arg1: i32) -> (i32, i32, i32) {
    %c0_i32 = arith.constant 0 : i32
    %c0_i32_0 = arith.constant 0 : i32
    %c0_i32_1 = arith.constant 0 : i32
    %c0_i32_2 = arith.constant 0 : i32
    return %c0_i32, %c0_i32_0, %c0_i32_1 : i32, i32, i32
  }
  func.func @transform_8(%arg0: i32, %arg1: i32) -> (i32, i32, i32) {
    %c0_i32 = arith.constant 0 : i32
    %c0_i32_0 = arith.constant 0 : i32
    %c0_i32_1 = arith.constant 0 : i32
    %c0_i32_2 = arith.constant 0 : i32
    return %c0_i32, %c0_i32_0, %c0_i32_1 : i32, i32, i32
  }
  func.func @transform_9(%arg0: i32, %arg1: i32) -> (i32, i32, i32) {
    %c0_i32 = arith.constant 0 : i32
    %c0_i32_0 = arith.constant 0 : i32
    %c0_i32_1 = arith.constant 0 : i32
    %c0_i32_2 = arith.constant 0 : i32
    return %c0_i32, %c0_i32_0, %c0_i32_1 : i32, i32, i32
  }
  func.func @transform_10(%arg0: i32, %arg1: i32) -> (i32, i32, i32) {
    %c0_i32 = arith.constant 0 : i32
    %c0_i32_0 = arith.constant 0 : i32
    %c0_i32_1 = arith.constant 0 : i32
    %c0_i32_2 = arith.constant 0 : i32
    return %c0_i32, %c0_i32_0, %c0_i32_1 : i32, i32, i32
  }
  func.func @transform_11(%arg0: i32, %arg1: i32) -> (i32, i32, i32) {
    %c0_i32 = arith.constant 0 : i32
    %c0_i32_0 = arith.constant 0 : i32
    return %arg0, %arg1, %c0_i32 : i32, i32, i32
  }
}

module attributes {stable_mosaic.version = 11 : i64} {
  func.func @_parallel_convnext_kernel(%arg0: i32, %arg1: i32, %arg2: memref<1x32x128xf32, #tpu.memory_space<vmem>>, %arg3: memref<1x1x6x128xf32, #tpu.memory_space<vmem>>, %arg4: memref<2x7x128xf32, #tpu.memory_space<vmem>>, %arg5: memref<2x1x128xf32, #tpu.memory_space<vmem>>, %arg6: memref<2x1x128xf32, #tpu.memory_space<vmem>>, %arg7: memref<2x1x128xf32, #tpu.memory_space<vmem>>, %arg8: memref<2x128x512xbf16, #tpu.memory_space<vmem>>, %arg9: memref<2x1x512xf32, #tpu.memory_space<vmem>>, %arg10: memref<2x512x128xbf16, #tpu.memory_space<vmem>>, %arg11: memref<2x1x128xf32, #tpu.memory_space<vmem>>, %arg12: memref<2x1x128xf32, #tpu.memory_space<vmem>>, %arg13: memref<1x32x128xf32, #tpu.memory_space<vmem>>, %arg14: memref<48x128xf32, #tpu.memory_space<vmem>>) attributes {dimension_semantics = [#tpu.dimension_semantics<parallel>, #tpu.dimension_semantics<parallel>], iteration_bounds = array<i64: 2, 3>, scalar_prefetch = 0 : i64, scratch_operands = 1 : i64, tpu.core_type = #tpu.core_type<tc>, window_params = [{transform_indices = @transform_0, window_bounds = array<i64: 1, 32, 128>}, {transform_indices = @transform_1, window_bounds = array<i64: 1, 1, 6, 128>}, {pipeline_mode = #tpu.pipeline_mode<synchronous>, transform_indices = @transform_2, window_bounds = array<i64: 2, 7, 128>}, {pipeline_mode = #tpu.pipeline_mode<synchronous>, transform_indices = @transform_3, window_bounds = array<i64: 2, 1, 128>}, {pipeline_mode = #tpu.pipeline_mode<synchronous>, transform_indices = @transform_4, window_bounds = array<i64: 2, 1, 128>}, {pipeline_mode = #tpu.pipeline_mode<synchronous>, transform_indices = @transform_5, window_bounds = array<i64: 2, 1, 128>}, {pipeline_mode = #tpu.pipeline_mode<synchronous>, transform_indices = @transform_6, window_bounds = array<i64: 2, 128, 512>}, {pipeline_mode = #tpu.pipeline_mode<synchronous>, transform_indices = @transform_7, window_bounds = array<i64: 2, 1, 512>}, {pipeline_mode = #tpu.pipeline_mode<synchronous>, transform_indices = @transform_8, window_bounds = array<i64: 2, 512, 128>}, {pipeline_mode = #tpu.pipeline_mode<synchronous>, transform_indices = @transform_9, window_bounds = array<i64: 2, 1, 128>}, {pipeline_mode = #tpu.pipeline_mode<synchronous>, transform_indices = @transform_10, window_bounds = array<i64: 2, 1, 128>}, {transform_indices = @transform_11, window_bounds = array<i64: 1, 32, 128>}]} {
    %c0 = arith.constant 0 : index
    %c0_0 = arith.constant 0 : index
    %c0_1 = arith.constant 0 : index
    %0 = vector.load %arg2[%c0, %c0_0, %c0_1] : memref<1x32x128xf32, #tpu.memory_space<vmem>>, vector<1x32x128xf32>
    %1 = vector.shape_cast %0 : vector<1x32x128xf32> to vector<32x128xf32>
    %c8 = arith.constant 8 : index
    %c0_2 = arith.constant 0 : index
    %2 = vector.load %arg14[%c8, %c0_2] : memref<48x128xf32, #tpu.memory_space<vmem>>, vector<32x128xf32>
    tpu.vector_store %arg14[%c8, %c0_2], %1 {strides = array<i32>} : memref<48x128xf32, #tpu.memory_space<vmem>>, vector<32x128xf32>,
    %c0_3 = arith.constant 0 : index
    %c0_4 = arith.constant 0 : index
    %c0_5 = arith.constant 0 : index
    %c0_6 = arith.constant 0 : index
    %3 = vector.load %arg3[%c0_3, %c0_4, %c0_5, %c0_6] : memref<1x1x6x128xf32, #tpu.memory_space<vmem>>, vector<1x1x6x128xf32>
    %4 = vector.shape_cast %3 : vector<1x1x6x128xf32> to vector<6x128xf32>
    %5 = vector.extract_strided_slice %4 {offsets = [0, 0], sizes = [3, 128], strides = [1, 1]} : vector<6x128xf32> to vector<3x128xf32>
    %c5 = arith.constant 5 : index
    %c0_7 = arith.constant 0 : index
    %6 = vector.load %arg14[%c5, %c0_7] : memref<48x128xf32, #tpu.memory_space<vmem>>, vector<3x128xf32>
    tpu.vector_store %arg14[%c5, %c0_7], %5 {strides = array<i32>} : memref<48x128xf32, #tpu.memory_space<vmem>>, vector<3x128xf32>,
    %7 = vector.extract_strided_slice %4 {offsets = [3, 0], sizes = [3, 128], strides = [1, 1]} : vector<6x128xf32> to vector<3x128xf32>
    %c40 = arith.constant 40 : index
    %c0_8 = arith.constant 0 : index
    %8 = vector.load %arg14[%c40, %c0_8] : memref<48x128xf32, #tpu.memory_space<vmem>>, vector<3x128xf32>
    tpu.vector_store %arg14[%c40, %c0_8], %7 {strides = array<i32>} : memref<48x128xf32, #tpu.memory_space<vmem>>, vector<3x128xf32>,
    %c0_9 = arith.constant 0 : index
    %c0_10 = arith.constant 0 : index
    %c0_11 = arith.constant 0 : index
    %9 = vector.load %arg4[%c0_9, %c0_10, %c0_11] : memref<2x7x128xf32, #tpu.memory_space<vmem>>, vector<2x7x128xf32>
    %cst = arith.constant 0.000000e+00 : f32
    %10 = vector.broadcast %cst : f32 to vector<32x128xf32>
    %cst_12 = arith.constant 0.000000e+00 : f32
    %11 = vector.broadcast %cst_12 : f32 to vector<32x128xf32>
    %c5_13 = arith.constant 5 : index
    %c0_14 = arith.constant 0 : index
    %12 = vector.load %arg14[%c5_13, %c0_14] : memref<48x128xf32, #tpu.memory_space<vmem>>, vector<32x128xf32>
    %13 = vector.extract_strided_slice %9 {offsets = [0, 0, 0], sizes = [1, 1, 128], strides = [1, 1, 1]} : vector<2x7x128xf32> to vector<1x1x128xf32>
    %14 = vector.shape_cast %13 : vector<1x1x128xf32> to vector<1x128xf32>
    %15 = vector.broadcast %14 : vector<1x128xf32> to vector<32x128xf32>
    %16 = arith.mulf %12, %15 : vector<32x128xf32>
    %17 = arith.addf %10, %16 : vector<32x128xf32>
    %18 = vector.extract_strided_slice %9 {offsets = [1, 0, 0], sizes = [1, 1, 128], strides = [1, 1, 1]} : vector<2x7x128xf32> to vector<1x1x128xf32>
    %19 = vector.shape_cast %18 : vector<1x1x128xf32> to vector<1x128xf32>
    %20 = vector.broadcast %19 : vector<1x128xf32> to vector<32x128xf32>
    %21 = arith.mulf %12, %20 : vector<32x128xf32>
    %22 = arith.addf %11, %21 : vector<32x128xf32>
    %c6 = arith.constant 6 : index
    %c0_15 = arith.constant 0 : index
    %23 = vector.load %arg14[%c6, %c0_15] : memref<48x128xf32, #tpu.memory_space<vmem>>, vector<32x128xf32>
    %24 = vector.extract_strided_slice %9 {offsets = [0, 1, 0], sizes = [1, 1, 128], strides = [1, 1, 1]} : vector<2x7x128xf32> to vector<1x1x128xf32>
    %25 = vector.shape_cast %24 : vector<1x1x128xf32> to vector<1x128xf32>
    %26 = vector.broadcast %25 : vector<1x128xf32> to vector<32x128xf32>
    %27 = arith.mulf %23, %26 : vector<32x128xf32>
    %28 = arith.addf %17, %27 : vector<32x128xf32>
    %29 = vector.extract_strided_slice %9 {offsets = [1, 1, 0], sizes = [1, 1, 128], strides = [1, 1, 1]} : vector<2x7x128xf32> to vector<1x1x128xf32>
    %30 = vector.shape_cast %29 : vector<1x1x128xf32> to vector<1x128xf32>
    %31 = vector.broadcast %30 : vector<1x128xf32> to vector<32x128xf32>
    %32 = arith.mulf %23, %31 : vector<32x128xf32>
    %33 = arith.addf %22, %32 : vector<32x128xf32>
    %c7 = arith.constant 7 : index
    %c0_16 = arith.constant 0 : index
    %34 = vector.load %arg14[%c7, %c0_16] : memref<48x128xf32, #tpu.memory_space<vmem>>, vector<32x128xf32>
    %35 = vector.extract_strided_slice %9 {offsets = [0, 2, 0], sizes = [1, 1, 128], strides = [1, 1, 1]} : vector<2x7x128xf32> to vector<1x1x128xf32>
    %36 = vector.shape_cast %35 : vector<1x1x128xf32> to vector<1x128xf32>
    %37 = vector.broadcast %36 : vector<1x128xf32> to vector<32x128xf32>
    %38 = arith.mulf %34, %37 : vector<32x128xf32>
    %39 = arith.addf %28, %38 : vector<32x128xf32>
    %40 = vector.extract_strided_slice %9 {offsets = [1, 2, 0], sizes = [1, 1, 128], strides = [1, 1, 1]} : vector<2x7x128xf32> to vector<1x1x128xf32>
    %41 = vector.shape_cast %40 : vector<1x1x128xf32> to vector<1x128xf32>
    %42 = vector.broadcast %41 : vector<1x128xf32> to vector<32x128xf32>
    %43 = arith.mulf %34, %42 : vector<32x128xf32>
    %44 = arith.addf %33, %43 : vector<32x128xf32>
    %c8_17 = arith.constant 8 : index
    %c0_18 = arith.constant 0 : index
    %45 = vector.load %arg14[%c8_17, %c0_18] : memref<48x128xf32, #tpu.memory_space<vmem>>, vector<32x128xf32>
    %46 = vector.extract_strided_slice %9 {offsets = [0, 3, 0], sizes = [1, 1, 128], strides = [1, 1, 1]} : vector<2x7x128xf32> to vector<1x1x128xf32>
    %47 = vector.shape_cast %46 : vector<1x1x128xf32> to vector<1x128xf32>
    %48 = vector.broadcast %47 : vector<1x128xf32> to vector<32x128xf32>
    %49 = arith.mulf %45, %48 : vector<32x128xf32>
    %50 = arith.addf %39, %49 : vector<32x128xf32>
    %51 = vector.extract_strided_slice %9 {offsets = [1, 3, 0], sizes = [1, 1, 128], strides = [1, 1, 1]} : vector<2x7x128xf32> to vector<1x1x128xf32>
    %52 = vector.shape_cast %51 : vector<1x1x128xf32> to vector<1x128xf32>
    %53 = vector.broadcast %52 : vector<1x128xf32> to vector<32x128xf32>
    %54 = arith.mulf %45, %53 : vector<32x128xf32>
    %55 = arith.addf %44, %54 : vector<32x128xf32>
    %c9 = arith.constant 9 : index
    %c0_19 = arith.constant 0 : index
    %56 = vector.load %arg14[%c9, %c0_19] : memref<48x128xf32, #tpu.memory_space<vmem>>, vector<32x128xf32>
    %57 = vector.extract_strided_slice %9 {offsets = [0, 4, 0], sizes = [1, 1, 128], strides = [1, 1, 1]} : vector<2x7x128xf32> to vector<1x1x128xf32>
    %58 = vector.shape_cast %57 : vector<1x1x128xf32> to vector<1x128xf32>
    %59 = vector.broadcast %58 : vector<1x128xf32> to vector<32x128xf32>
    %60 = arith.mulf %56, %59 : vector<32x128xf32>
    %61 = arith.addf %50, %60 : vector<32x128xf32>
    %62 = vector.extract_strided_slice %9 {offsets = [1, 4, 0], sizes = [1, 1, 128], strides = [1, 1, 1]} : vector<2x7x128xf32> to vector<1x1x128xf32>
    %63 = vector.shape_cast %62 : vector<1x1x128xf32> to vector<1x128xf32>
    %64 = vector.broadcast %63 : vector<1x128xf32> to vector<32x128xf32>
    %65 = arith.mulf %56, %64 : vector<32x128xf32>
    %66 = arith.addf %55, %65 : vector<32x128xf32>
    %c10 = arith.constant 10 : index
    %c0_20 = arith.constant 0 : index
    %67 = vector.load %arg14[%c10, %c0_20] : memref<48x128xf32, #tpu.memory_space<vmem>>, vector<32x128xf32>
    %68 = vector.extract_strided_slice %9 {offsets = [0, 5, 0], sizes = [1, 1, 128], strides = [1, 1, 1]} : vector<2x7x128xf32> to vector<1x1x128xf32>
    %69 = vector.shape_cast %68 : vector<1x1x128xf32> to vector<1x128xf32>
    %70 = vector.broadcast %69 : vector<1x128xf32> to vector<32x128xf32>
    %71 = arith.mulf %67, %70 : vector<32x128xf32>
    %72 = arith.addf %61, %71 : vector<32x128xf32>
    %73 = vector.extract_strided_slice %9 {offsets = [1, 5, 0], sizes = [1, 1, 128], strides = [1, 1, 1]} : vector<2x7x128xf32> to vector<1x1x128xf32>
    %74 = vector.shape_cast %73 : vector<1x1x128xf32> to vector<1x128xf32>
    %75 = vector.broadcast %74 : vector<1x128xf32> to vector<32x128xf32>
    %76 = arith.mulf %67, %75 : vector<32x128xf32>
    %77 = arith.addf %66, %76 : vector<32x128xf32>
    %c11 = arith.constant 11 : index
    %c0_21 = arith.constant 0 : index
    %78 = vector.load %arg14[%c11, %c0_21] : memref<48x128xf32, #tpu.memory_space<vmem>>, vector<32x128xf32>
    %79 = vector.extract_strided_slice %9 {offsets = [0, 6, 0], sizes = [1, 1, 128], strides = [1, 1, 1]} : vector<2x7x128xf32> to vector<1x1x128xf32>
    %80 = vector.shape_cast %79 : vector<1x1x128xf32> to vector<1x128xf32>
    %81 = vector.broadcast %80 : vector<1x128xf32> to vector<32x128xf32>
    %82 = arith.mulf %78, %81 : vector<32x128xf32>
    %83 = arith.addf %72, %82 : vector<32x128xf32>
    %84 = vector.extract_strided_slice %9 {offsets = [1, 6, 0], sizes = [1, 1, 128], strides = [1, 1, 1]} : vector<2x7x128xf32> to vector<1x1x128xf32>
    %85 = vector.shape_cast %84 : vector<1x1x128xf32> to vector<1x128xf32>
    %86 = vector.broadcast %85 : vector<1x128xf32> to vector<32x128xf32>
    %87 = arith.mulf %78, %86 : vector<32x128xf32>
    %88 = arith.addf %77, %87 : vector<32x128xf32>
    %c0_22 = arith.constant 0 : index
    %c0_23 = arith.constant 0 : index
    %c0_24 = arith.constant 0 : index
    %89 = vector.load %arg5[%c0_22, %c0_23, %c0_24] : memref<2x1x128xf32, #tpu.memory_space<vmem>>, vector<1x1x128xf32>
    %90 = vector.shape_cast %89 : vector<1x1x128xf32> to vector<1x128xf32>
    %91 = vector.broadcast %90 : vector<1x128xf32> to vector<32x128xf32>
    %92 = arith.addf %83, %91 : vector<32x128xf32>
    %cst_25 = arith.constant dense<0.000000e+00> : vector<32xf32>
    %93 = vector.multi_reduction <add>, %92, %cst_25 [1] : vector<32x128xf32> to vector<32xf32>
    %94 = vector.shape_cast %93 : vector<32xf32> to vector<32x1xf32>
    %cst_26 = arith.constant 1.280000e+02 : f32
    %95 = vector.broadcast %cst_26 : f32 to vector<32x1xf32>
    %96 = arith.divf %94, %95 : vector<32x1xf32>
    %97 = vector.broadcast %96 : vector<32x1xf32> to vector<32x128xf32>
    %98 = arith.subf %92, %97 : vector<32x128xf32>
    %99 = arith.mulf %98, %98 : vector<32x128xf32>
    %cst_27 = arith.constant dense<0.000000e+00> : vector<32xf32>
    %100 = vector.multi_reduction <add>, %99, %cst_27 [1] : vector<32x128xf32> to vector<32xf32>
    %101 = vector.shape_cast %100 : vector<32xf32> to vector<32x1xf32>
    %cst_28 = arith.constant 1.280000e+02 : f32
    %102 = vector.broadcast %cst_28 : f32 to vector<32x1xf32>
    %103 = arith.divf %101, %102 : vector<32x1xf32>
    %cst_29 = arith.constant 9.99999997E-7 : f32
    %104 = vector.broadcast %cst_29 : f32 to vector<32x1xf32>
    %105 = arith.addf %103, %104 : vector<32x1xf32>
    %106 = math.rsqrt %105 : vector<32x1xf32>
    %107 = vector.broadcast %106 : vector<32x1xf32> to vector<32x128xf32>
    %108 = arith.mulf %98, %107 : vector<32x128xf32>
    %c0_30 = arith.constant 0 : index
    %c0_31 = arith.constant 0 : index
    %c0_32 = arith.constant 0 : index
    %109 = vector.load %arg6[%c0_30, %c0_31, %c0_32] : memref<2x1x128xf32, #tpu.memory_space<vmem>>, vector<1x1x128xf32>
    %110 = vector.shape_cast %109 : vector<1x1x128xf32> to vector<1x128xf32>
    %111 = vector.broadcast %110 : vector<1x128xf32> to vector<32x128xf32>
    %112 = arith.mulf %108, %111 : vector<32x128xf32>
    %c0_33 = arith.constant 0 : index
    %c0_34 = arith.constant 0 : index
    %c0_35 = arith.constant 0 : index
    %113 = vector.load %arg7[%c0_33, %c0_34, %c0_35] : memref<2x1x128xf32, #tpu.memory_space<vmem>>, vector<1x1x128xf32>
    %114 = vector.shape_cast %113 : vector<1x1x128xf32> to vector<1x128xf32>
    %115 = vector.broadcast %114 : vector<1x128xf32> to vector<32x128xf32>
    %116 = arith.addf %112, %115 : vector<32x128xf32>
    %117 = arith.truncf %116 : vector<32x128xf32> to vector<32x128xbf16>
    %c0_36 = arith.constant 0 : index
    %c0_37 = arith.constant 0 : index
    %c0_38 = arith.constant 0 : index
    %118 = vector.load %arg8[%c0_36, %c0_37, %c0_38] : memref<2x128x512xbf16, #tpu.memory_space<vmem>>, vector<1x128x512xbf16>
    %119 = vector.shape_cast %118 : vector<1x128x512xbf16> to vector<128x512xbf16>
    %cst_39 = arith.constant dense<0.000000e+00> : vector<32x512xf32>
    %120 = tpu.matmul %117, %119, %cst_39 {dimension_numbers = #tpu.dot_dimension_numbers<[1], [0], [0], [1], [0, 0, 1, 1], [], []>} : vector<32x128xbf16>, vector<128x512xbf16>, vector<32x512xf32> -> vector<32x512xf32>
    %c0_40 = arith.constant 0 : index
    %c0_41 = arith.constant 0 : index
    %c0_42 = arith.constant 0 : index
    %121 = vector.load %arg9[%c0_40, %c0_41, %c0_42] : memref<2x1x512xf32, #tpu.memory_space<vmem>>, vector<1x1x512xf32>
    %122 = vector.shape_cast %121 : vector<1x1x512xf32> to vector<1x512xf32>
    %123 = vector.broadcast %122 : vector<1x512xf32> to vector<32x512xf32>
    %124 = arith.addf %120, %123 : vector<32x512xf32>
    %cst_43 = arith.constant 5.000000e-01 : f32
    %125 = vector.broadcast %cst_43 : f32 to vector<32x512xf32>
    %126 = arith.mulf %125, %124 : vector<32x512xf32>
    %cst_44 = arith.constant 4.471500e-02 : f32
    %127 = vector.broadcast %cst_44 : f32 to vector<32x512xf32>
    %128 = arith.mulf %127, %124 : vector<32x512xf32>
    %129 = arith.mulf %128, %124 : vector<32x512xf32>
    %130 = arith.mulf %129, %124 : vector<32x512xf32>
    %131 = arith.addf %124, %130 : vector<32x512xf32>
    %cst_45 = arith.constant 0.797884583 : f32
    %132 = vector.broadcast %cst_45 : f32 to vector<32x512xf32>
    %133 = arith.mulf %132, %131 : vector<32x512xf32>
    %134 = math.tanh %133 : vector<32x512xf32>
    %cst_46 = arith.constant 1.000000e+00 : f32
    %135 = vector.broadcast %cst_46 : f32 to vector<32x512xf32>
    %136 = arith.addf %135, %134 : vector<32x512xf32>
    %137 = arith.mulf %126, %136 : vector<32x512xf32>
    %138 = arith.truncf %137 : vector<32x512xf32> to vector<32x512xbf16>
    %c0_47 = arith.constant 0 : index
    %c0_48 = arith.constant 0 : index
    %c0_49 = arith.constant 0 : index
    %139 = vector.load %arg10[%c0_47, %c0_48, %c0_49] : memref<2x512x128xbf16, #tpu.memory_space<vmem>>, vector<1x512x128xbf16>
    %140 = vector.shape_cast %139 : vector<1x512x128xbf16> to vector<512x128xbf16>
    %cst_50 = arith.constant dense<0.000000e+00> : vector<32x128xf32>
    %141 = tpu.matmul %138, %140, %cst_50 {dimension_numbers = #tpu.dot_dimension_numbers<[1], [0], [0], [1], [0, 0, 1, 1], [], []>} : vector<32x512xbf16>, vector<512x128xbf16>, vector<32x128xf32> -> vector<32x128xf32>
    %c0_51 = arith.constant 0 : index
    %c0_52 = arith.constant 0 : index
    %c0_53 = arith.constant 0 : index
    %142 = vector.load %arg11[%c0_51, %c0_52, %c0_53] : memref<2x1x128xf32, #tpu.memory_space<vmem>>, vector<1x1x128xf32>
    %143 = vector.shape_cast %142 : vector<1x1x128xf32> to vector<1x128xf32>
    %144 = vector.broadcast %143 : vector<1x128xf32> to vector<32x128xf32>
    %145 = arith.addf %141, %144 : vector<32x128xf32>
    %c0_54 = arith.constant 0 : index
    %c0_55 = arith.constant 0 : index
    %c0_56 = arith.constant 0 : index
    %146 = vector.load %arg12[%c0_54, %c0_55, %c0_56] : memref<2x1x128xf32, #tpu.memory_space<vmem>>, vector<1x1x128xf32>
    %147 = vector.shape_cast %146 : vector<1x1x128xf32> to vector<1x128xf32>
    %148 = vector.broadcast %147 : vector<1x128xf32> to vector<32x128xf32>
    %149 = arith.mulf %145, %148 : vector<32x128xf32>
    %150 = arith.addf %1, %149 : vector<32x128xf32>
    %c1 = arith.constant 1 : index
    %c0_57 = arith.constant 0 : index
    %c0_58 = arith.constant 0 : index
    %151 = vector.load %arg5[%c1, %c0_57, %c0_58] : memref<2x1x128xf32, #tpu.memory_space<vmem>>, vector<1x1x128xf32>
    %152 = vector.shape_cast %151 : vector<1x1x128xf32> to vector<1x128xf32>
    %153 = vector.broadcast %152 : vector<1x128xf32> to vector<32x128xf32>
    %154 = arith.addf %88, %153 : vector<32x128xf32>
    %cst_59 = arith.constant dense<0.000000e+00> : vector<32xf32>
    %155 = vector.multi_reduction <add>, %154, %cst_59 [1] : vector<32x128xf32> to vector<32xf32>
    %156 = vector.shape_cast %155 : vector<32xf32> to vector<32x1xf32>
    %cst_60 = arith.constant 1.280000e+02 : f32
    %157 = vector.broadcast %cst_60 : f32 to vector<32x1xf32>
    %158 = arith.divf %156, %157 : vector<32x1xf32>
    %159 = vector.broadcast %158 : vector<32x1xf32> to vector<32x128xf32>
    %160 = arith.subf %154, %159 : vector<32x128xf32>
    %161 = arith.mulf %160, %160 : vector<32x128xf32>
    %cst_61 = arith.constant dense<0.000000e+00> : vector<32xf32>
    %162 = vector.multi_reduction <add>, %161, %cst_61 [1] : vector<32x128xf32> to vector<32xf32>
    %163 = vector.shape_cast %162 : vector<32xf32> to vector<32x1xf32>
    %cst_62 = arith.constant 1.280000e+02 : f32
    %164 = vector.broadcast %cst_62 : f32 to vector<32x1xf32>
    %165 = arith.divf %163, %164 : vector<32x1xf32>
    %cst_63 = arith.constant 9.99999997E-7 : f32
    %166 = vector.broadcast %cst_63 : f32 to vector<32x1xf32>
    %167 = arith.addf %165, %166 : vector<32x1xf32>
    %168 = math.rsqrt %167 : vector<32x1xf32>
    %169 = vector.broadcast %168 : vector<32x1xf32> to vector<32x128xf32>
    %170 = arith.mulf %160, %169 : vector<32x128xf32>
    %c1_64 = arith.constant 1 : index
    %c0_65 = arith.constant 0 : index
    %c0_66 = arith.constant 0 : index
    %171 = vector.load %arg6[%c1_64, %c0_65, %c0_66] : memref<2x1x128xf32, #tpu.memory_space<vmem>>, vector<1x1x128xf32>
    %172 = vector.shape_cast %171 : vector<1x1x128xf32> to vector<1x128xf32>
    %173 = vector.broadcast %172 : vector<1x128xf32> to vector<32x128xf32>
    %174 = arith.mulf %170, %173 : vector<32x128xf32>
    %c1_67 = arith.constant 1 : index
    %c0_68 = arith.constant 0 : index
    %c0_69 = arith.constant 0 : index
    %175 = vector.load %arg7[%c1_67, %c0_68, %c0_69] : memref<2x1x128xf32, #tpu.memory_space<vmem>>, vector<1x1x128xf32>
    %176 = vector.shape_cast %175 : vector<1x1x128xf32> to vector<1x128xf32>
    %177 = vector.broadcast %176 : vector<1x128xf32> to vector<32x128xf32>
    %178 = arith.addf %174, %177 : vector<32x128xf32>
    %179 = arith.truncf %178 : vector<32x128xf32> to vector<32x128xbf16>
    %c1_70 = arith.constant 1 : index
    %c0_71 = arith.constant 0 : index
    %c0_72 = arith.constant 0 : index
    %180 = vector.load %arg8[%c1_70, %c0_71, %c0_72] : memref<2x128x512xbf16, #tpu.memory_space<vmem>>, vector<1x128x512xbf16>
    %181 = vector.shape_cast %180 : vector<1x128x512xbf16> to vector<128x512xbf16>
    %cst_73 = arith.constant dense<0.000000e+00> : vector<32x512xf32>
    %182 = tpu.matmul %179, %181, %cst_73 {dimension_numbers = #tpu.dot_dimension_numbers<[1], [0], [0], [1], [0, 0, 1, 1], [], []>} : vector<32x128xbf16>, vector<128x512xbf16>, vector<32x512xf32> -> vector<32x512xf32>
    %c1_74 = arith.constant 1 : index
    %c0_75 = arith.constant 0 : index
    %c0_76 = arith.constant 0 : index
    %183 = vector.load %arg9[%c1_74, %c0_75, %c0_76] : memref<2x1x512xf32, #tpu.memory_space<vmem>>, vector<1x1x512xf32>
    %184 = vector.shape_cast %183 : vector<1x1x512xf32> to vector<1x512xf32>
    %185 = vector.broadcast %184 : vector<1x512xf32> to vector<32x512xf32>
    %186 = arith.addf %182, %185 : vector<32x512xf32>
    %cst_77 = arith.constant 5.000000e-01 : f32
    %187 = vector.broadcast %cst_77 : f32 to vector<32x512xf32>
    %188 = arith.mulf %187, %186 : vector<32x512xf32>
    %cst_78 = arith.constant 4.471500e-02 : f32
    %189 = vector.broadcast %cst_78 : f32 to vector<32x512xf32>
    %190 = arith.mulf %189, %186 : vector<32x512xf32>
    %191 = arith.mulf %190, %186 : vector<32x512xf32>
    %192 = arith.mulf %191, %186 : vector<32x512xf32>
    %193 = arith.addf %186, %192 : vector<32x512xf32>
    %cst_79 = arith.constant 0.797884583 : f32
    %194 = vector.broadcast %cst_79 : f32 to vector<32x512xf32>
    %195 = arith.mulf %194, %193 : vector<32x512xf32>
    %196 = math.tanh %195 : vector<32x512xf32>
    %cst_80 = arith.constant 1.000000e+00 : f32
    %197 = vector.broadcast %cst_80 : f32 to vector<32x512xf32>
    %198 = arith.addf %197, %196 : vector<32x512xf32>
    %199 = arith.mulf %188, %198 : vector<32x512xf32>
    %200 = arith.truncf %199 : vector<32x512xf32> to vector<32x512xbf16>
    %c1_81 = arith.constant 1 : index
    %c0_82 = arith.constant 0 : index
    %c0_83 = arith.constant 0 : index
    %201 = vector.load %arg10[%c1_81, %c0_82, %c0_83] : memref<2x512x128xbf16, #tpu.memory_space<vmem>>, vector<1x512x128xbf16>
    %202 = vector.shape_cast %201 : vector<1x512x128xbf16> to vector<512x128xbf16>
    %cst_84 = arith.constant dense<0.000000e+00> : vector<32x128xf32>
    %203 = tpu.matmul %200, %202, %cst_84 {dimension_numbers = #tpu.dot_dimension_numbers<[1], [0], [0], [1], [0, 0, 1, 1], [], []>} : vector<32x512xbf16>, vector<512x128xbf16>, vector<32x128xf32> -> vector<32x128xf32>
    %c1_85 = arith.constant 1 : index
    %c0_86 = arith.constant 0 : index
    %c0_87 = arith.constant 0 : index
    %204 = vector.load %arg11[%c1_85, %c0_86, %c0_87] : memref<2x1x128xf32, #tpu.memory_space<vmem>>, vector<1x1x128xf32>
    %205 = vector.shape_cast %204 : vector<1x1x128xf32> to vector<1x128xf32>
    %206 = vector.broadcast %205 : vector<1x128xf32> to vector<32x128xf32>
    %207 = arith.addf %203, %206 : vector<32x128xf32>
    %c1_88 = arith.constant 1 : index
    %c0_89 = arith.constant 0 : index
    %c0_90 = arith.constant 0 : index
    %208 = vector.load %arg12[%c1_88, %c0_89, %c0_90] : memref<2x1x128xf32, #tpu.memory_space<vmem>>, vector<1x1x128xf32>
    %209 = vector.shape_cast %208 : vector<1x1x128xf32> to vector<1x128xf32>
    %210 = vector.broadcast %209 : vector<1x128xf32> to vector<32x128xf32>
    %211 = arith.mulf %207, %210 : vector<32x128xf32>
    %212 = arith.addf %150, %211 : vector<32x128xf32>
    %c0_91 = arith.constant 0 : index
    %c0_92 = arith.constant 0 : index
    %c0_93 = arith.constant 0 : index
    %213 = vector.load %arg13[%c0_91, %c0_92, %c0_93] : memref<1x32x128xf32, #tpu.memory_space<vmem>>, vector<1x32x128xf32>
    %214 = vector.shape_cast %213 : vector<1x32x128xf32> to vector<32x128xf32>
    %215 = vector.shape_cast %212 : vector<32x128xf32> to vector<1x32x128xf32>
    tpu.vector_store %arg13[%c0_91, %c0_92, %c0_93], %215 {strides = array<i32>} : memref<1x32x128xf32, #tpu.memory_space<vmem>>, vector<1x32x128xf32>,
    return
  }
  func.func @transform_0(%arg0: i32, %arg1: i32) -> (i32, i32, i32) {
    %c0_i32 = arith.constant 0 : i32
    %c0_i32_0 = arith.constant 0 : i32
    return %arg0, %arg1, %c0_i32 : i32, i32, i32
  }
  func.func @transform_1(%arg0: i32, %arg1: i32) -> (i32, i32, i32, i32) {
    %c0_i32 = arith.constant 0 : i32
    %c0_i32_0 = arith.constant 0 : i32
    %c0_i32_1 = arith.constant 0 : i32
    return %arg0, %arg1, %c0_i32, %c0_i32_0 : i32, i32, i32, i32
  }
  func.func @transform_2(%arg0: i32, %arg1: i32) -> (i32, i32, i32) {
    %c0_i32 = arith.constant 0 : i32
    %c0_i32_0 = arith.constant 0 : i32
    %c0_i32_1 = arith.constant 0 : i32
    %c0_i32_2 = arith.constant 0 : i32
    return %c0_i32, %c0_i32_0, %c0_i32_1 : i32, i32, i32
  }
  func.func @transform_3(%arg0: i32, %arg1: i32) -> (i32, i32, i32) {
    %c0_i32 = arith.constant 0 : i32
    %c0_i32_0 = arith.constant 0 : i32
    %c0_i32_1 = arith.constant 0 : i32
    %c0_i32_2 = arith.constant 0 : i32
    return %c0_i32, %c0_i32_0, %c0_i32_1 : i32, i32, i32
  }
  func.func @transform_4(%arg0: i32, %arg1: i32) -> (i32, i32, i32) {
    %c0_i32 = arith.constant 0 : i32
    %c0_i32_0 = arith.constant 0 : i32
    %c0_i32_1 = arith.constant 0 : i32
    %c0_i32_2 = arith.constant 0 : i32
    return %c0_i32, %c0_i32_0, %c0_i32_1 : i32, i32, i32
  }
  func.func @transform_5(%arg0: i32, %arg1: i32) -> (i32, i32, i32) {
    %c0_i32 = arith.constant 0 : i32
    %c0_i32_0 = arith.constant 0 : i32
    %c0_i32_1 = arith.constant 0 : i32
    %c0_i32_2 = arith.constant 0 : i32
    return %c0_i32, %c0_i32_0, %c0_i32_1 : i32, i32, i32
  }
  func.func @transform_6(%arg0: i32, %arg1: i32) -> (i32, i32, i32) {
    %c0_i32 = arith.constant 0 : i32
    %c0_i32_0 = arith.constant 0 : i32
    %c0_i32_1 = arith.constant 0 : i32
    %c0_i32_2 = arith.constant 0 : i32
    return %c0_i32, %c0_i32_0, %c0_i32_1 : i32, i32, i32
  }
  func.func @transform_7(%arg0: i32, %arg1: i32) -> (i32, i32, i32) {
    %c0_i32 = arith.constant 0 : i32
    %c0_i32_0 = arith.constant 0 : i32
    %c0_i32_1 = arith.constant 0 : i32
    %c0_i32_2 = arith.constant 0 : i32
    return %c0_i32, %c0_i32_0, %c0_i32_1 : i32, i32, i32
  }
  func.func @transform_8(%arg0: i32, %arg1: i32) -> (i32, i32, i32) {
    %c0_i32 = arith.constant 0 : i32
    %c0_i32_0 = arith.constant 0 : i32
    %c0_i32_1 = arith.constant 0 : i32
    %c0_i32_2 = arith.constant 0 : i32
    return %c0_i32, %c0_i32_0, %c0_i32_1 : i32, i32, i32
  }
  func.func @transform_9(%arg0: i32, %arg1: i32) -> (i32, i32, i32) {
    %c0_i32 = arith.constant 0 : i32
    %c0_i32_0 = arith.constant 0 : i32
    %c0_i32_1 = arith.constant 0 : i32
    %c0_i32_2 = arith.constant 0 : i32
    return %c0_i32, %c0_i32_0, %c0_i32_1 : i32, i32, i32
  }
  func.func @transform_10(%arg0: i32, %arg1: i32) -> (i32, i32, i32) {
    %c0_i32 = arith.constant 0 : i32
    %c0_i32_0 = arith.constant 0 : i32
    %c0_i32_1 = arith.constant 0 : i32
    %c0_i32_2 = arith.constant 0 : i32
    return %c0_i32, %c0_i32_0, %c0_i32_1 : i32, i32, i32
  }
  func.func @transform_11(%arg0: i32, %arg1: i32) -> (i32, i32, i32) {
    %c0_i32 = arith.constant 0 : i32
    %c0_i32_0 = arith.constant 0 : i32
    return %arg0, %arg1, %c0_i32 : i32, i32, i32
  }
}

</mosaic_0001>

<bundles_post_ra>
// kernel: tpu_custom_call.1
= control target key start
LH: loop header
LB: loop body
LE: loop exit
PB: predicated region body
PF: predicated region fallthrough
CT: control target
= control target key end

     0   :  { %s4449_s0 = inlined_call_operand.hbm [shape: f32[2,96,128], index: 0, kind: input, shape index: {}]   ;;  %s4450_s1 = inlined_call_operand.vmem [shape: f32[2,3,6,128], index: 1, kind: input, shape index: {}]   ;;  %s4451_s2 = inlined_call_operand.vmem [shape: f32[2,7,128], index: 2, kind: input, shape index: {}]   ;;  %s4452_s3 = inlined_call_operand.vmem [shape: f32[2,1,128], index: 3, kind: input, shape index: {}]   ;;  %s4453_s4 = inlined_call_operand.vmem [shape: f32[2,1,128], index: 4, kind: input, shape index: {}]   ;;  %s4454_s5 = inlined_call_operand.vmem [shape: f32[2,1,128], index: 5, kind: input, shape index: {}]   ;;  %s4455_s6 = inlined_call_operand.hbm [shape: bf16[2,128,512], index: 6, kind: input, shape index: {}]   ;;  %s4456_s7 = inlined_call_operand.vmem [shape: f32[2,1,512], index: 7, kind: input, shape index: {}]   ;;  %s4457_s8 = inlined_call_operand.hbm [shape: bf16[2,512,128], index: 8, kind: input, shape index: {}]   ;;  %s4458_s9 = inlined_call_operand.vmem [shape: f32[2,1,128], index: 9, kind: input, shape index: {}]   ;;  %s4459_s10 = inlined_call_operand.vmem [shape: f32[2,1,128], index: 10, kind: input, shape index: {}]   ;;  %s4460_s11 = inlined_call_operand.hbm [shape: f32[2,96,128], index: 11, kind: output, shape index: {}]  }
   0x1   :  { %4476 = sst [smem:[#allocation17_spill]] %s4453_s4 }
   0x2   :  { %4477 = sst [smem:[#allocation18_spill]] %s4454_s5 }
   0x3   :  { %4478 = sst [smem:[#allocation19_spill]] %s4455_s6 }
   0x4   :  { %4479 = sst [smem:[#allocation20_spill]] %s4456_s7 }
   0x5   :  { %4480 = sst [smem:[#allocation21_spill]] %s4457_s8 }
   0x6   :  { %4481 = sst [smem:[#allocation22_spill]] %s4458_s9 }
   0x7   :  { %4482 = sst [smem:[#allocation23_spill]] %s4459_s10 }
   0x8   :  { %4483 = sst [smem:[#allocation24_spill]] %s4460_s11 }
   0x9   :  { %16 = vsyncpa [#allocation4], 0 }
   0xa   :  { %18 = vsyncpa [#allocation4 + $0x1], 0 }
   0xb   :  { %19 = vsyncpa [#allocation7], 0 }
   0xc   :  { %20 = vsyncpa [#allocation5], 0 }
   0xd   :  { %22 = vsyncpa [#allocation5 + $0x1], 0  ;;  %s3599_s17 = smov 0   ;;  %s3601_s18 = smov 0  }
   0xe   :  { %s3603_s19 = smov 0   ;;  %s3605_s20 = smov 0  }
   0xf   :  { %s3607_s21 = smov 0   ;;  %s3609_s22 = smov 0  }
  0x10   :  { %s3611_s23 = smov 0   ;;  %s3613_s24 = smov 0  }
  0x11 LB: > { %4484 = sst [smem:[#allocation13_spill]] %s3496_s17  ;;  %s2705_s25 = sadd.s32 4294967295, %s3524_s24   ;;  %s3524_s24 = sphi %s3613_s24, %s28_s24   ;;  %s3520_s23 = sphi %s3611_s23, %s4521_s23   ;;  %s3516_s22 = sphi %s3609_s22, %s4520_s22   ;;  %s3512_s21 = sphi %s3607_s21, %s4519_s21   ;;  %s3508_s20 = sphi %s3605_s20, %s4518_s20   ;;  %s3504_s19 = sphi %s3603_s19, %s4517_s19   ;;  %s3500_s18 = sphi %s3601_s18, %s4516_s18   ;;  %s3496_s17 = sphi %s3599_s17, %s4515_s17  }
  0x12   : > { %s2706_s26 = sadd.s32 4294967294, %s3524_s24   ;;  %p62_p0 = scmp.ne.s32.totalorder %s3500_s18, %s3496_s17 }
  0x13   : > { %p3643_p1 = scmp.eq.s32.totalorder %s2705_s25, 0  ;;  %p3647_p2 = scmp.eq.s32.totalorder %s2705_s25, 5 }
  0x14   : > { %p311_p3 = scmp.eq.s32.totalorder %s2706_s26, 5  ;;  %p2707_p5 = scmp.ge.s32.totalorder %s3524_s24, 1 }
  0x15   : > { %s4485_s27 = scalar_select %p3643_p1, 1, 0 }
  0x16   : > { %s4486_s28 = scalar_select %p3647_p2, 1, 0 }
  0x17   : > { %p3653_p4 = por %p3643_p1, %p62_p0  ;;  %p3658_p6 = por %p311_p3, %p62_p0 }
  0x18   : > { %p318_p7 = scmp.lt.s32.totalorder %s3524_s24, 7  ;;  %s3526_s13 = smov [#allocation6]  }
  0x19   : > { %s4487_s29 = scalar_select %p3653_p4, 1, 0 }
  0x1a   : > { %s4488_s30 = scalar_select %p3658_p6, 1, 0 }
  0x1b   : > { %p3663_p8 = pnand %p2707_p5, %p318_p7  ;;  %s342_s14 = sshll.u32 %s3526_s13, 4  ;;  %s343_s14 = int_to_ptr.vmem [resolvable:$true] %s342_s14 }
  0x1c   : > { %4489 = sst [smem:[#allocation14_spill]] %s4488_s30  ;;  %s3527_s16 = smov [#allocation8]  }
  0x1d   : > { %s4490_s12 = scalar_select %p3663_p8, 1, 0 }
  0x1e   : > { %p2996_p9 = pneg %p3663_p8  ;;  %s358_s25 = sshll.u32 %s3527_s16, 4  ;;  %s3675_s25 = int_to_ptr.vmem [resolvable:$true] %s358_s25 }
  0x1f   : > { %s4492_s6 = sld [smem:[#allocation19_spill]] }
  0x20   : > { %p3671_p10 = pnand %p2996_p9, %p3643_p1 }
  0x22   : > { %p3338_p12 = pneg %p3671_p10 }
  0x25   : > { %s3336_s17 = scalar_lea.hbm %s4492_s6, 8192 }
  0x26   : > { %p3337_p11 = scmp.ne.s32.totalorder %s4492_s6, %s3336_s17  ;;  %p3343_p3 = scmp.lt.u32.totalorder %s3336_s17, %s4492_s6 }
  0x28   : > { %p3339_p13 = pnand %p3338_p12, %p3337_p11 }
  0x2a   : > { %p3340_p0 = pneg %p3339_p13 }
  0x2c   : > { %p3345_p5 = pnand %p3343_p3, %p3340_p0 }
  0x2e   : > { %3348 = shalt.err (!%p3345_p5)
}
  0x2f   : > { %s3349_s16 = scalar_lea.vmem %s343_s14, 8192  ;;  %p3357_p1 = scmp.lt.s32.totalorder %s343_s14, %s343_s14 }
  0x30   : > { %p3350_p7 = scmp.ne.s32.totalorder %s343_s14, %s3349_s16  ;;  %p3358_p4 = scmp.lt.s32.totalorder %s3349_s16, %s3349_s16 }
  0x32   : > { %p3352_p9 = pnand %p3350_p7, %p3338_p12  ;;  %p3359_p8 = por %p3358_p4, %p3357_p1 }
  0x34   : > { %p3353_p6 = pneg %p3352_p9 }
  0x36   : > { %p3360_p2 = pnand %p3359_p8, %p3353_p6 }
  0x38   : > { %3363 = shalt.err (!%p3360_p2)
}
  0x39   : > { %s3528_s11 = smov 256   ;;  %s3529_s30 = smov 16  }
  0x3a   : > { %2999 = dma.hbm_to_vmem [thread:$0]  (!%p3671_p10), %s4492_s6, 8192, %s343_s14, [#allocation7], %s3528_s11, %s3528_s11, %s3529_s30  }
  0x3b   : > { %s4493_s8 = sld [smem:[#allocation21_spill]] }
  0x41   : > { %s3364_s13 = scalar_lea.hbm %s4493_s8, 8192 }
  0x42   : > { %p3365_p11 = scmp.ne.s32.totalorder %s4493_s8, %s3364_s13  ;;  %p3371_p4 = scmp.lt.u32.totalorder %s3364_s13, %s4493_s8 }
  0x44   : > { %p3367_p1 = pnand %p3365_p11, %p3338_p12 }
  0x46   : > { %p3368_p2 = pneg %p3367_p1 }
  0x48   : > { %p3373_p6 = pnand %p3371_p4, %p3368_p2 }
  0x4a   : > { %3376 = shalt.err (!%p3373_p6)
}
  0x4b   : > { %s3377_s14 = scalar_lea.vmem %s3675_s25, 8192  ;;  %p3385_p3 = scmp.lt.s32.totalorder %s3675_s25, %s3675_s25 }
  0x4c   : > { %p3378_p8 = scmp.ne.s32.totalorder %s3675_s25, %s3377_s14  ;;  %p3386_p5 = scmp.lt.s32.totalorder %s3377_s14, %s3377_s14 }
  0x4e   : > { %p3380_p13 = pnand %p3378_p8, %p3338_p12  ;;  %p3387_p7 = por %p3386_p5, %p3385_p3 }
  0x50   : > { %p3381_p0 = pneg %p3380_p13 }
  0x52   : > { %p3388_p9 = pnand %p3387_p7, %p3381_p0 }
  0x54   : > { %3391 = shalt.err (!%p3388_p9)
}
  0x55   : > { %s3530_s4 = smov 64   ;;  %s3531_s5 = smov 4  }
  0x56   : > { %3002 = dma.hbm_to_vmem [thread:$0]  (!%p3671_p10), %s4493_s8, 8192, %s3675_s25, [#allocation7], %s3530_s4, %s3530_s4, %s3531_s5  }
  0x57   : > { %s37_s30 = sadd.s32 1, %s3516_s22  ;;  %s40_s9 = sadd.s32 1, %s3520_s23 }
  0x58   : > { %p38_p12 = scmp.ge.s32.totalorder %s37_s30, 3  ;;  %s49_s10 = sadd.s32 1, %s3504_s19 }
  0x59   : > { %p56_p11 = scmp.ne.s32.totalorder %s3504_s19, %s3500_s18  ;;  %p57_p1 = scmp.eq.s32.totalorder %s3524_s24, 0 }
  0x5a   : > { %s4523_s30 = smov (%p38_p12, %s37_s30), 0  ;;  %s4525_s9 = smov (!%p38_p12, %s40_s9), %s3520_s23 }
  0x5b   : > { %4494 = sst [smem:[#allocation15_spill]] %s4523_s30  ;;  %s45_s17 = ssub.s32 %s3516_s22, %s4523_s30 }
  0x5c   : > { %p3735_p2 = por %p57_p1, %p56_p11  ;;  %p42_p10 = scmp.ge.s32.totalorder %s4525_s9, 2 }
  0x5d   : > { %p4496_p4 = scmp.ne.s32.totalorder %s4486_s28, 0  ;;  %p3013_p8 = scmp.lt.s32.totalorder %s3524_s24, 6 }
  0x5e   : > { %s378_s26 = sand.u32 1, %s3504_s19   ;;  %s4527_s9 = smov (%p42_p10, %s4525_s9), 0 }
  0x5f   : > { %p3741_p6 = por %p4496_p4, %p56_p11  ;;  %4498 = sst [smem:[#allocation16_spill]] %s4527_s9 }
  0x60   : > { %s2711_s13 = sshll.u32 %s378_s26, 5  ;;  %s44_s16 = ssub.s32 %s3520_s23, %s4527_s9 }
  0x61   : > { %s46_s14 = sor.u32 %s45_s17, %s44_s16  ;;  %s2712_s4 = sshll.u32 %s3516_s22, 2 }
  0x62   : > { %p47_p13 = scmp.eq.s32.totalorder %s46_s14, 0  ;;  %s2981_s5 = smul.u32 12, %s3520_s23 }
  0x63   : > { %s382_s7 = scalar_lea.vmem [#allocation3], %s2711_s13  ;;  %p3755_p0 = pnand %p3013_p8, %p3735_p2 }
  0x64   : > { %s391_s11 = sshll.u32 %s382_s7, 4  ;;  %s388_s8 = sadd.s32 %s2981_s5, %s2712_s4  ;;  %s3762_s11 = int_to_ptr.vmem [resolvable:$true] %s391_s11 }
  0x65   : > { %s3760_s6 = scalar_select %p47_p13, %s3504_s19, %s49_s10  }
  0x66   : > { %s2713_s30 = sshll.u32 %s388_s8, 7  ;;  %s3769_s15 = scalar_lea.sflag [#allocation4], %s378_s26 }
  0x67   : > { %s3767_s16 = scalar_lea.hbm %s4449_s0, %s2713_s30  ;;  %p3394_p5 = pneg %p3755_p0 }
  0x68   : > { %s3392_s13 = scalar_lea.hbm %s3767_s16, 512  ;;  %s3397_s9 = scalar_lea.hbm %s4449_s0, 3072 }
  0x69   : > { %p3393_p3 = scmp.ne.s32.totalorder %s3767_s16, %s3392_s13  ;;  %p3398_p12 = scmp.lt.u32.totalorder %s3767_s16, %s4449_s0 }
  0x6a   : > { %p3399_p11 = scmp.lt.u32.totalorder %s3397_s9, %s3392_s13  ;;  %p3401_p2 = scmp.lt.u32.totalorder %s3392_s13, %s3767_s16 }
  0x6b   : > { %p3395_p7 = pnand %p3394_p5, %p3393_p3 }
  0x6c   : > { %p3400_p1 = por %p3399_p11, %p3398_p12 }
  0x6d   : > { %p3396_p9 = pneg %p3395_p7 }
  0x6e   : > { %p3402_p10 = por %p3401_p2, %p3400_p1 }
  0x70   : > { %p3403_p4 = pnand %p3402_p10, %p3396_p9 }
  0x72   : > { %3406 = shalt.err (!%p3403_p4)
}
  0x73   : > { %s3407_s26 = scalar_lea.vmem %s3762_s11, 512  ;;  %s3532_s4 = smov [#allocation3]  }
  0x74   : > { %p3408_p8 = scmp.ne.s32.totalorder %s3762_s11, %s3407_s26  ;;  %s3412_s5 = sshll.u32 %s3532_s4, 4  ;;  %s3413_s5 = int_to_ptr.vmem [resolvable:$false] %s3412_s5 }
  0x75   : > { %s3414_s7 = scalar_lea.vmem %s3413_s5, 1024  ;;  %p3415_p7 = scmp.lt.s32.totalorder %s3762_s11, %s3413_s5 }
  0x76   : > { %p3410_p13 = pnand %p3408_p8, %p3394_p5  ;;  %p3416_p12 = scmp.lt.s32.totalorder %s3414_s7, %s3407_s26 }
  0x78   : > { %p3411_p3 = pneg %p3410_p13  ;;  %p3417_p11 = por %p3416_p12, %p3415_p7 }
  0x7a   : > { %p3418_p1 = pnand %p3417_p11, %p3411_p3 }
  0x7c   : > { %3421 = shalt.err (!%p3418_p1)
}
  0x7d   : > { %s3533_s17 = smov 128   ;;  %s3534_s13 = smov 8  }
  0x7e   : > { %3006 = dma.hbm_to_vmem [thread:$0]  (!%p3755_p0), %s3767_s16, 512, %s3762_s11, %s3769_s15, %s3533_s17, %s3533_s17, %s3534_s13  }
  0x7f   : > { %p4500_p5 = scmp.ne.s32.totalorder %s4490_s12, 0 }
  0x80   : > { %s3800_s8 = sand.u32 (!%p4500_p5), 1, %s3500_s18   ;;  %p4501_p9 = scmp.ne.s32.totalorder (!%p4500_p5), %s4487_s29, 0 }
  0x81   : > { %414 = sbr.rel (%p4500_p5) target bundleno = 1279 (0x4ff), region = 64  ;;  %s2715_s10 = sshll.u32 (!%p4500_p5), %s3800_s8, 5 }
  0x82   : > { %s417_s9 = scalar_lea.sflag (!%p4500_p5), [#allocation4], %s3800_s8  ;;  %s420_s30 = scalar_lea.vmem (!%p4500_p5), [#allocation3], %s2715_s10 }
  0x88   : > { %3483 = dma.done.wait (%p4501_p9), %s417_s9, 512  }
  0x89   : > { %3485 = vsyncadd (%p4501_p9), %s417_s9, 4294966784  ;;  %p4502_p0 = scmp.ne.s32.totalorder %s4485_s27, 0 }
  0x8b   : > { %3487 = dma.done.wait (%p4502_p0), [#allocation7], 16384  }
  0x8c   : > { %3489 = vsyncadd (%p4502_p0), [#allocation7], 4294950912  ;;  %p476_p2 = scmp.lt.s32.totalorder %s3512_s21, 1  ;;  %p478_p10 = scmp.lt.s32.totalorder %s3508_s20, 2  ;;  %v503_v0 = vlaneseq  ;;  %v3820_v2 = vld [vmem:[%s420_s30] sm:$0xff]  ;;  %v3822_v3 = vld [vmem:[%s420_s30 + $0x8] sm:$0xff] }
  0x8d   : > { %490 = vst [vmem:[#allocation2 + $0x8] sm:$0xff] %v3820_v2  ;;  %491 = vst [vmem:[#allocation2 + $0x10] sm:$0xff] %v3822_v3  ;;  %v3829_v4 = vld [vmem:[%s420_s30 + $0x10] sm:$0xff]  ;;  %v3831_v5 = vld [vmem:[%s420_s30 + $0x18] sm:$0xff]  ;;  %s4505_s27 = sld [smem:[#allocation18_spill]]  ;;  %s4506_s26 = sld [smem:[#allocation20_spill]] }
  0x8e   : > { %s477_s12 = scalar_select %p476_p2, %s3512_s21, 1  ;;  %v3818_v1 = vshrl.u32 %v503_v0, 7  ;;  %v497_v7 = vld [vmem:[%s4451_s2] sm:$0x7f]  ;;  %492 = vst [vmem:[#allocation2 + $0x18] sm:$0xff] %v3829_v4  ;;  %493 = vst [vmem:[#allocation2 + $0x20] sm:$0xff] %v3831_v5 }
  0x8f   : > { %s479_s11 = scalar_select %p478_p10, %s3508_s20, 2 }
  0x90   : > { %s2982_s28 = smul.u32 3, %s477_s12  ;;  %v3839_v8 = vsub.s32 0, %v3818_v1  ;;  %v3842_v9 = vsub.s32 1, %v3818_v1  ;;  %v3845_v10 = vsub.s32 2, %v3818_v1  ;;  %v3848_v11 = vsub.s32 3, %v3818_v1  ;;  %s4507_s30 = sld [smem:[#allocation22_spill]] }
  0x91   : > { %v617_v12 = vsub.s32 4, %v3818_v1  ;;  %v645_v13 = vsub.s32 5, %v3818_v1  ;;  %v4475_v17 = vsub.s32 6, %v3818_v1  ;;  %s4508_s4 = sld [smem:[#allocation23_spill]]  ;;  %s2983_s17 = smul.u32 12, %s3512_s21 }
  0x92   : > { %s481_s16 = sadd.s32 %s2982_s28, %s479_s11  ;;  %v506_v14 = vrot.slane %v497_v7, %v3839_v8  ;;  %v534_v15 = vrot.slane %v497_v7, %v3842_v9  ;;  %v562_v16 = vrot.slane %v497_v7, %v3845_v10  ;;  %v590_v18 = vrot.slane %v497_v7, %v3848_v11  ;;  %s4504_s28 = sld [smem:[#allocation17_spill]] }
  0x93   : > { %s2719_s29 = sshll.u32 %s481_s16, 3  ;;  %v3859_v19 = vrot.slane %v497_v7, %v617_v12  ;;  %v3875_v26 = vrot.slane %v497_v7, %v645_v13  ;;  %v674_v35 = vrot.slane %v497_v7, %v4475_v17  ;;  %s4380_s13 = scalar_lea.vmem [#allocation9], %s2715_s10 }
  0x94   : > { %s483_s14 = scalar_lea.vmem %s4450_s1, %s2719_s29  ;;  %v3883_v33 = vld [vmem:[#allocation2 + $0x9] sm:$0xff]  ;;  %v591_v37 = vmul.f32 %v590_v18, %v3820_v2  ;;  %v593_v39 = vmul.f32 %v590_v18, %v3829_v4  ;;  %v592_v43 = vmul.f32 %v590_v18, %v3822_v3  ;;  %v594_v58 = vmul.f32 %v590_v18, %v3831_v5  ;;  %s2865_s9 = sshll.u32 %s3508_s20, 2 }
  0x95   : > { %v494_v6 = vld [vmem:[%s483_s14] sm:$0x3f]  ;;  %v3861_v20 = vld [vmem:[#allocation2 + $0x15] sm:$0xff]  ;;  %v3885_v34 = vld [vmem:[#allocation2 + $0xa] sm:$0xff]  ;;  %v619_v52 = vmul.f32 %v3859_v19, %v3883_v33  ;;  %s2575_s21 = sadd.s32 %s2983_s17, %s2865_s9  ;;  %s2578_s10 = sshll.u32 %s4380_s13, 4  ;;  %s4388_s10 = int_to_ptr.vmem [resolvable:$true] %s2578_s10 }
  0x96   : > { %495 = vst [vmem:[#allocation2 + $0x5] sm:$0x7] %v494_v6  ;;  %496 = vst [vmem:[#allocation2 + $0x25] sm:$0x38] %v494_v6  ;;  %v3863_v21 = vld [vmem:[#allocation2 + $0x16] sm:$0xff]  ;;  %v509_v27 = vmul.f32 %v506_v14, %v3861_v20  ;;  %v3893_v40 = vld [vmem:[#allocation2 + $0xd] sm:$0xff]  ;;  %v647_v7 = vmul.f32 %v3875_v26, %v3885_v34 }
  0x97   : > { %v3865_v22 = vld [vmem:[#allocation2 + $0x17] sm:$0xff]  ;;  %v537_v28 = vmul.f32 %v534_v15, %v3863_v21  ;;  %v3895_v41 = vld [vmem:[#allocation2 + $0xe] sm:$0xff]  ;;  %v508_v48 = vmul.f32 %v506_v14, %v3893_v40  ;;  %v3919_v57 = vld [vmem:[#allocation2 + $0x1f] sm:$0xff]  ;;  %s2866_s20 = sshll.u32 %s2575_s21, 7  ;;  %s4509_s16 = sld [smem:[#allocation24_spill]] }
  0x98   : > { %v565_v29 = vmul.f32 %v562_v16, %v3865_v22  ;;  %v3889_v36 = vld [vmem:[#allocation2 + $0x19] sm:$0xff]  ;;  %v3897_v42 = vld [vmem:[#allocation2 + $0xf] sm:$0xff]  ;;  %v536_v49 = vmul.f32 %v534_v15, %v3895_v41  ;;  %v566_v18 = vmul.f32 %v562_v16, %v3919_v57  ;;  %s2563_s15 = scalar_lea.sflag [#allocation5], %s3800_s8  ;;  %s3422_s14 = scalar_lea.vmem %s4388_s10, 512 }
  0x99   : > { %v541_v38 = vadd.f32 %v537_v28, %v509_v27  ;;  %v3900_v45 = vld [vmem:[#allocation2 + $0xb] sm:$0xff]  ;;  %v3902_v46 = vld [vmem:[#allocation2 + $0x1a] sm:$0xff]  ;;  %v564_v50 = vmul.f32 %v562_v16, %v3897_v42  ;;  %v621_v54 = vmul.f32 %v3859_v19, %v3889_v36  ;;  %p3423_p4 = scmp.ne.s32.totalorder %s4388_s10, %s3422_s14  ;;  %s3536_s5 = smov [#allocation9]  }
  0x9a   : > { %v3904_v47 = vld [vmem:[#allocation2 + $0x1b] sm:$0xff]  ;;  %v3909_v51 = vld [vmem:[#allocation2 + $0x11] sm:$0xff]  ;;  %v540_v60 = vadd.f32 %v536_v49, %v508_v48  ;;  %v649_v28 = vmul.f32 %v3875_v26, %v3902_v46  ;;  %s3426_s7 = sshll.u32 %s3536_s5, 4  ;;  %s3427_s7 = int_to_ptr.vmem [resolvable:$false] %s3426_s7 }
  0x9b   : > { %v569_v53 = vadd.f32 %v565_v29, %v541_v38  ;;  %v3915_v55 = vld [vmem:[#allocation2 + $0x1d] sm:$0xff]  ;;  %v3922_v61 = vld [vmem:[#allocation2 + $0x12] sm:$0xff]  ;;  %p3424_p8 = pnand %p3423_p4, %p3741_p6  ;;  %s3428_s17 = scalar_lea.vmem %s3427_s7, 1024 }
  0x9c   : > { %v3917_v56 = vld [vmem:[#allocation2 + $0x1e] sm:$0xff]  ;;  %v3924_v62 = vld [vmem:[#allocation2 + $0x13] sm:$0xff]  ;;  %v510_v63 = vmul.f32 %v506_v14, %v3915_v55  ;;  %p3429_p3 = scmp.lt.s32.totalorder %s4388_s10, %s3427_s7  ;;  %p3430_p7 = scmp.lt.s32.totalorder %s3428_s17, %s3422_s14 }
  0x9d   : > { %v3867_v23 = vld [vmem:[#allocation2 + $0x5] sm:$0xff]  ;;  %v538_v0 = vmul.f32 %v534_v15, %v3917_v56  ;;  %v597_v27 = vadd.f32 %v593_v39, %v569_v53  ;;  %v648_v39 = vmul.f32 %v3875_v26, %v3922_v61  ;;  %s4394_s29 = scalar_lea.hbm %s4509_s16, %s2866_s20  ;;  %p3425_p13 = pneg %p3424_p8 }
  0x9e   : > { %v3869_v24 = vld [vmem:[#allocation2 + $0x6] sm:$0xff]  ;;  %v507_v30 = vmul.f32 %v506_v14, %v3867_v23  ;;  %v620_v14 = vmul.f32 %v3859_v19, %v3909_v51  ;;  %p3431_p12 = por %p3430_p7, %p3429_p3 }
  0x9f   : > { %v3871_v25 = vld [vmem:[#allocation2 + $0x7] sm:$0xff]  ;;  %v535_v31 = vmul.f32 %v534_v15, %v3869_v24  ;;  %v675_v15 = vmul.f32 %v674_v35, %v3900_v45  ;;  %v625_v38 = vadd.f32 %v621_v54, %v597_v27  ;;  %v676_v54 = vmul.f32 %v674_v35, %v3924_v62 }
  0xa0   : > { %v563_v32 = vmul.f32 %v562_v16, %v3871_v25  ;;  %v3928_v6 = vld [vmem:[#allocation2 + $0x21] sm:$0xff]  ;;  %p3432_p11 = pnand %p3431_p12, %p3425_p13 }
  0xa1   : > { %v539_v44 = vadd.f32 %v535_v31, %v507_v30  ;;  %v3935_v29 = vld [vmem:[#allocation2 + $0x22] sm:$0xff]  ;;  %v568_v31 = vadd.f32 %v564_v50, %v540_v60  ;;  %v2720_v50 = vld [vmem:[%s4452_s3] ss:$0 sm:$0xff] }
  0xa2   : > { %v3943_v48 = vld [vmem:[#allocation2 + $0x23] sm:$0xff]  ;;  %v650_v27 = vmul.f32 %v3875_v26, %v3935_v29 }
  0xa3   : > { %v567_v59 = vadd.f32 %v563_v32, %v539_v44  ;;  %v542_v32 = vadd.f32 %v538_v0, %v510_v63  ;;  %v677_v44 = vmul.f32 %v674_v35, %v3904_v47  ;;  %v596_v16 = vadd.f32 %v592_v43, %v568_v31 }
  0xa5   : > { %v595_v30 = vadd.f32 %v591_v37, %v567_v59  ;;  %v570_v53 = vadd.f32 %v566_v18, %v542_v32  ;;  %v622_v37 = vmul.f32 %v3859_v19, %v3928_v6  ;;  %v653_v59 = vadd.f32 %v649_v28, %v625_v38 }
  0xa6   : > { %v624_v63 = vadd.f32 %v620_v14, %v596_v16 }
  0xa7   : > { %v623_v49 = vadd.f32 %v619_v52, %v595_v30  ;;  %v598_v0 = vadd.f32 %v594_v58, %v570_v53  ;;  %v681_v17 = vadd.f32 %v677_v44, %v653_v59  ;;  %v678_v30 = vmul.f32 %v674_v35, %v3943_v48 }
  0xa8   : > { %v652_v43 = vadd.f32 %v648_v39, %v624_v63 }
  0xa9   : > { %v651_v60 = vadd.f32 %v647_v7, %v623_v49  ;;  %v626_v18 = vadd.f32 %v622_v37, %v598_v0  ;;  %v3954_v19 = vadd.f32 %v2720_v50, %v681_v17  ;;  %v498_v17 = vld [vmem:[%s4451_s2 + $0x8] sm:$0x7f] }
  0xaa   : > { %v680_v32 = vadd.f32 %v676_v54, %v652_v43  ;;  %v518_v35 = vrot.slane %v498_v17, %v3839_v8  ;;  %v546_v14 = vrot.slane %v498_v17, %v3842_v9  ;;  %v574_v44 = vrot.slane %v498_v17, %v3845_v10 }
  0xab   : > { %v679_v52 = vadd.f32 %v675_v15, %v651_v60  ;;  %v654_v28 = vadd.f32 %v650_v27, %v626_v18  ;;  %710 = vadd.xlane.f32.xlu1 %v3954_v19  ;;  %v602_v16 = vrot.slane %v498_v17, %v3848_v11 }
  0xac   : > { %v3960_v58 = vadd.f32 %v2720_v50, %v680_v32  ;;  %v519_v15 = vmul.f32 %v518_v35, %v3867_v23  ;;  %v547_v38 = vmul.f32 %v546_v14, %v3869_v24  ;;  %v575_v49 = vmul.f32 %v574_v44, %v3871_v25 }
  0xad   : > { %v3956_v31 = vadd.f32 %v2720_v50, %v679_v52  ;;  %v682_v7 = vadd.f32 %v678_v30, %v654_v28  ;;  %v603_v37 = vmul.f32 %v602_v16, %v3820_v2  ;;  %v521_v59 = vmul.f32 %v518_v35, %v3861_v20 }
  0xae   : > { %v551_v39 = vadd.f32 %v547_v38, %v519_v15  ;;  %v549_v54 = vmul.f32 %v546_v14, %v3863_v21  ;;  %v520_v23 = vmul.f32 %v518_v35, %v3893_v40  ;;  %v548_v24 = vmul.f32 %v546_v14, %v3895_v41 }
  0xaf   : > { %706 = vadd.xlane.f32.xlu0 %v3956_v31  ;;  %v3962_v26 = vadd.f32 %v2720_v50, %v682_v7  ;;  %v630_v50 = vrot.slane %v498_v17, %v617_v12  ;;  %v658_v25 = vrot.slane %v498_v17, %v645_v13  ;;  %v577_v0 = vmul.f32 %v574_v44, %v3865_v22 }
  0xb0   : > { %v579_v53 = vadd.f32 %v575_v49, %v551_v39  ;;  %v553_v2 = vadd.f32 %v549_v54, %v521_v59  ;;  %v552_v27 = vadd.f32 %v548_v24, %v520_v23  ;;  %v576_v12 = vmul.f32 %v574_v44, %v3897_v42  ;;  %v3097_v54 = vld [vmem:[#allocation6 + $0x8] ss:$16 sps:$4 sm:$0xff]   ;;  %v3100_v23 = vld [vmem:[#allocation6 + $0x2c] ss:$16 sps:$4 sm:$0xff]  }
  0xb1   : > { %712 = vadd.xlane.f32.xlu1 %v3962_v26  ;;  %v631_v63 = vmul.f32 %v630_v50, %v3883_v33  ;;  %v659_v20 = vmul.f32 %v658_v25, %v3885_v34  ;;  %v4503_v21 = vsub.s32 6, %v3818_v1  ;;  %v605_v41 = vmul.f32 %v602_v16, %v3829_v4 }
  0xb2   : > { %v607_v60 = vadd.f32 %v603_v37, %v579_v53  ;;  %v581_v43 = vadd.f32 %v577_v0, %v553_v2  ;;  %v580_v18 = vadd.f32 %v576_v12, %v552_v27  ;;  %v604_v33 = vmul.f32 %v602_v16, %v3822_v3 }
  0xb3   : > { %708 = vadd.xlane.f32.xlu0 %v3960_v58  ;;  %v686_v40 = vrot.slane %v498_v17, %v4503_v21  ;;  %v522_v13 = vmul.f32 %v518_v35, %v3915_v55  ;;  %v633_v32 = vmul.f32 %v630_v50, %v3889_v36  ;;  %v632_v42 = vmul.f32 %v630_v50, %v3909_v51 }
  0xb4   : > { %v635_v52 = vadd.f32 %v631_v63, %v607_v60  ;;  %v609_v28 = vadd.f32 %v605_v41, %v581_v43  ;;  %v608_v34 = vadd.f32 %v604_v33, %v580_v18  ;;  %v550_v1 = vmul.f32 %v546_v14, %v3917_v56  ;;  %v3102_v43 = vld [vmem:[#allocation6 + $0x20] ss:$16 sps:$4 sm:$0xff]   ;;  %v3103_v18 = vld [vmem:[#allocation6 + $0x28] ss:$16 sps:$4 sm:$0xff]   ;;  %v3104_v33 = vld [vmem:[#allocation6 + $0x44] ss:$16 sps:$4 sm:$0xff]  }
  0xb5   : > { %v687_v22 = vmul.f32 %v686_v40, %v3900_v45  ;;  %v578_v7 = vmul.f32 %v574_v44, %v3919_v57  ;;  %v661_v17 = vmul.f32 %v658_v25, %v3902_v46  ;;  %v660_v3 = vmul.f32 %v658_v25, %v3922_v61 }
  0xb6   : > { %v663_v30 = vadd.f32 %v659_v20, %v635_v52  ;;  %v637_v15 = vadd.f32 %v633_v32, %v609_v28  ;;  %v636_v55 = vadd.f32 %v632_v42, %v608_v34  ;;  %v554_v35 = vadd.f32 %v550_v1, %v522_v13  ;;  %v3106_v13 = vld [vmem:[#allocation6 + $0x4c] ss:$16 sps:$4 sm:$0xff]   ;;  %v3110_v32 = vld [vmem:[#allocation6 + $0x64] ss:$16 sps:$4 sm:$0xff]   ;;  %v3114_v28 = vld [vmem:[#allocation6 + $0x60] ss:$16 sps:$4 sm:$0xff]  }
  0xb7   : > { %v606_v45 = vmul.f32 %v602_v16, %v3831_v5  ;;  %v689_v36 = vmul.f32 %v686_v40, %v3904_v47  ;;  %v688_v51 = vmul.f32 %v686_v40, %v3924_v62  ;;  %v634_v38 = vmul.f32 %v630_v50, %v3928_v6  ;;  %v3092_v5 = vld [vmem:[#allocation6 + $0x4] ss:$16 sps:$4 sm:$0xff]   ;;  %v3094_v16 = vld [vmem:[#allocation6 + $0xc] ss:$16 sps:$4 sm:$0xff]   ;;  %v3096_v47 = vld [vmem:[#allocation6] ss:$16 sps:$4 sm:$0xff]  }
  0xb8   : > { %v691_v4 = vadd.f32 %v687_v22, %v663_v30  ;;  %v665_v39 = vadd.f32 %v661_v17, %v637_v15  ;;  %v664_v56 = vadd.f32 %v660_v3, %v636_v55  ;;  %v582_v14 = vadd.f32 %v578_v7, %v554_v35  ;;  %v3098_v62 = vld [vmem:[#allocation6 + $0x24] ss:$16 sps:$4 sm:$0xff]   ;;  %989 = vmatprep.subr.bf16.mxu0 %v3092_v5  ;;  %v3108_v30 = vld [vmem:[#allocation6 + $0x40] ss:$16 sps:$4 sm:$0xff]   ;;  %v3109_v22 = vld [vmem:[#allocation6 + $0x48] ss:$16 sps:$4 sm:$0xff]  }
  0xb9   : > { %v662_v57 = vmul.f32 %v658_v25, %v3935_v29  ;;  %v690_v61 = vmul.f32 %v686_v40, %v3943_v48  ;;  %1042 = vmatprep.subr.bf16.mxu1 %v3094_v16  ;;  %990 = vmatpush1.bf16.msra.mxu0 %v3096_v47  ;;  %v3112_v42 = vld [vmem:[#allocation6 + $0x6c] ss:$16 sps:$4 sm:$0xff]   ;;  %v3115_v34 = vld [vmem:[#allocation6 + $0x68] ss:$16 sps:$4 sm:$0xff]   ;;  %v3116_v1 = vld [vmem:[#allocation6 + $0x84] ss:$16 sps:$4 sm:$0xff]  }
  0xba   : > { %v693_v44 = vadd.f32 %v689_v36, %v665_v39  ;;  %v692_v46 = vadd.f32 %v688_v51, %v664_v56  ;;  %v610_v49 = vadd.f32 %v606_v45, %v582_v14  ;;  %1043 = vmatpush1.bf16.msra.mxu1 %v3097_v54  ;;  %991 = vmatprep.subr.bf16.mxu0 %v3098_v62  ;;  %v3118_v7 = vld [vmem:[#allocation6 + $0x8c] ss:$16 sps:$4 sm:$0xff]   ;;  %v3121_v17 = vld [vmem:[#allocation6 + $0x88] ss:$16 sps:$4 sm:$0xff]   ;;  %v3122_v3 = vld [vmem:[#allocation6 + $0xa4] ss:$16 sps:$4 sm:$0xff]  }
  0xbb   : > { %1044 = vmatprep.subr.bf16.mxu1 %v3100_v23  ;;  %v3124_v15 = vld [vmem:[#allocation6 + $0xac] ss:$16 sps:$4 sm:$0xff]   ;;  %v3126_v55 = vld [vmem:[#allocation6 + $0xa0] ss:$16 sps:$4 sm:$0xff]   ;;  %v3127_v35 = vld [vmem:[#allocation6 + $0xa8] ss:$16 sps:$4 sm:$0xff]  }
  0xbc   : > { %v638_v53 = vadd.f32 %v634_v38, %v610_v49  ;;  %v3128_v45 = vld [vmem:[#allocation6 + $0xc4] ss:$16 sps:$4 sm:$0xff]   ;;  %v3130_v36 = vld [vmem:[#allocation6 + $0xcc] ss:$16 sps:$4 sm:$0xff]   ;;  %v3132_v51 = vld [vmem:[#allocation6 + $0xc0] ss:$16 sps:$4 sm:$0xff]  }
  0xbd   : > { %992 = vmatpush1.bf16.msra.mxu0 %v3102_v43  ;;  %v3133_v38 = vld [vmem:[#allocation6 + $0xc8] ss:$16 sps:$4 sm:$0xff]   ;;  %v3134_v39 = vld [vmem:[#allocation6 + $0xe4] ss:$16 sps:$4 sm:$0xff]   ;;  %v3136_v56 = vld [vmem:[#allocation6 + $0xec] ss:$16 sps:$4 sm:$0xff]  }
  0xbe   : > { %v666_v37 = vadd.f32 %v662_v57, %v638_v53  ;;  %1045 = vmatpush1.bf16.msra.mxu1 %v3103_v18  ;;  %993 = vmatprep.subr.bf16.mxu0 %v3104_v33  ;;  %v3138_v14 = vld [vmem:[#allocation6 + $0xe0] ss:$16 sps:$4 sm:$0xff]   ;;  %v3139_v57 = vld [vmem:[#allocation6 + $0xe8] ss:$16 sps:$4 sm:$0xff]  }
  0xbf   : > { %1046 = vmatprep.subr.bf16.mxu1 %v3106_v13  ;;  %v2721_v33 = vld [vmem:[%s4504_s28] ss:$0 sm:$0xff] }
  0xc0   : > { %v694_v59 = vadd.f32 %v690_v61, %v666_v37 }
  0xc1   : > { %994 = vmatpush1.bf16.msra.mxu0 %v3108_v30 }
  0xc2   : > { %1047 = vmatpush1.bf16.msra.mxu1 %v3109_v22  ;;  %995 = vmatprep.subr.bf16.mxu0 %v3110_v32  ;;  %v2722_v32 = vld [vmem:[%s4505_s27] ss:$0 sm:$0xff] }
  0xc3   : > { %1048 = vmatprep.subr.bf16.mxu1 %v3112_v42 }
  0xc5   : > { %996 = vmatpush1.bf16.msra.mxu0 %v3114_v28 }
  0xc6   : > { %1049 = vmatpush1.bf16.msra.mxu1 %v3115_v34  ;;  %997 = vmatprep.subr.bf16.mxu0 %v3116_v1 }
  0xc7   : > { %1050 = vmatprep.subr.bf16.mxu1 %v3118_v7 }
  0xca   : > { %1051 = vmatpush1.bf16.msra.mxu1 %v3121_v17 }
  0xcb   : > { %1052 = vmatprep.subr.bf16.mxu1 %v3124_v15 }
  0xce   : > { %1053 = vmatpush1.bf16.msra.mxu1 %v3127_v35  ;;  %v3140_v35 = vld [vmem:[#allocation8 + $0x40] sm:$0xff]  }
  0xcf   : > { %1054 = vmatprep.subr.bf16.mxu1 %v3130_v36  ;;  %v3144_v36 = vld [vmem:[#allocation8 + $0x48] sm:$0xff]  }
  0xd2   : > { %1055 = vmatpush1.bf16.msra.mxu1 %v3133_v38  ;;  %v3146_v38 = vld [vmem:[#allocation8 + $0x8] sm:$0xff]  }
  0xd3   : > { %1056 = vmatprep.subr.bf16.mxu1 %v3136_v56  ;;  %v3148_v56 = vld [vmem:[#allocation8 + $0x50] sm:$0xff]  }
  0xd6   : > { %1057 = vmatpush1.bf16.msra.mxu1 %v3139_v57  ;;  %v3150_v57 = vld [vmem:[#allocation8 + $0x10] sm:$0xff]  }
 0x138   : > { %v711_v6 = vpop.xlane.xlu1 %710 }
 0x139   : > { %v717_v50 = vmul.f32 0.0078125, %v711_v6 }
 0x13b   : > { %v4011_v60 = vsub.f32 %v3954_v19, %v717_v50  ;;  %v2790_v19 = vld [vmem:[%s4452_s3 + $0x1] ss:$0 sm:$0xff] }
 0x13c   : > { %v707_v29 = vpop.xlane.xlu0 %706  ;;  %v4028_v21 = vadd.f32 %v2790_v19, %v691_v4  ;;  %v4035_v40 = vadd.f32 %v2790_v19, %v692_v46  ;;  %v4039_v41 = vadd.f32 %v2790_v19, %v694_v59  ;;  %v3120_v4 = vld [vmem:[#allocation6 + $0x80] ss:$16 sps:$4 sm:$0xff]  }
 0x13d   : > { %v715_v24 = vmul.f32 0.0078125, %v707_v29  ;;  %998 = vmatpush1.bf16.msra.mxu0 %v3120_v4 }
 0x13e   : > { %v713_v25 = vpop.xlane.xlu1 %712  ;;  %999 = vmatprep.subr.bf16.mxu0 %v3122_v3 }
 0x13f   : > { %v4008_v48 = vsub.f32 %v3956_v31, %v715_v24  ;;  %v718_v27 = vmul.f32 0.0078125, %v713_v25  ;;  %v725_v31 = vmul.f32 %v4011_v60, %v4011_v60 }
 0x140   : > { %v709_v63 = vpop.xlane.xlu0 %708 }
 0x141   : > { %v716_v0 = vmul.f32 0.0078125, %v709_v63  ;;  %v723_v2 = vmul.f32 %v4008_v48, %v4008_v48  ;;  %v4019_v52 = vsub.f32 %v3962_v26, %v718_v27  ;;  %v4033_v26 = vadd.f32 %v2790_v19, %v693_v44  ;;  %1000 = vmatpush1.bf16.msra.mxu0 %v3126_v55 }
 0x142   : > { %1001 = vmatprep.subr.bf16.mxu0 %v3128_v45  ;;  %v3535_v44 = vmov 0   ;;  %v3141_v45 = vld [vmem:[#allocation8 + $0xc0] sm:$0xff]  }
 0x143   : > { %v4016_v12 = vsub.f32 %v3960_v58, %v716_v0  ;;  %727 = vadd.xlane.f32.xlu0 %v723_v2  ;;  %v726_v58 = vmul.f32 %v4019_v52, %v4019_v52  ;;  %1021 = vmatprep.mubr.bf16.mxu0 %v3535_v44 }
 0x144   : > { %1074 = vmatprep.mubr.bf16.mxu1 %v3535_v44  ;;  %2897 = vmatprep.subr.bf16.mxu1 %v3141_v45 }
 0x145   : > { %v724_v20 = vmul.f32 %v4016_v12, %v4016_v12  ;;  %1002 = vmatpush1.bf16.msra.mxu0 %v3132_v51  ;;  %v3145_v51 = vld [vmem:[#allocation8 + $0xc8] sm:$0xff]  }
 0x146   : > { %1003 = vmatprep.subr.bf16.mxu0 %v3134_v39  ;;  %v3147_v39 = vld [vmem:[#allocation8 + $0x88] sm:$0xff]  }
 0x147   : > { %731 = vadd.xlane.f32.xlu0 %v725_v31  ;;  %729 = vadd.xlane.f32.xlu1 %v724_v20 }
 0x149   : > { %1004 = vmatpush1.bf16.msra.mxu0 %v3138_v14  ;;  %v3149_v14 = vld [vmem:[#allocation8 + $0xd0] sm:$0xff]  }
 0x14a   : > { %2869 = vmatprep.subr.bf16.mxu0 %v3140_v35 }
 0x14b   : > { %1635 = vadd.xlane.f32.xlu0 %v4028_v21  ;;  %733 = vadd.xlane.f32.xlu1 %v726_v58 }
 0x14f   : > { %1639 = vadd.xlane.f32.xlu0 %v4033_v26  ;;  %1637 = vadd.xlane.f32.xlu1 %v4035_v40 }
 0x153   : > { %1641 = vadd.xlane.f32.xlu1 %v4039_v41 }
 0x1d0   : > { %v728_v46 = vpop.xlane.xlu0 %727 }
 0x1d1   : > { %v735_v49 = vmul.f32 0.0078125, %v728_v46  ;;  %v3151_v46 = vld [vmem:[#allocation8 + $0x90] sm:$0xff]  }
 0x1d3   : > { %v739_v61 = vadd.f32 1e-06, %v735_v49  ;;  %v3152_v49 = vld [vmem:[#allocation8 + $0x58] sm:$0xff]  }
 0x1d4   : > { %v730_v53 = vpop.xlane.xlu1 %729  ;;  %v732_v37 = vpop.xlane.xlu0 %731 }
 0x1d5   : > { %3252 = vrsqrt.f32 %v739_v61  ;;  %v736_v59 = vmul.f32 0.0078125, %v730_v53  ;;  %v737_v5 = vmul.f32 0.0078125, %v732_v37  ;;  %v3153_v61 = vld [vmem:[#allocation8 + $0xd8] sm:$0xff]  }
 0x1d6   : > { %v3154_v53 = vld [vmem:[#allocation8 + $0x18] sm:$0xff]  }
 0x1d7   : > { %v740_v16 = vadd.f32 1e-06, %v736_v59  ;;  %v741_v47 = vadd.f32 1e-06, %v737_v5  ;;  %v3155_v37 = vld [vmem:[#allocation8 + $0x98] sm:$0xff]   ;;  %v3156_v59 = vld [vmem:[#allocation8 + $0x60] sm:$0xff]  }
 0x1d8   : > { %v734_v54 = vpop.xlane.xlu1 %733  ;;  %v1636_v62 = vpop.xlane.xlu0 %1635  ;;  %v3157_v5 = vld [vmem:[#allocation8 + $0xe0] sm:$0xff]  }
 0x1d9   : > { %3254 = vrsqrt.f32 %v740_v16  ;;  %v738_v23 = vmul.f32 0.0078125, %v734_v54  ;;  %v1643_v6 = vmul.f32 0.0078125, %v1636_v62  ;;  %v3158_v16 = vld [vmem:[#allocation8 + $0x20] sm:$0xff]   ;;  %v3160_v54 = vld [vmem:[#allocation8 + $0x68] sm:$0xff]  }
 0x1da   : > { %3256 = vrsqrt.f32 %v741_v47  ;;  %v3159_v47 = vld [vmem:[#allocation8 + $0xa0] sm:$0xff]   ;;  %v3161_v62 = vld [vmem:[#allocation8 + $0xe8] sm:$0xff]  }
 0x1db   : > { %v742_v29 = vadd.f32 1e-06, %v738_v23  ;;  %v4045_v50 = vsub.f32 %v4028_v21, %v1643_v6  ;;  %v3162_v23 = vld [vmem:[#allocation8 + $0x28] sm:$0xff]  }
 0x1dc   : > { %v1638_v24 = vpop.xlane.xlu1 %1637  ;;  %v1640_v63 = vpop.xlane.xlu0 %1639  ;;  %v3163_v6 = vld [vmem:[#allocation8 + $0xa8] sm:$0xff]  }
 0x1dd   : > { %3258 = vrsqrt.f32 %v742_v29  ;;  %v1644_v25 = vmul.f32 0.0078125, %v1638_v24  ;;  %v1645_v0 = vmul.f32 0.0078125, %v1640_v63  ;;  %v1651_v2 = vmul.f32 %v4045_v50, %v4045_v50  ;;  %v3164_v29 = vld [vmem:[#allocation8 + $0x70] sm:$0xff]  }
 0x1de   : > { %v3165_v24 = vld [vmem:[#allocation8 + $0xf0] sm:$0xff]  }
 0x1df   : > { %v3253_v27 = vpop.eup %3252  ;;  %v4050_v31 = vsub.f32 %v4035_v40, %v1644_v25  ;;  %v4053_v19 = vsub.f32 %v4033_v26, %v1645_v0  ;;  %1655 = vadd.xlane.f32.xlu0 %v1651_v2  ;;  %v3166_v63 = vld [vmem:[#allocation8 + $0x30] sm:$0xff]   ;;  %v3168_v0 = vld [vmem:[#allocation8 + $0x78] sm:$0xff]  }
 0x1e0   : > { %v1642_v20 = vpop.xlane.xlu1 %1641  ;;  %v747_v21 = vmul.f32 %v3253_v27, %v4008_v48  ;;  %v3167_v25 = vld [vmem:[#allocation8 + $0xb0] sm:$0xff]   ;;  %v3169_v2 = vld [vmem:[#allocation8 + $0xf8] sm:$0xff]  }
 0x1e1   : > { %v1646_v58 = vmul.f32 0.0078125, %v1642_v20  ;;  %v1652_v43 = vmul.f32 %v4050_v31, %v4050_v31  ;;  %v1653_v18 = vmul.f32 %v4053_v19, %v4053_v19  ;;  %v3170_v27 = vld [vmem:[#allocation8 + $0x38] sm:$0xff]  }
 0x1e2   : > { %v758_v48 = vmul.f32 %v2721_v33, %v747_v21  ;;  %v3171_v20 = vld [vmem:[#allocation8 + $0xb8] sm:$0xff]   ;;  %v3174_v21 = vld [vmem:[#allocation6 + $0x104] ss:$16 sps:$4 sm:$0xff]  }
 0x1e3   : > { %v3255_v40 = vpop.eup %3254  ;;  %v4064_v13 = vsub.f32 %v4039_v41, %v1646_v58  ;;  %1657 = vadd.xlane.f32.xlu1 %v1652_v43  ;;  %1659 = vadd.xlane.f32.xlu0 %v1653_v18  ;;  %v3177_v58 = vld [vmem:[#allocation6 + $0x10c] ss:$16 sps:$4 sm:$0xff]   ;;  %v807_v43 = vld [vmem:[%s4506_s26] sm:$0xf] }
 0x1e4   : > { %v748_v26 = vmul.f32 %v3255_v40, %v4016_v12  ;;  %v3257_v30 = vpop.eup %3256  ;;  %v769_v34 = vadd.f32 %v2722_v32, %v758_v48  ;;  %v4080_v18 = vrot.slane %v807_v43, %v3839_v8  ;;  %v4086_v48 = vrot.slane %v807_v43, %v3842_v9 }
 0x1e5   : > { %v1654_v22 = vmul.f32 %v4064_v13, %v4064_v13  ;;  %v749_v41 = vmul.f32 %v3257_v30, %v4011_v60  ;;  %v3142_v60 = vld [vmem:[#allocation8] sm:$0xff]  }
 0x1e6   : > { %v759_v42 = vmul.f32 %v2721_v33, %v748_v26 }
 0x1e7   : > { %v3259_v28 = vpop.eup %3258  ;;  %1661 = vadd.xlane.f32.xlu1 %v1654_v22  ;;  %v760_v17 = vmul.f32 %v2721_v33, %v749_v41 }
 0x1e8   : > { %v770_v1 = vadd.f32 %v2722_v32, %v759_v42  ;;  %v750_v7 = vmul.f32 %v3259_v28, %v4019_v52  ;;  %v3143_v52 = vld [vmem:[#allocation8 + $0x80] sm:$0xff]   ;;  %v4091_v28 = vrot.slane %v807_v43, %v3848_v11 }
 0x1e9   : > { %v771_v15 = vadd.f32 %v2722_v32, %v760_v17 }
 0x1ea   : > { %v773_v4 = vpack.c.bf16 %v770_v1, %v769_v34  ;;  %v761_v12 = vmul.f32 %v2721_v33, %v750_v7  ;;  %v4083_v33 = vrot.slane %v807_v43, %v3845_v10 }
 0x1ec   : > { %1022 = vmatmul.mubr.bf16.vlgmr.msra.gmra.mrb[0].mxu0 %v773_v4  ;;  %1075 = vmatmul.mubr.bf16.vlgmr.msra.gmra.mrb[0].mxu1 %v773_v4  ;;  %v772_v3 = vadd.f32 %v2722_v32, %v761_v12 }
 0x1ed   : > { %1031 = vmatprep.mubr.bf16.mxu0 %v3535_v44  ;;  %1084 = vmatprep.mubr.bf16.mxu1 %v3535_v44 }
 0x1ee   : > { %v774_v55 = vpack.c.bf16 %v772_v3, %v771_v15  ;;  %2870 = vmatpush3.bf16.msra.mxu0 %v3142_v60  ;;  %2898 = vmatpush3.bf16.msra.mxu1 %v3143_v52 }
 0x1ef   : > { %2871 = vmatprep.subr.bf16.mxu0 %v3144_v36  ;;  %2899 = vmatprep.subr.bf16.mxu1 %v3145_v51 }
 0x1f2   : > { %2872 = vmatpush3.bf16.msra.mxu0 %v3146_v38  ;;  %2900 = vmatpush3.bf16.msra.mxu1 %v3147_v39 }
 0x1f3   : > { %2873 = vmatprep.subr.bf16.mxu0 %v3148_v56  ;;  %2901 = vmatprep.subr.bf16.mxu1 %v3149_v14 }
 0x1f4   : > { %1032 = vmatmul.mubr.bf16.gmra.mrb[4].mxu0 %v774_v55  ;;  %1085 = vmatmul.mubr.bf16.gmra.mrb[4].mxu1 %v774_v55 }
 0x1f6   : > { %2874 = vmatpush3.bf16.msra.mxu0 %v3150_v57  ;;  %2902 = vmatpush3.bf16.msra.mxu1 %v3151_v46 }
 0x1f7   : > { %2875 = vmatprep.subr.bf16.mxu0 %v3152_v49  ;;  %2903 = vmatprep.subr.bf16.mxu1 %v3153_v61 }
 0x1fa   : > { %2876 = vmatpush3.bf16.msra.mxu0 %v3154_v53  ;;  %2904 = vmatpush3.bf16.msra.mxu1 %v3155_v37 }
 0x1fb   : > { %2877 = vmatprep.subr.bf16.mxu0 %v3156_v59  ;;  %2905 = vmatprep.subr.bf16.mxu1 %v3157_v5 }
 0x1fe   : > { %2878 = vmatpush3.bf16.msra.mxu0 %v3158_v16  ;;  %2906 = vmatpush3.bf16.msra.mxu1 %v3159_v47 }
 0x1ff   : > { %2879 = vmatprep.subr.bf16.mxu0 %v3160_v54  ;;  %2907 = vmatprep.subr.bf16.mxu1 %v3161_v62 }
 0x202   : > { %2880 = vmatpush3.bf16.msra.mxu0 %v3162_v23  ;;  %2908 = vmatpush3.bf16.msra.mxu1 %v3163_v6 }
 0x203   : > { %2881 = vmatprep.subr.bf16.mxu0 %v3164_v29  ;;  %2909 = vmatprep.subr.bf16.mxu1 %v3165_v24 }
 0x206   : > { %2882 = vmatpush3.bf16.msra.mxu0 %v3166_v63  ;;  %2910 = vmatpush3.bf16.msra.mxu1 %v3167_v25 }
 0x207   : > { %2883 = vmatprep.subr.bf16.mxu0 %v3168_v0  ;;  %2911 = vmatprep.subr.bf16.mxu1 %v3169_v2 }
 0x20a   : > { %2884 = vmatpush3.bf16.msra.mxu0 %v3170_v27  ;;  %2912 = vmatpush3.bf16.msra.mxu1 %v3171_v20 }
 0x20b   : > { %1921 = vmatprep.subr.bf16.mxu0 %v3174_v21  ;;  %1974 = vmatprep.subr.bf16.mxu1 %v3177_v58 }
 0x2bf   : > { %v1023_v40 = vpop.f32.mrb[0].mxu0  ;;  %v1076_v26 = vpop.f32.mrb[0].mxu1 }
 0x2c0   : > { %v1024_v30 = vadd.f32 %v1023_v40, %v4080_v18  ;;  %v1077_v22 = vadd.f32 %v1076_v26, %v4083_v33  ;;  %v1025_v32 = vpop.f32.mrb[1].mxu0  ;;  %v1078_v42 = vpop.f32.mrb[1].mxu1 }
 0x2c1   : > { %v1027_v34 = vpop.f32.mrb[2].mxu0  ;;  %v1080_v1 = vpop.f32.mrb[2].mxu1  ;;  %v4094_v4 = vadd.f32 %v1025_v32, %v4086_v48  ;;  %v4104_v60 = vadd.f32 %v1078_v42, %v4091_v28 }
 0x2c2   : > { %v1111_v41 = vmul.f32 0.044715, %v1024_v30  ;;  %v1113_v7 = vmul.f32 0.044715, %v1077_v22  ;;  %v1028_v12 = vadd.f32 %v1027_v34, %v4080_v18  ;;  %v4098_v17 = vadd.f32 %v1080_v1, %v4083_v33  ;;  %v1029_v3 = vpop.f32.mrb[3].mxu0  ;;  %v1082_v15 = vpop.f32.mrb[3].mxu1 }
 0x2c3   : > { %v4101_v45 = vadd.f32 %v1029_v3, %v4086_v48  ;;  %v4107_v36 = vadd.f32 %v1082_v15, %v4091_v28  ;;  %v4109_v51 = vmul.f32 0.5, %v1024_v30  ;;  %v1112_v14 = vmul.f32 0.044715, %v4094_v4 }
 0x2c4   : > { %v1127_v55 = vmul.f32 %v1111_v41, %v1024_v30  ;;  %v1129_v35 = vmul.f32 %v1113_v7, %v1077_v22  ;;  %v1115_v52 = vmul.f32 0.044715, %v1028_v12  ;;  %v1117_v56 = vmul.f32 0.044715, %v4098_v17 }
 0x2c5   : > { %v1116_v46 = vmul.f32 0.044715, %v4101_v45  ;;  %v4114_v37 = vmul.f32 0.5, %v1077_v22  ;;  %v1114_v54 = vmul.f32 0.044715, %v4104_v60  ;;  %v1128_v20 = vmul.f32 %v1112_v14, %v4094_v4 }
 0x2c6   : > { %v1143_v38 = vmul.f32 %v1127_v55, %v1024_v30  ;;  %v1145_v39 = vmul.f32 %v1129_v35, %v1077_v22  ;;  %v1131_v57 = vmul.f32 %v1115_v52, %v1028_v12  ;;  %v1133_v5 = vmul.f32 %v1117_v56, %v4098_v17 }
 0x2c7   : > { %v1033_v49 = vpop.f32.mrb[4].mxu0  ;;  %v1086_v61 = vpop.f32.mrb[4].mxu1  ;;  %v1118_v23 = vmul.f32 0.044715, %v4107_v36  ;;  %v1132_v58 = vmul.f32 %v1116_v46, %v4101_v45  ;;  %v1144_v3 = vmul.f32 %v1128_v20, %v4094_v4 }
 0x2c8   : > { %v1159_v53 = vadd.f32 %v1143_v38, %v1024_v30  ;;  %v1161_v59 = vadd.f32 %v1145_v39, %v1077_v22  ;;  %v1035_v16 = vpop.f32.mrb[5].mxu0  ;;  %v1088_v47 = vpop.f32.mrb[5].mxu1  ;;  %v1147_v62 = vmul.f32 %v1131_v57, %v1028_v12  ;;  %v4120_v6 = vadd.f32 %v1033_v49, %v4080_v18 }
 0x2c9   : > { %v1037_v29 = vpop.f32.mrb[6].mxu0  ;;  %v1090_v24 = vpop.f32.mrb[6].mxu1  ;;  %v1149_v0 = vmul.f32 %v1133_v5, %v4098_v17  ;;  %v4126_v43 = vadd.f32 %v1086_v61, %v4083_v33  ;;  %v4131_v30 = vadd.f32 %v1035_v16, %v4086_v48  ;;  %v1130_v22 = vmul.f32 %v1114_v54, %v4104_v60 }
 0x2ca   : > { %v1175_v63 = vmul.f32 0.7978846, %v1159_v53  ;;  %v1177_v25 = vmul.f32 0.7978846, %v1161_v59  ;;  %v1039_v2 = vpop.f32.mrb[7].mxu0  ;;  %v1092_v27 = vpop.f32.mrb[7].mxu1  ;;  %v1163_v21 = vadd.f32 %v1147_v62, %v1028_v12  ;;  %v1134_v42 = vmul.f32 %v1118_v23, %v4107_v36 }
 0x2cb   : > { %v1165_v40 = vadd.f32 %v1149_v0, %v4098_v17  ;;  %v1119_v26 = vmul.f32 0.044715, %v4120_v6  ;;  %v1120_v1 = vmul.f32 0.044715, %v4131_v30  ;;  %v4137_v41 = vadd.f32 %v1088_v47, %v4091_v28 }
 0x2cc   : > { %3260 = vtanh.f32 %v1175_v63  ;;  %v1179_v32 = vmul.f32 0.7978846, %v1163_v21  ;;  %v4140_v7 = vadd.f32 %v1037_v29, %v4080_v18  ;;  %v1148_v15 = vmul.f32 %v1132_v58, %v4101_v45 }
 0x2cd   : > { %3262 = vtanh.f32 %v1177_v25  ;;  %v1181_v34 = vmul.f32 0.7978846, %v1165_v40  ;;  %v4145_v55 = vadd.f32 %v1090_v24, %v4083_v33  ;;  %v1135_v35 = vmul.f32 %v1119_v26, %v4120_v6 }
 0x2ce   : > { %3264 = vtanh.f32 %v1179_v32  ;;  %v1121_v52 = vmul.f32 0.044715, %v4126_v43  ;;  %v1122_v38 = vmul.f32 0.044715, %v4137_v41  ;;  %v1099_v39 = vmul.f32 0.5, %v1028_v12 }
 0x2cf   : > { %3266 = vtanh.f32 %v1181_v34  ;;  %v1136_v56 = vmul.f32 %v1120_v1, %v4131_v30  ;;  %v4152_v18 = vadd.f32 %v1039_v2, %v4086_v48  ;;  %v4155_v14 = vadd.f32 %v1092_v27, %v4091_v28 }
 0x2d0   : > { %v1146_v57 = vmul.f32 %v1130_v22, %v4104_v60  ;;  %v1150_v33 = vmul.f32 %v1134_v42, %v4107_v36  ;;  %v1123_v46 = vmul.f32 0.044715, %v4140_v7  ;;  %v1125_v49 = vmul.f32 0.044715, %v4145_v55 }
 0x2d1   : > { %v1138_v61 = vmul.f32 %v1122_v38, %v4137_v41  ;;  %v1124_v12 = vmul.f32 0.044715, %v4152_v18  ;;  %v1126_v53 = vmul.f32 0.044715, %v4155_v14  ;;  %v1160_v48 = vadd.f32 %v1144_v3, %v4094_v4 }
 0x2d2   : > { %v1101_v59 = vmul.f32 0.5, %v4098_v17  ;;  %v1151_v28 = vmul.f32 %v1135_v35, %v4120_v6  ;;  %v1137_v5 = vmul.f32 %v1121_v52, %v4126_v43  ;;  %v1164_v16 = vadd.f32 %v1148_v15, %v4101_v45 }
 0x2d3   : > { %v1152_v47 = vmul.f32 %v1136_v56, %v4131_v30  ;;  %v1140_v54 = vmul.f32 %v1124_v12, %v4152_v18  ;;  %v1142_v62 = vmul.f32 %v1126_v53, %v4155_v14  ;;  %v1176_v23 = vmul.f32 0.7978846, %v1160_v48 }
 0x2d4   : > { %v1139_v24 = vmul.f32 %v1123_v46, %v4140_v7  ;;  %v1180_v63 = vmul.f32 0.7978846, %v1164_v16  ;;  %v1162_v25 = vadd.f32 %v1146_v57, %v4104_v60  ;;  %v1166_v17 = vadd.f32 %v1150_v33, %v4107_v36 }
 0x2d5   : > { %v1154_v2 = vmul.f32 %v1138_v61, %v4137_v41  ;;  %v1141_v27 = vmul.f32 %v1125_v49, %v4145_v55  ;;  %v1156_v20 = vmul.f32 %v1140_v54, %v4152_v18  ;;  %3268 = vtanh.f32 %v1176_v23 }
 0x2d6   : > { %v3261_v29 = vpop.eup %3260  ;;  %3270 = vtanh.f32 %v1180_v63  ;;  %v1178_v21 = vmul.f32 0.7978846, %v1162_v25  ;;  %v1182_v58 = vmul.f32 0.7978846, %v1166_v17  ;;  %v1153_v22 = vmul.f32 %v1137_v5, %v4126_v43 }
 0x2d7   : > { %v3263_v0 = vpop.eup %3262  ;;  %v1207_v40 = vadd.f32 1.0, %v3261_v29  ;;  %v1158_v32 = vmul.f32 %v1142_v62, %v4155_v14  ;;  %v1168_v34 = vadd.f32 %v1152_v47, %v4131_v30  ;;  %v1155_v3 = vmul.f32 %v1139_v24, %v4140_v7 }
 0x2d8   : > { %v3265_v26 = vpop.eup %3264  ;;  %v1209_v42 = vadd.f32 1.0, %v3263_v0  ;;  %3272 = vtanh.f32 %v1178_v21  ;;  %v1172_v35 = vadd.f32 %v1156_v20, %v4152_v18  ;;  %v1157_v52 = vmul.f32 %v1141_v27, %v4145_v55  ;;  %v1658_v27 = vpop.xlane.xlu1 %1657 }
 0x2d9   : > { %v3267_v1 = vpop.eup %3266  ;;  %v1211_v15 = vadd.f32 1.0, %v3265_v26  ;;  %3274 = vtanh.f32 %v1182_v58  ;;  %v1184_v56 = vmul.f32 0.7978846, %v1168_v34  ;;  %v1223_v57 = vmul.f32 %v1207_v40, %v4109_v51 }
 0x2da   : > { %v1213_v38 = vadd.f32 1.0, %v3267_v1  ;;  %v1188_v46 = vmul.f32 0.7978846, %v1172_v35  ;;  %v1170_v49 = vadd.f32 %v1154_v2, %v4137_v41  ;;  %v4187_v61 = vmul.f32 %v1209_v42, %v4114_v37  ;;  %v1656_v42 = vpop.xlane.xlu0 %1655  ;;  %v3172_v1 = vld [vmem:[#allocation6 + $0x100] ss:$16 sps:$4 sm:$0xff]  }
 0x2db   : > { %v1227_v33 = vmul.f32 %v1211_v15, %v1099_v39  ;;  %3276 = vtanh.f32 %v1184_v56  ;;  %v1174_v53 = vadd.f32 %v1158_v32, %v4155_v14  ;;  %v1167_v51 = vadd.f32 %v1151_v28, %v4120_v6 }
 0x2dc   : > { %v4189_v12 = vmul.f32 %v1213_v38, %v1101_v59  ;;  %3278 = vtanh.f32 %v1188_v46  ;;  %v1186_v5 = vmul.f32 0.7978846, %v1170_v49  ;;  %v1171_v39 = vadd.f32 %v1155_v3, %v4140_v7  ;;  %v3175_v49 = vld [vmem:[#allocation6 + $0x108] ss:$16 sps:$4 sm:$0xff]  }
 0x2dd   : > { %v1239_v48 = vpack.c.bf16 %v1227_v33, %v1223_v57  ;;  %v1190_v47 = vmul.f32 0.7978846, %v1174_v53  ;;  %v1169_v37 = vadd.f32 %v1153_v22, %v4126_v43  ;;  %v1183_v59 = vmul.f32 0.7978846, %v1167_v51  ;;  %v3178_v53 = vld [vmem:[#allocation6 + $0x120] ss:$16 sps:$4 sm:$0xff]  }
 0x2de   : > { %v1241_v16 = vpack.c.bf16 %v4189_v12, %v4187_v61  ;;  %3280 = vtanh.f32 %v1186_v5  ;;  %v1187_v62 = vmul.f32 0.7978846, %v1171_v39  ;;  %v1173_v23 = vadd.f32 %v1157_v52, %v4145_v55  ;;  %v3180_v52 = vld [vmem:[#allocation6 + $0x124] ss:$16 sps:$4 sm:$0xff]   ;;  %v3183_v51 = vld [vmem:[#allocation6 + $0x12c] ss:$16 sps:$4 sm:$0xff]  }
 0x2df   : > { %v3269_v54 = vpop.eup %3268  ;;  %3282 = vtanh.f32 %v1190_v47  ;;  %v1096_v24 = vmul.f32 0.5, %v4094_v4  ;;  %v1185_v25 = vmul.f32 0.7978846, %v1169_v37  ;;  %v1100_v17 = vmul.f32 0.5, %v4101_v45 }
 0x2e0   : > { %v3271_v29 = vpop.eup %3270  ;;  %v1208_v63 = vadd.f32 1.0, %v3269_v54  ;;  %3284 = vtanh.f32 %v1183_v59  ;;  %v1189_v28 = vmul.f32 0.7978846, %v1173_v23  ;;  %v1098_v26 = vmul.f32 0.5, %v4104_v60 }
 0x2e1   : > { %v1212_v0 = vadd.f32 1.0, %v3271_v29  ;;  %3286 = vtanh.f32 %v1187_v62  ;;  %v1102_v22 = vmul.f32 0.5, %v4107_v36  ;;  %v1664_v45 = vmul.f32 0.0078125, %v1658_v27  ;;  %v3186_v62 = vld [vmem:[#allocation6 + $0x144] ss:$16 sps:$4 sm:$0xff]   ;;  %v1662_v29 = vpop.xlane.xlu1 %1661 }
 0x2e2   : > { %v3273_v2 = vpop.eup %3272  ;;  %v1224_v21 = vmul.f32 %v1208_v63, %v1096_v24  ;;  %3288 = vtanh.f32 %v1185_v25  ;;  %v1104_v56 = vmul.f32 0.5, %v4131_v30  ;;  %v1108_v57 = vmul.f32 0.5, %v4152_v18  ;;  %v3189_v27 = vld [vmem:[#allocation6 + $0x14c] ss:$16 sps:$4 sm:$0xff]  }
 0x2e3   : > { %v3275_v20 = vpop.eup %3274  ;;  %v1228_v58 = vmul.f32 %v1212_v0, %v1100_v17  ;;  %v1210_v40 = vadd.f32 1.0, %v3273_v2  ;;  %3290 = vtanh.f32 %v1189_v28  ;;  %v1663_v36 = vmul.f32 0.0078125, %v1656_v42  ;;  %v3184_v28 = vld [vmem:[#allocation6 + $0x140] ss:$16 sps:$4 sm:$0xff]  }
 0x2e4   : > { %v1214_v4 = vadd.f32 1.0, %v3275_v20  ;;  %v1668_v47 = vadd.f32 1e-06, %v1664_v45  ;;  %v1106_v30 = vmul.f32 0.5, %v4137_v41  ;;  %v1110_v18 = vmul.f32 0.5, %v4155_v14  ;;  %v1660_v14 = vpop.xlane.xlu0 %1659 }
 0x2e5   : > { %v3277_v32 = vpop.eup %3276  ;;  %v1240_v34 = vpack.c.bf16 %v1228_v58, %v1224_v21  ;;  %v1226_v15 = vmul.f32 %v1210_v40, %v1098_v26  ;;  %v1667_v25 = vadd.f32 1e-06, %v1663_v36  ;;  %v1103_v20 = vmul.f32 0.5, %v4120_v6  ;;  %v3187_v6 = vld [vmem:[#allocation6 + $0x148] ss:$16 sps:$4 sm:$0xff]  }
 0x2e6   : > { %v3279_v3 = vpop.eup %3278  ;;  %v1230_v35 = vmul.f32 %v1214_v4, %v1102_v22  ;;  %v1216_v38 = vadd.f32 1.0, %v3277_v32  ;;  %3292 = vrsqrt.f32 %v1668_v47  ;;  %v1107_v61 = vmul.f32 0.5, %v4140_v7  ;;  %v3192_v22 = vld [vmem:[#allocation6 + $0x164] ss:$16 sps:$4 sm:$0xff]  }
 0x2e7   : > { %1542 = vmatprep.mubr.bf16.mxu0 %v1240_v34  ;;  %v1220_v60 = vadd.f32 1.0, %v3279_v3  ;;  %v1666_v21 = vmul.f32 0.0078125, %v1662_v29  ;;  %v1105_v40 = vmul.f32 0.5, %v4126_v43  ;;  %v1109_v42 = vmul.f32 0.5, %v4145_v55  ;;  %v3190_v43 = vld [vmem:[#allocation6 + $0x160] ss:$16 sps:$4 sm:$0xff]  }
 0x2e8   : > { %v3281_v33 = vpop.eup %3280  ;;  %v1242_v46 = vpack.c.bf16 %v1230_v35, %v1226_v15  ;;  %1543 = vmatmul.mubr.bf16.vlgmr.msra.gmra.mrb[8].mxu0 %v1239_v48  ;;  %v1232_v39 = vmul.f32 %v1216_v38, %v1104_v56  ;;  %v3181_v48 = vld [vmem:[#allocation6 + $0x128] ss:$16 sps:$4 sm:$0xff]   ;;  %3294 = vrsqrt.f32 %v1667_v25  ;;  %v1665_v34 = vmul.f32 0.0078125, %v1660_v14  ;;  %v3195_v15 = vld [vmem:[#allocation6 + $0x16c] ss:$16 sps:$4 sm:$0xff]  }
 0x2e9   : > { %v3283_v5 = vpop.eup %3282  ;;  %1922 = vmatpush1.bf16.msra.mxu0 %v3172_v1  ;;  %v1236_v37 = vmul.f32 %v1220_v60, %v1108_v57  ;;  %v1218_v54 = vadd.f32 1.0, %v3281_v33  ;;  %v1670_v35 = vadd.f32 1e-06, %v1666_v21  ;;  %v3198_v38 = vld [vmem:[#allocation6 + $0x184] ss:$16 sps:$4 sm:$0xff]  }
 0x2ea   : > { %1591 = vmatprep.mubr.bf16.mxu1 %v1242_v46  ;;  %1923 = vmatprep.subr.bf16.mxu0 %v3180_v52  ;;  %v1222_v59 = vadd.f32 1.0, %v3283_v5  ;;  %v3285_v23 = vpop.eup %3284  ;;  %v1669_v56 = vadd.f32 1e-06, %v1665_v34  ;;  %v3193_v55 = vld [vmem:[#allocation6 + $0x168] ss:$16 sps:$4 sm:$0xff]   ;;  %v3222_v21 = vld [vmem:[#allocation8 + $0x100] sm:$0xff]  }
 0x2eb   : > { %1592 = vmatmul.mubr.bf16.vlgmr.msra.gmra.mrb[8].mxu1 %v1241_v16  ;;  %v1244_v24 = vpack.c.bf16 %v1236_v37, %v1232_v39  ;;  %v3287_v63 = vpop.eup %3286  ;;  %v1234_v17 = vmul.f32 %v1218_v54, %v1106_v30  ;;  %v1215_v2 = vadd.f32 1.0, %v3285_v23  ;;  %v3201_v57 = vld [vmem:[#allocation6 + $0x18c] ss:$16 sps:$4 sm:$0xff]   ;;  %3296 = vrsqrt.f32 %v1670_v35  ;;  %v3196_v60 = vld [vmem:[#allocation6 + $0x180] ss:$16 sps:$4 sm:$0xff]  }
 0x2ec   : > { %1975 = vmatpush1.bf16.msra.mxu1 %v3175_v49  ;;  %v1238_v0 = vmul.f32 %v1222_v59, %v1110_v18  ;;  %v3289_v41 = vpop.eup %3288  ;;  %v1219_v12 = vadd.f32 1.0, %v3287_v63  ;;  %v3204_v36 = vld [vmem:[#allocation6 + $0x1a4] ss:$16 sps:$4 sm:$0xff]   ;;  %3298 = vrsqrt.f32 %v1669_v56  ;;  %v3199_v46 = vld [vmem:[#allocation6 + $0x188] ss:$16 sps:$4 sm:$0xff]  }
 0x2ed   : > { %1976 = vmatprep.subr.bf16.mxu1 %v3183_v51  ;;  %1924 = vmatpush1.bf16.msra.mxu0 %v3178_v53  ;;  %v3291_v16 = vpop.eup %3290  ;;  %v1217_v26 = vadd.f32 1.0, %v3289_v41  ;;  %v1231_v4 = vmul.f32 %v1215_v2, %v1103_v20  ;;  %v3207_v49 = vld [vmem:[#allocation6 + $0x1ac] ss:$16 sps:$4 sm:$0xff]   ;;  %v3202_v5 = vld [vmem:[#allocation6 + $0x1a0] ss:$16 sps:$4 sm:$0xff]  }
 0x2ee   : > { %1550 = vmatprep.mubr.bf16.mxu0 %v1244_v24  ;;  %v1246_v58 = vpack.c.bf16 %v1238_v0, %v1234_v17  ;;  %1925 = vmatprep.subr.bf16.mxu0 %v3186_v62  ;;  %v1235_v32 = vmul.f32 %v1219_v12, %v1107_v61  ;;  %v1221_v45 = vadd.f32 1.0, %v3291_v16  ;;  %v3210_v51 = vld [vmem:[#allocation6 + $0x1c4] ss:$16 sps:$4 sm:$0xff]   ;;  %v3205_v39 = vld [vmem:[#allocation6 + $0x1a8] ss:$16 sps:$4 sm:$0xff]  }
 0x2ef   : > { %v1233_v1 = vmul.f32 %v1217_v26, %v1105_v40  ;;  %v3213_v54 = vld [vmem:[#allocation6 + $0x1cc] ss:$16 sps:$4 sm:$0xff]   ;;  %v2792_v30 = vld [vmem:[%s4504_s28 + $0x1] ss:$0 sm:$0xff]  ;;  %v3216_v62 = vld [vmem:[#allocation6 + $0x1e4] ss:$16 sps:$4 sm:$0xff]  }
 0x2f0   : > { %1977 = vmatpush1.bf16.msra.mxu1 %v3181_v48  ;;  %1599 = vmatprep.mubr.bf16.mxu1 %v1246_v58  ;;  %v1243_v7 = vpack.c.bf16 %v1235_v32, %v1231_v4  ;;  %v1237_v3 = vmul.f32 %v1221_v45, %v1109_v42  ;;  %v3293_v33 = vpop.eup %3292  ;;  %v3208_v18 = vld [vmem:[#allocation6 + $0x1c0] ss:$16 sps:$4 sm:$0xff]   ;;  %v3219_v48 = vld [vmem:[#allocation6 + $0x1ec] ss:$16 sps:$4 sm:$0xff]   ;;  %v3217_v0 = vld [vmem:[#allocation6 + $0x1e8] ss:$16 sps:$4 sm:$0xff]  }
 0x2f1   : > { %1978 = vmatprep.subr.bf16.mxu1 %v3189_v27  ;;  %1926 = vmatpush1.bf16.msra.mxu0 %v3184_v28  ;;  %v1676_v47 = vmul.f32 %v3293_v33, %v4050_v31  ;;  %v3211_v31 = vld [vmem:[#allocation6 + $0x1c8] ss:$16 sps:$4 sm:$0xff]   ;;  %v2794_v63 = vld [vmem:[%s4505_s27 + $0x1] ss:$0 sm:$0xff]  ;;  %v3220_v12 = vld [vmem:[#allocation8 + $0x140] sm:$0xff]  }
 0x2f2   : > { %1927 = vmatprep.subr.bf16.mxu0 %v3192_v22  ;;  %1551 = vmatmul.mubr.bf16.gmra.mrb[12].mxu0 %v1243_v7  ;;  %v1245_v52 = vpack.c.bf16 %v1237_v3, %v1233_v1  ;;  %v3295_v53 = vpop.eup %3294  ;;  %v3221_v16 = vld [vmem:[#allocation8 + $0x1c0] sm:$0xff]   ;;  %v3224_v58 = vld [vmem:[#allocation8 + $0x148] sm:$0xff]   ;;  %v3229_v4 = vld [vmem:[#allocation8 + $0x1d0] sm:$0xff]  }
 0x2f3   : > { %1953 = vmatprep.mubr.bf16.mxu0 %v3535_v44  ;;  %v1675_v37 = vmul.f32 %v3295_v53, %v4045_v50  ;;  %v1688_v59 = vmul.f32 %v2792_v30, %v1676_v47  ;;  %v3214_v50 = vld [vmem:[#allocation6 + $0x1e0] ss:$16 sps:$4 sm:$0xff]   ;;  %v3225_v40 = vld [vmem:[#allocation8 + $0x1c8] sm:$0xff]   ;;  %v3232_v45 = vld [vmem:[#allocation8 + $0x158] sm:$0xff]  }
 0x2f4   : > { %1979 = vmatpush1.bf16.msra.mxu1 %v3187_v6  ;;  %v3226_v26 = vld [vmem:[#allocation8 + $0x108] sm:$0xff]   ;;  %v3230_v32 = vld [vmem:[#allocation8 + $0x110] sm:$0xff]   ;;  %v3233_v34 = vld [vmem:[#allocation8 + $0x1d8] sm:$0xff]  }
 0x2f5   : > { %1600 = vmatmul.mubr.bf16.gmra.mrb[12].mxu1 %v1245_v52  ;;  %1980 = vmatprep.subr.bf16.mxu1 %v3195_v15  ;;  %v3297_v23 = vpop.eup %3296  ;;  %v1687_v29 = vmul.f32 %v2792_v30, %v1675_v37  ;;  %v1700_v25 = vadd.f32 %v2794_v63, %v1688_v59  ;;  %v3227_v22 = vld [vmem:[#allocation8 + $0x188] sm:$0xff]   ;;  %v3231_v42 = vld [vmem:[#allocation8 + $0x190] sm:$0xff]   ;;  %v3234_v6 = vld [vmem:[#allocation8 + $0x118] sm:$0xff]  }
 0x2f6   : > { %1928 = vmatpush1.bf16.msra.mxu0 %v3190_v43  ;;  %2006 = vmatprep.mubr.bf16.mxu1 %v3535_v44  ;;  %v3299_v24 = vpop.eup %3298  ;;  %v1678_v17 = vmul.f32 %v3297_v23, %v4064_v13  ;;  %v3235_v7 = vld [vmem:[#allocation8 + $0x198] sm:$0xff]   ;;  %v3236_v1 = vld [vmem:[#allocation8 + $0x160] sm:$0xff]   ;;  %v3240_v43 = vld [vmem:[#allocation8 + $0x168] sm:$0xff]  }
 0x2f7   : > { %1929 = vmatprep.subr.bf16.mxu0 %v3198_v38  ;;  %v1699_v28 = vadd.f32 %v2794_v63, %v1687_v29  ;;  %v1677_v2 = vmul.f32 %v3299_v24, %v4053_v19  ;;  %v3223_v19 = vld [vmem:[#allocation8 + $0x180] sm:$0xff]   ;;  %v3241_v52 = vld [vmem:[#allocation8 + $0x1e8] sm:$0xff]   ;;  %v3247_v33 = vld [vmem:[#allocation8 + $0x1b0] sm:$0xff]  }
 0x2f8   : > { %1981 = vmatpush1.bf16.msra.mxu1 %v3193_v55  ;;  %v1690_v14 = vmul.f32 %v2792_v30, %v1678_v17  ;;  %v3237_v3 = vld [vmem:[#allocation8 + $0x1e0] sm:$0xff]   ;;  %v3242_v38 = vld [vmem:[#allocation8 + $0x128] sm:$0xff]   ;;  %v3244_v55 = vld [vmem:[#allocation8 + $0x170] sm:$0xff]  }
 0x2f9   : > { %1982 = vmatprep.subr.bf16.mxu1 %v3201_v57  ;;  %v1703_v41 = vpack.c.bf16 %v1700_v25, %v1699_v28  ;;  %v1689_v27 = vmul.f32 %v2792_v30, %v1677_v2  ;;  %v3238_v15 = vld [vmem:[#allocation8 + $0x120] sm:$0xff]   ;;  %v3243_v56 = vld [vmem:[#allocation8 + $0x1a8] sm:$0xff]   ;;  %v3245_v57 = vld [vmem:[#allocation8 + $0x1f0] sm:$0xff]  }
 0x2fa   : > { %1930 = vmatpush1.bf16.msra.mxu0 %v3196_v60  ;;  %v1702_v20 = vadd.f32 %v2794_v63, %v1690_v14  ;;  %v3239_v35 = vld [vmem:[#allocation8 + $0x1a0] sm:$0xff]   ;;  %v3246_v60 = vld [vmem:[#allocation8 + $0x130] sm:$0xff]   ;;  %v3251_v53 = vld [vmem:[#allocation8 + $0x1b8] sm:$0xff]  }
 0x2fb   : > { %1931 = vmatprep.subr.bf16.mxu0 %v3204_v36  ;;  %v1701_v61 = vadd.f32 %v2794_v63, %v1689_v27  ;;  %v3248_v36 = vld [vmem:[#allocation8 + $0x178] sm:$0xff]   ;;  %v2755_v47 = vld [vmem:[%s4507_s30] ss:$0 sm:$0xff] }
 0x2fc   : > { %1983 = vmatpush1.bf16.msra.mxu1 %v3199_v46  ;;  %v3249_v46 = vld [vmem:[#allocation8 + $0x1f8] sm:$0xff]  }
 0x2fd   : > { %1984 = vmatprep.subr.bf16.mxu1 %v3207_v49  ;;  %v1704_v13 = vpack.c.bf16 %v1702_v20, %v1701_v61  ;;  %v3250_v49 = vld [vmem:[#allocation8 + $0x138] sm:$0xff]  }
 0x2fe   : > { %1932 = vmatpush1.bf16.msra.mxu0 %v3202_v5 }
 0x2ff   : > { %1933 = vmatprep.subr.bf16.mxu0 %v3210_v51 }
 0x300   : > { %1985 = vmatpush1.bf16.msra.mxu1 %v3205_v39 }
 0x301   : > { %1986 = vmatprep.subr.bf16.mxu1 %v3213_v54 }
 0x302   : > { %1934 = vmatpush1.bf16.msra.mxu0 %v3208_v18 }
 0x303   : > { %1935 = vmatprep.subr.bf16.mxu0 %v3216_v62 }
 0x304   : > { %1987 = vmatpush1.bf16.msra.mxu1 %v3211_v31 }
 0x305   : > { %1988 = vmatprep.subr.bf16.mxu1 %v3219_v48 }
 0x306   : > { %1936 = vmatpush1.bf16.msra.mxu0 %v3214_v50 }
 0x307   : > { %2925 = vmatprep.subr.bf16.mxu0 %v3220_v12 }
 0x308   : > { %1989 = vmatpush1.bf16.msra.mxu1 %v3217_v0 }
 0x309   : > { %1954 = vmatmul.mubr.bf16.vlgmr.msra.gmra.mrb[16].mxu0 %v1703_v41  ;;  %2953 = vmatprep.subr.bf16.mxu1 %v3221_v16 }
 0x30a   : > { %1963 = vmatprep.mubr.bf16.mxu0 %v3535_v44  ;;  %2926 = vmatpush3.bf16.msra.mxu0 %v3222_v21 }
 0x30b   : > { %2007 = vmatmul.mubr.bf16.vlgmr.msra.gmra.mrb[16].mxu1 %v1703_v41  ;;  %2927 = vmatprep.subr.bf16.mxu0 %v3224_v58 }
 0x30c   : > { %2016 = vmatprep.mubr.bf16.mxu1 %v3535_v44  ;;  %2954 = vmatpush3.bf16.msra.mxu1 %v3223_v19  ;;  %v3228_v44 = vld [vmem:[#allocation8 + $0x150] sm:$0xff]  }
 0x30d   : > { %2955 = vmatprep.subr.bf16.mxu1 %v3225_v40  ;;  %v2795_v40 = vld [vmem:[%s4506_s26 + $0x4] sm:$0xf] }
 0x30e   : > { %2928 = vmatpush3.bf16.msra.mxu0 %v3226_v26  ;;  %v4242_v26 = vrot.slane %v2795_v40, %v3839_v8 }
 0x30f   : > { %2929 = vmatprep.subr.bf16.mxu0 %v3228_v44 }
 0x310   : > { %2956 = vmatpush3.bf16.msra.mxu1 %v3227_v22  ;;  %v4245_v22 = vrot.slane %v2795_v40, %v3845_v10 }
 0x311   : > { %1964 = vmatmul.mubr.bf16.gmra.mrb[20].mxu0 %v1704_v13  ;;  %2957 = vmatprep.subr.bf16.mxu1 %v3229_v4  ;;  %v4248_v4 = vrot.slane %v2795_v40, %v3842_v9 }
 0x312   : > { %2930 = vmatpush3.bf16.msra.mxu0 %v3230_v32 }
 0x313   : > { %2017 = vmatmul.mubr.bf16.gmra.mrb[20].mxu1 %v1704_v13  ;;  %2931 = vmatprep.subr.bf16.mxu0 %v3232_v45 }
 0x314   : > { %2958 = vmatpush3.bf16.msra.mxu1 %v3231_v42 }
 0x315   : > { %2959 = vmatprep.subr.bf16.mxu1 %v3233_v34  ;;  %v4252_v34 = vrot.slane %v2795_v40, %v3848_v11 }
 0x316   : > { %2932 = vmatpush3.bf16.msra.mxu0 %v3234_v6 }
 0x317   : > { %2933 = vmatprep.subr.bf16.mxu0 %v3236_v1 }
 0x318   : > { %2960 = vmatpush3.bf16.msra.mxu1 %v3235_v7 }
 0x319   : > { %2961 = vmatprep.subr.bf16.mxu1 %v3237_v3 }
 0x31a   : > { %2934 = vmatpush3.bf16.msra.mxu0 %v3238_v15 }
 0x31b   : > { %2935 = vmatprep.subr.bf16.mxu0 %v3240_v43 }
 0x31c   : > { %2962 = vmatpush3.bf16.msra.mxu1 %v3239_v35 }
 0x31d   : > { %2963 = vmatprep.subr.bf16.mxu1 %v3241_v52 }
 0x31e   : > { %2936 = vmatpush3.bf16.msra.mxu0 %v3242_v38 }
 0x31f   : > { %2937 = vmatprep.subr.bf16.mxu0 %v3244_v55 }
 0x320   : > { %2964 = vmatpush3.bf16.msra.mxu1 %v3243_v56 }
 0x321   : > { %2965 = vmatprep.subr.bf16.mxu1 %v3245_v57 }
 0x322   : > { %2938 = vmatpush3.bf16.msra.mxu0 %v3246_v60 }
 0x323   : > { %2939 = vmatprep.subr.bf16.mxu0 %v3248_v36 }
 0x324   : > { %2966 = vmatpush3.bf16.msra.mxu1 %v3247_v33 }
 0x325   : > { %2967 = vmatprep.subr.bf16.mxu1 %v3249_v46 }
 0x326   : > { %2940 = vmatpush3.bf16.msra.mxu0 %v3250_v49 }
 0x328   : > { %2968 = vmatpush3.bf16.msra.mxu1 %v3251_v53 }
 0x3bb   : > { %v2885_v5 = vpop.f32.mrb[8].mxu0 }
 0x3bc   : > { %v2886_v51 = vpop.f32.mrb[9].mxu0 }
 0x3bd   : > { %v2887_v39 = vadd.f32 %v2886_v51, %v2885_v5  ;;  %v2888_v37 = vpop.f32.mrb[10].mxu0 }
 0x3be   : > { %v2913_v54 = vpop.f32.mrb[8].mxu1  ;;  %v2889_v30 = vpop.f32.mrb[11].mxu0 }
 0x3bf   : > { %v1545_v18 = vadd.f32 %v2887_v39, %v2755_v47  ;;  %v2914_v59 = vpop.f32.mrb[9].mxu1  ;;  %v2890_v62 = vadd.f32 %v2889_v30, %v2888_v37 }
 0x3c0   : > { %v2915_v23 = vadd.f32 %v2914_v59, %v2913_v54  ;;  %v2916_v31 = vpop.f32.mrb[10].mxu1 }
 0x3c1   : > { %v1548_v29 = vadd.f32 %v2890_v62, %v2755_v47  ;;  %v2917_v48 = vpop.f32.mrb[11].mxu1 }
 0x3c2   : > { %v4230_v24 = vadd.f32 %v2915_v23, %v1545_v18  ;;  %v2918_v50 = vadd.f32 %v2917_v48, %v2916_v31 }
 0x3c4   : > { %v4232_v63 = vadd.f32 %v2918_v50, %v1548_v29 }
 0x3c5   : > { %v2891_v25 = vpop.f32.mrb[12].mxu0 }
 0x3c6   : > { %v2892_v17 = vpop.f32.mrb[13].mxu0 }
 0x3c7   : > { %v2893_v28 = vadd.f32 %v2892_v17, %v2891_v25  ;;  %v2894_v2 = vpop.f32.mrb[14].mxu0 }
 0x3c8   : > { %v2919_v0 = vpop.f32.mrb[12].mxu1  ;;  %v2895_v14 = vpop.f32.mrb[15].mxu0 }
 0x3c9   : > { %v2920_v41 = vpop.f32.mrb[13].mxu1  ;;  %v1553_v27 = vadd.f32 %v2893_v28, %v2755_v47  ;;  %v2896_v13 = vadd.f32 %v2895_v14, %v2894_v2 }
 0x3ca   : > { %v2921_v20 = vadd.f32 %v2920_v41, %v2919_v0  ;;  %v2922_v61 = vpop.f32.mrb[14].mxu1 }
 0x3cb   : > { %v2923_v12 = vpop.f32.mrb[15].mxu1  ;;  %v1556_v21 = vadd.f32 %v2896_v13, %v2755_v47 }
 0x3cc   : > { %v4234_v16 = vadd.f32 %v2921_v20, %v1553_v27  ;;  %v2924_v19 = vadd.f32 %v2923_v12, %v2922_v61 }
 0x3ce   : > { %v4236_v58 = vadd.f32 %v2924_v19, %v1556_v21 }
 0x3dc   : > { %v1955_v44 = vpop.f32.mrb[16].mxu0 }
 0x3dd   : > { %v1956_v32 = vadd.f32 %v1955_v44, %v4242_v26  ;;  %v1957_v42 = vpop.f32.mrb[17].mxu0 }
 0x3de   : > { %v2008_v45 = vpop.f32.mrb[16].mxu1  ;;  %v1959_v6 = vpop.f32.mrb[18].mxu0  ;;  %v4257_v15 = vadd.f32 %v1957_v42, %v4248_v4 }
 0x3df   : > { %v2043_v7 = vmul.f32 0.044715, %v1956_v32  ;;  %v2009_v1 = vadd.f32 %v2008_v45, %v4245_v22  ;;  %v2010_v8 = vpop.f32.mrb[17].mxu1  ;;  %v1960_v3 = vadd.f32 %v1959_v6, %v4242_v26  ;;  %v1961_v10 = vpop.f32.mrb[19].mxu0  ;;  %v4274_v37 = vmul.f32 0.5, %v1956_v32 }
 0x3e0   : > { %v2012_v9 = vpop.f32.mrb[18].mxu1  ;;  %v4260_v35 = vadd.f32 %v1961_v10, %v4248_v4  ;;  %v4263_v11 = vadd.f32 %v2010_v8, %v4252_v34  ;;  %v2044_v33 = vmul.f32 0.044715, %v4257_v15 }
 0x3e1   : > { %v2059_v43 = vmul.f32 %v2043_v7, %v1956_v32  ;;  %v2045_v52 = vmul.f32 0.044715, %v2009_v1  ;;  %v2014_v38 = vpop.f32.mrb[19].mxu1  ;;  %v2047_v56 = vmul.f32 0.044715, %v1960_v3  ;;  %v4266_v55 = vadd.f32 %v2012_v9, %v4245_v22 }
 0x3e2   : > { %v2048_v46 = vmul.f32 0.044715, %v4260_v35  ;;  %v4271_v49 = vadd.f32 %v2014_v38, %v4252_v34  ;;  %v2046_v54 = vmul.f32 0.044715, %v4263_v11  ;;  %v4280_v31 = vmul.f32 0.5, %v2009_v1 }
 0x3e3   : > { %v2075_v57 = vmul.f32 %v2059_v43, %v1956_v32  ;;  %v2061_v60 = vmul.f32 %v2045_v52, %v2009_v1  ;;  %v2063_v36 = vmul.f32 %v2047_v56, %v1960_v3  ;;  %v2049_v51 = vmul.f32 0.044715, %v4266_v55 }
 0x3e4   : > { %v1965_v53 = vpop.f32.mrb[20].mxu0  ;;  %v2060_v17 = vmul.f32 %v2044_v33, %v4257_v15  ;;  %v2064_v28 = vmul.f32 %v2048_v46, %v4260_v35  ;;  %v2050_v2 = vmul.f32 0.044715, %v4271_v49  ;;  %v2062_v13 = vmul.f32 %v2046_v54, %v4263_v11 }
 0x3e5   : > { %v2091_v5 = vadd.f32 %v2075_v57, %v1956_v32  ;;  %v2077_v47 = vmul.f32 %v2061_v60, %v2009_v1  ;;  %v1967_v39 = vpop.f32.mrb[21].mxu0  ;;  %v2079_v30 = vmul.f32 %v2063_v36, %v1960_v3  ;;  %v4278_v18 = vadd.f32 %v1965_v53, %v4242_v26 }
 0x3e6   : > { %v2018_v59 = vpop.f32.mrb[20].mxu1  ;;  %v1969_v62 = vpop.f32.mrb[22].mxu0  ;;  %v2065_v48 = vmul.f32 %v2049_v51, %v4266_v55  ;;  %v4288_v20 = vadd.f32 %v1967_v39, %v4248_v4  ;;  %v2076_v42 = vmul.f32 %v2060_v17, %v4257_v15  ;;  %v2066_v45 = vmul.f32 %v2050_v2, %v4271_v49 }
 0x3e7   : > { %v2107_v23 = vmul.f32 0.7978846, %v2091_v5  ;;  %v2093_v29 = vadd.f32 %v2077_v47, %v2009_v1  ;;  %v2020_v50 = vpop.f32.mrb[21].mxu1  ;;  %v1971_v25 = vpop.f32.mrb[23].mxu0  ;;  %v2095_v0 = vadd.f32 %v2079_v30, %v1960_v3  ;;  %v2051_v21 = vmul.f32 0.044715, %v4278_v18 }
 0x3e8   : > { %v2022_v41 = vpop.f32.mrb[22].mxu1  ;;  %v2081_v27 = vmul.f32 %v2065_v48, %v4266_v55  ;;  %v4293_v19 = vadd.f32 %v2018_v59, %v4245_v22  ;;  %v2052_v44 = vmul.f32 0.044715, %v4288_v20  ;;  %v4298_v32 = vadd.f32 %v2020_v50, %v4252_v34 }
 0x3e9   : > { %3300 = vtanh.f32 %v2107_v23  ;;  %v2109_v14 = vmul.f32 0.7978846, %v2093_v29  ;;  %v2024_v61 = vpop.f32.mrb[23].mxu1  ;;  %v2111_v12 = vmul.f32 0.7978846, %v2095_v0  ;;  %v4303_v6 = vadd.f32 %v1969_v62, %v4242_v26 }
 0x3ea   : > { %v2097_v40 = vadd.f32 %v2081_v27, %v4266_v55  ;;  %v2080_v1 = vmul.f32 %v2064_v28, %v4260_v35  ;;  %v2054_v8 = vmul.f32 0.044715, %v4298_v32  ;;  %v4308_v10 = vadd.f32 %v2022_v41, %v4245_v22 }
 0x3eb   : > { %3302 = vtanh.f32 %v2109_v14  ;;  %v2031_v9 = vmul.f32 0.5, %v1960_v3  ;;  %v2067_v43 = vmul.f32 %v2051_v21, %v4278_v18  ;;  %v4312_v52 = vadd.f32 %v1971_v25, %v4248_v4 }
 0x3ec   : > { %3304 = vtanh.f32 %v2111_v12  ;;  %v2113_v7 = vmul.f32 0.7978846, %v2097_v40  ;;  %v4315_v38 = vadd.f32 %v2024_v61, %v4252_v34  ;;  %v2078_v26 = vmul.f32 %v2062_v13, %v4263_v11 }
 0x3ed   : > { %v2053_v56 = vmul.f32 0.044715, %v4293_v19  ;;  %v2068_v57 = vmul.f32 %v2052_v44, %v4288_v20  ;;  %v2082_v60 = vmul.f32 %v2066_v45, %v4271_v49  ;;  %v2055_v22 = vmul.f32 0.044715, %v4303_v6 }
 0x3ee   : > { %3306 = vtanh.f32 %v2113_v7  ;;  %v2056_v3 = vmul.f32 0.044715, %v4312_v52  ;;  %v2058_v33 = vmul.f32 0.044715, %v4315_v38  ;;  %v2070_v4 = vmul.f32 %v2054_v8, %v4298_v32 }
 0x3ef   : > { %v2057_v34 = vmul.f32 0.044715, %v4308_v10  ;;  %v2092_v36 = vadd.f32 %v2076_v42, %v4257_v15  ;;  %v2096_v46 = vadd.f32 %v2080_v1, %v4260_v35  ;;  %v2033_v53 = vmul.f32 0.5, %v4266_v55 }
 0x3f0   : > { %v2083_v5 = vmul.f32 %v2067_v43, %v4278_v18  ;;  %v2072_v47 = vmul.f32 %v2056_v3, %v4312_v52  ;;  %v2074_v51 = vmul.f32 %v2058_v33, %v4315_v38  ;;  %v2069_v54 = vmul.f32 %v2053_v56, %v4293_v19 }
 0x3f1   : > { %v2084_v30 = vmul.f32 %v2068_v57, %v4288_v20  ;;  %v2108_v59 = vmul.f32 0.7978846, %v2092_v36  ;;  %v2112_v62 = vmul.f32 0.7978846, %v2096_v46  ;;  %v2071_v23 = vmul.f32 %v2055_v22, %v4303_v6 }
 0x3f2   : > { %v2088_v29 = vmul.f32 %v2072_v47, %v4312_v52  ;;  %v2094_v48 = vadd.f32 %v2078_v26, %v4263_v11  ;;  %v2098_v55 = vadd.f32 %v2082_v60, %v4271_v49  ;;  %v2086_v25 = vmul.f32 %v2070_v4, %v4298_v32 }
 0x3f3   : > { %v3301_v39 = vpop.eup %3300  ;;  %v2073_v17 = vmul.f32 %v2057_v34, %v4308_v10  ;;  %3308 = vtanh.f32 %v2108_v59  ;;  %v2090_v2 = vmul.f32 %v2074_v51, %v4315_v38  ;;  %v2100_v13 = vadd.f32 %v2084_v30, %v4288_v20 }
 0x3f4   : > { %v2139_v0 = vadd.f32 1.0, %v3301_v39  ;;  %3310 = vtanh.f32 %v2112_v62  ;;  %v2110_v41 = vmul.f32 0.7978846, %v2094_v48  ;;  %v2114_v14 = vmul.f32 0.7978846, %v2098_v55 }
 0x3f5   : > { %v3303_v50 = vpop.eup %3302  ;;  %v2104_v12 = vadd.f32 %v2088_v29, %v4312_v52  ;;  %v2085_v21 = vmul.f32 %v2069_v54, %v4293_v19  ;;  %v2087_v40 = vmul.f32 %v2071_v23, %v4303_v6  ;;  %v2116_v7 = vmul.f32 0.7978846, %v2100_v13 }
 0x3f6   : > { %v3305_v28 = vpop.eup %3304  ;;  %v2141_v61 = vadd.f32 1.0, %v3303_v50  ;;  %3312 = vtanh.f32 %v2110_v41  ;;  %v2155_v44 = vmul.f32 %v2139_v0, %v4274_v37  ;;  %v2089_v8 = vmul.f32 %v2073_v17, %v4308_v10 }
 0x3f7   : > { %v2143_v27 = vadd.f32 1.0, %v3305_v28  ;;  %3314 = vtanh.f32 %v2114_v14  ;;  %v2120_v1 = vmul.f32 0.7978846, %v2104_v12  ;;  %v2102_v26 = vadd.f32 %v2086_v25, %v4298_v32 }
 0x3f8   : > { %v3307_v42 = vpop.eup %3306  ;;  %v2106_v56 = vadd.f32 %v2090_v2, %v4315_v38  ;;  %v2157_v60 = vmul.f32 %v2141_v61, %v4280_v31  ;;  %3316 = vtanh.f32 %v2116_v7  ;;  %v2099_v22 = vadd.f32 %v2083_v5, %v4278_v18 }
 0x3f9   : > { %v2159_v45 = vmul.f32 %v2143_v27, %v2031_v9  ;;  %v2145_v43 = vadd.f32 1.0, %v3307_v42  ;;  %3318 = vtanh.f32 %v2120_v1  ;;  %v2118_v37 = vmul.f32 0.7978846, %v2102_v26 }
 0x3fa   : > { %v2122_v33 = vmul.f32 0.7978846, %v2106_v56  ;;  %v2103_v9 = vadd.f32 %v2087_v40, %v4303_v6  ;;  %v2115_v4 = vmul.f32 0.7978846, %v2099_v22  ;;  %v2101_v36 = vadd.f32 %v2085_v21, %v4293_v19 }
 0x3fb   : > { %v2171_v57 = vpack.c.bf16 %v2159_v45, %v2155_v44  ;;  %v2161_v3 = vmul.f32 %v2145_v43, %v2033_v53  ;;  %3320 = vtanh.f32 %v2118_v37  ;;  %v2105_v46 = vadd.f32 %v2089_v8, %v4308_v10 }
 0x3fc   : > { %3322 = vtanh.f32 %v2122_v33  ;;  %v2119_v51 = vmul.f32 0.7978846, %v2103_v9  ;;  %v2117_v5 = vmul.f32 0.7978846, %v2101_v36  ;;  %v2028_v54 = vmul.f32 0.5, %v4257_v15 }
 0x3fd   : > { %v2173_v34 = vpack.c.bf16 %v2161_v3, %v2157_v60  ;;  %v3309_v47 = vpop.eup %3308  ;;  %3324 = vtanh.f32 %v2115_v4  ;;  %v2121_v53 = vmul.f32 0.7978846, %v2105_v46  ;;  %v2032_v30 = vmul.f32 0.5, %v4260_v35 }
 0x3fe   : > { %v3311_v31 = vpop.eup %3310  ;;  %v2140_v39 = vadd.f32 1.0, %v3309_v47  ;;  %3326 = vtanh.f32 %v2119_v51  ;;  %v2030_v50 = vmul.f32 0.5, %v4263_v11  ;;  %v2034_v25 = vmul.f32 0.5, %v4271_v49  ;;  %v2829_v47 = vld [vmem:[%s4507_s30 + $0x1] ss:$0 sm:$0xff] }
 0x3ff   : > { %v2144_v59 = vadd.f32 1.0, %v3311_v31  ;;  %3328 = vtanh.f32 %v2117_v5  ;;  %v2036_v14 = vmul.f32 0.5, %v4288_v20  ;;  %v2040_v27 = vmul.f32 0.5, %v4312_v52 }
 0x400   : > { %v3313_v62 = vpop.eup %3312  ;;  %v2156_v29 = vmul.f32 %v2140_v39, %v2028_v54  ;;  %3330 = vtanh.f32 %v2121_v53  ;;  %v2038_v42 = vmul.f32 0.5, %v4298_v32  ;;  %v2042_v45 = vmul.f32 0.5, %v4315_v38 }
 0x401   : > { %v3315_v23 = vpop.eup %3314  ;;  %v2160_v48 = vmul.f32 %v2144_v59, %v2032_v30  ;;  %v2142_v55 = vadd.f32 1.0, %v3313_v62  ;;  %v2035_v52 = vmul.f32 0.5, %v4278_v18  ;;  %v2037_v3 = vmul.f32 0.5, %v4293_v19 }
 0x402   : > { %v2146_v17 = vadd.f32 1.0, %v3315_v23  ;;  %v3317_v0 = vpop.eup %3316  ;;  %v2041_v32 = vmul.f32 0.5, %v4308_v10  ;;  %v2788_v10 = vld [vmem:[%s4508_s4] ss:$0 sm:$0xff] }
 0x403   : > { %v2172_v28 = vpack.c.bf16 %v2160_v48, %v2156_v29  ;;  %v3319_v2 = vpop.eup %3318  ;;  %v2158_v15 = vmul.f32 %v2142_v55, %v2030_v50  ;;  %v2148_v35 = vadd.f32 1.0, %v3317_v0  ;;  %v1615_v59 = vmul.f32 %v2788_v10, %v4230_v24  ;;  %v2863_v29 = vld [vmem:[%s4508_s4 + $0x1] ss:$0 sm:$0xff]  ;;  %v3332_v0 = vld [vmem:[#allocation2 + $0x8] sm:$0xff] }
 0x404   : > { %v2162_v41 = vmul.f32 %v2146_v17, %v2034_v25  ;;  %v2152_v61 = vadd.f32 1.0, %v3319_v2  ;;  %v1616_v50 = vmul.f32 %v2788_v10, %v4232_v63 }
 0x405   : > { %2476 = vmatprep.mubr.bf16.mxu0 %v2172_v28  ;;  %v3321_v13 = vpop.eup %3320  ;;  %v2164_v11 = vmul.f32 %v2148_v35, %v2036_v14  ;;  %v1619_v28 = vadd.f32 %v3332_v0, %v1615_v59 }
 0x406   : > { %v2174_v12 = vpack.c.bf16 %v2162_v41, %v2158_v15  ;;  %2477 = vmatmul.mubr.bf16.vlgmr.msra.gmra.mrb[24].mxu0 %v2171_v57  ;;  %v3323_v21 = vpop.eup %3322  ;;  %v2168_v40 = vmul.f32 %v2152_v61, %v2040_v27  ;;  %v2150_v49 = vadd.f32 1.0, %v3321_v13  ;;  %v2039_v57 = vmul.f32 0.5, %v4303_v6  ;;  %v3333_v41 = vld [vmem:[#allocation2 + $0x10] sm:$0xff] }
 0x407   : > { %v3325_v44 = vpop.eup %3324  ;;  %v2154_v7 = vadd.f32 1.0, %v3323_v21  ;;  %v1620_v35 = vadd.f32 %v3333_v41, %v1616_v50 }
 0x408   : > { %2525 = vmatprep.mubr.bf16.mxu1 %v2174_v12  ;;  %v3327_v1 = vpop.eup %3326  ;;  %v2176_v20 = vpack.c.bf16 %v2168_v40, %v2164_v11  ;;  %v2147_v8 = vadd.f32 1.0, %v3325_v44  ;;  %v2166_v26 = vmul.f32 %v2150_v49, %v2038_v42  ;;  %v1617_v49 = vmul.f32 %v2788_v10, %v4234_v16 }
 0x409   : > { %2526 = vmatmul.mubr.bf16.vlgmr.msra.gmra.mrb[24].mxu1 %v2173_v34  ;;  %v3329_v43 = vpop.eup %3328  ;;  %v2170_v56 = vmul.f32 %v2154_v7, %v2042_v45  ;;  %v2151_v60 = vadd.f32 1.0, %v3327_v1 }
 0x40a   : > { %v3331_v22 = vpop.eup %3330  ;;  %2484 = vmatprep.mubr.bf16.mxu0 %v2176_v20  ;;  %v2149_v38 = vadd.f32 1.0, %v3329_v43  ;;  %v2163_v33 = vmul.f32 %v2147_v8, %v2035_v52  ;;  %v1618_v20 = vmul.f32 %v2788_v10, %v4236_v58 }
 0x40b   : > { %v2178_v37 = vpack.c.bf16 %v2170_v56, %v2166_v26  ;;  %v2167_v9 = vmul.f32 %v2151_v60, %v2039_v57  ;;  %v2153_v4 = vadd.f32 1.0, %v3331_v22  ;;  %v3334_v26 = vld [vmem:[#allocation2 + $0x18] sm:$0xff]  ;;  %v3335_v60 = vld [vmem:[#allocation2 + $0x20] sm:$0xff] }
 0x40c   : > { %v2165_v34 = vmul.f32 %v2149_v38, %v2037_v3  ;;  %v1621_v56 = vadd.f32 %v3334_v26, %v1617_v49  ;;  %v1622_v22 = vadd.f32 %v3335_v60, %v1618_v20 }
 0x40d   : > { %2533 = vmatprep.mubr.bf16.mxu1 %v2178_v37  ;;  %v2175_v18 = vpack.c.bf16 %v2167_v9, %v2163_v33  ;;  %v2169_v36 = vmul.f32 %v2153_v4, %v2041_v32 }
 0x40f   : > { %2485 = vmatmul.mubr.bf16.gmra.mrb[28].mxu0 %v2175_v18  ;;  %v2177_v46 = vpack.c.bf16 %v2169_v36, %v2165_v34 }
 0x411   : > { %2534 = vmatmul.mubr.bf16.gmra.mrb[28].mxu1 %v2177_v46 }
 0x4d9   : > { %v2941_v6 = vpop.f32.mrb[24].mxu0 }
 0x4da   : > { %v2942_v19 = vpop.f32.mrb[25].mxu0 }
 0x4db   : > { %v2943_v51 = vadd.f32 %v2942_v19, %v2941_v6  ;;  %v2944_v31 = vpop.f32.mrb[26].mxu0 }
 0x4dc   : > { %v2969_v39 = vpop.f32.mrb[24].mxu1  ;;  %v2945_v5 = vpop.f32.mrb[27].mxu0 }
 0x4dd   : > { %v2479_v53 = vadd.f32 %v2943_v51, %v2829_v47  ;;  %v2970_v54 = vpop.f32.mrb[25].mxu1  ;;  %v2946_v30 = vadd.f32 %v2945_v5, %v2944_v31 }
 0x4de   : > { %v2971_v62 = vadd.f32 %v2970_v54, %v2969_v39  ;;  %v2972_v23 = vpop.f32.mrb[26].mxu1 }
 0x4df   : > { %v2482_v48 = vadd.f32 %v2946_v30, %v2829_v47  ;;  %v2973_v55 = vpop.f32.mrb[27].mxu1 }
 0x4e0   : > { %v2528_v25 = vadd.f32 %v2971_v62, %v2479_v53  ;;  %v2974_v17 = vadd.f32 %v2973_v55, %v2972_v23 }
 0x4e2   : > { %v2550_v2 = vmul.f32 %v2863_v29, %v2528_v25  ;;  %v2531_v15 = vadd.f32 %v2974_v17, %v2482_v48  ;;  %v2947_v24 = vpop.f32.mrb[28].mxu0 }
 0x4e3   : > { %v2948_v61 = vpop.f32.mrb[29].mxu0 }
 0x4e4   : > { %v2554_v14 = vadd.f32 %v2550_v2, %v1619_v28  ;;  %v2551_v27 = vmul.f32 %v2863_v29, %v2531_v15  ;;  %v2975_v13 = vpop.f32.mrb[28].mxu1  ;;  %v2949_v12 = vadd.f32 %v2948_v61, %v2947_v24  ;;  %v2950_v21 = vpop.f32.mrb[30].mxu0 }
 0x4e5   : > { %v2976_v11 = vpop.f32.mrb[29].mxu1  ;;  %v2951_v40 = vpop.f32.mrb[31].mxu0 }
 0x4e6   : > { %2558 = vst [vmem:[%s4380_s13] sm:$0xff] %v2554_v14  ;;  %v2555_v63 = vadd.f32 %v2551_v27, %v1620_v35  ;;  %v2487_v44 = vadd.f32 %v2949_v12, %v2829_v47  ;;  %v2977_v42 = vadd.f32 %v2976_v11, %v2975_v13  ;;  %v2978_v45 = vpop.f32.mrb[30].mxu1  ;;  %v2952_v7 = vadd.f32 %v2951_v40, %v2950_v21 }
 0x4e7   : > { %v2979_v1 = vpop.f32.mrb[31].mxu1 }
 0x4e8   : > { %2559 = vst [vmem:[%s4380_s13 + $0x8] sm:$0xff] %v2555_v63  ;;  %v2536_v52 = vadd.f32 %v2977_v42, %v2487_v44  ;;  %v2490_v8 = vadd.f32 %v2952_v7, %v2829_v47  ;;  %v2980_v43 = vadd.f32 %v2979_v1, %v2978_v45 }
 0x4ea   : > { %v2552_v16 = vmul.f32 %v2863_v29, %v2536_v52  ;;  %v2539_v57 = vadd.f32 %v2980_v43, %v2490_v8 }
 0x4ec   : > { %v2556_v58 = vadd.f32 %v2552_v16, %v1621_v56  ;;  %v2553_v3 = vmul.f32 %v2863_v29, %v2539_v57 }
 0x4ee   : > { %2560 = vst [vmem:[%s4380_s13 + $0x10] sm:$0xff] %v2556_v58  ;;  %v2557_v32 = vadd.f32 %v2553_v3, %v1622_v22 }
 0x4f0   : > { %2561 = vst [vmem:[%s4380_s13 + $0x18] sm:$0xff] %v2557_v32 }
 0x4f1   : > { %3435 = shalt.err (!%p3432_p11)
}
 0x4f2   : > { %s3436_s13 = scalar_lea.hbm %s4394_s29, 512  ;;  %s3440_s20 = scalar_lea.hbm %s4509_s16, 3072 }
 0x4f3   : > { %p3437_p1 = scmp.ne.s32.totalorder %s4394_s29, %s3436_s13  ;;  %p3441_p0 = scmp.lt.u32.totalorder %s4394_s29, %s4509_s16 }
 0x4f4   : > { %p3442_p2 = scmp.lt.u32.totalorder %s3440_s20, %s3436_s13  ;;  %p3444_p4 = scmp.lt.u32.totalorder %s3436_s13, %s4394_s29 }
 0x4f5   : > { %p3438_p5 = pnand %p3437_p1, %p3741_p6 }
 0x4f6   : > { %p3443_p10 = por %p3442_p2, %p3441_p0 }
 0x4f7   : > { %p3439_p9 = pneg %p3438_p5 }
 0x4f8   : > { %p3445_p8 = por %p3444_p4, %p3443_p10 }
 0x4fa   : > { %p3446_p13 = pnand %p3445_p8, %p3439_p9 }
 0x4fc   : > { %3449 = shalt.err (!%p3446_p13)
}
 0x4fd   : > { %s3537_s14 = smov 128   ;;  %s3538_s5 = smov 8  }
 0x4fe   : > { %2994 = dma.vmem_to_hbm [thread:$0]  (%p3741_p6), %s4388_s10, 512, %s4394_s29, %s2563_s15, %s3537_s14, %s3537_s14, %s3538_s5  }
 0x4ff PF: > { %s4510_s7 = sld [smem:[#allocation13_spill]]  ;;  %s4511_s17 = sld [smem:[#allocation14_spill]] }
 0x500   : > { %p3016_p3 = scmp.ge.s32.totalorder %s3524_s24, 2 }
 0x505   : > { %s2593_s9 = sand.u32 1, %s4510_s7   ;;  %p4512_p7 = scmp.ne.s32.totalorder %s4511_s17, 0 }
 0x506   : > { %s2594_s13 = scalar_lea.sflag [#allocation5], %s2593_s9 }
 0x507   : > { %p3008_p12 = pnand %p3016_p3, %p4512_p7 }
 0x509   : > { %3491 = dma.done.wait (!%p3008_p12), %s2594_s13, 512  }
 0x50a   : > { %3493 = vsyncadd (!%p3008_p12), %s2594_s13, 4294966784  ;;  %s28_s24 = sadd.s32 1, %s3524_s24   ;;  %s4513_s25 = sld [smem:[#allocation15_spill]] }
 0x50b   : > { %p25_p11 = scmp.ge.s32.totalorder %s28_s24, 8   ;;  %s4514_s8 = sld [smem:[#allocation16_spill]] }
 0x50c   : > { %s4515_s17 = smov %s3500_s18  ;;  %s4516_s18 = smov %s3504_s19 }
 0x50d   : > { %s4517_s19 = smov %s3760_s6  ;;  %s4518_s20 = smov %s3516_s22 }
 0x50e   : > { %s4519_s21 = smov %s3520_s23  ;;  %27 = sbr.rel (!%p25_p11) target bundleno = 17 (0x11), region = 128 }
 0x510   : > { %s4520_s22 = smov %s4513_s25 }
 0x511   : > { %s4521_s23 = smov %s4514_s8 }
 0x515   :  { %2599 = vsyncpa [#allocation4], 1 }
 0x516   :  { %2601 = vsyncpa [#allocation4 + $0x1], 1 }
 0x517   :  { %2602 = vsyncpa [#allocation7], 1 }
 0x518   :  { %2603 = vsyncpa [#allocation5], 1 }
 0x519   :  { %2605 = vsyncpa [#allocation5 + $0x1], 1 }

// kernel: tpu_custom_call.1
= control target key start
LH: loop header
LB: loop body
LE: loop exit
PB: predicated region body
PF: predicated region fallthrough
CT: control target
= control target key end

     0   :  { %s4449_s0 = inlined_call_operand.hbm [shape: f32[2,96,128], index: 0, kind: input, shape index: {}]   ;;  %s4450_s1 = inlined_call_operand.vmem [shape: f32[2,3,6,128], index: 1, kind: input, shape index: {}]   ;;  %s4451_s2 = inlined_call_operand.vmem [shape: f32[2,7,128], index: 2, kind: input, shape index: {}]   ;;  %s4452_s3 = inlined_call_operand.vmem [shape: f32[2,1,128], index: 3, kind: input, shape index: {}]   ;;  %s4453_s4 = inlined_call_operand.vmem [shape: f32[2,1,128], index: 4, kind: input, shape index: {}]   ;;  %s4454_s5 = inlined_call_operand.vmem [shape: f32[2,1,128], index: 5, kind: input, shape index: {}]   ;;  %s4455_s6 = inlined_call_operand.hbm [shape: bf16[2,128,512], index: 6, kind: input, shape index: {}]   ;;  %s4456_s7 = inlined_call_operand.vmem [shape: f32[2,1,512], index: 7, kind: input, shape index: {}]   ;;  %s4457_s8 = inlined_call_operand.hbm [shape: bf16[2,512,128], index: 8, kind: input, shape index: {}]   ;;  %s4458_s9 = inlined_call_operand.vmem [shape: f32[2,1,128], index: 9, kind: input, shape index: {}]   ;;  %s4459_s10 = inlined_call_operand.vmem [shape: f32[2,1,128], index: 10, kind: input, shape index: {}]   ;;  %s4460_s11 = inlined_call_operand.hbm [shape: f32[2,96,128], index: 11, kind: output, shape index: {}]  }
   0x1   :  { %4476 = sst [smem:[#allocation17_spill]] %s4453_s4 }
   0x2   :  { %4477 = sst [smem:[#allocation18_spill]] %s4454_s5 }
   0x3   :  { %4478 = sst [smem:[#allocation19_spill]] %s4455_s6 }
   0x4   :  { %4479 = sst [smem:[#allocation20_spill]] %s4456_s7 }
   0x5   :  { %4480 = sst [smem:[#allocation21_spill]] %s4457_s8 }
   0x6   :  { %4481 = sst [smem:[#allocation22_spill]] %s4458_s9 }
   0x7   :  { %4482 = sst [smem:[#allocation23_spill]] %s4459_s10 }
   0x8   :  { %4483 = sst [smem:[#allocation24_spill]] %s4460_s11 }
   0x9   :  { %16 = vsyncpa [#allocation4], 0 }
   0xa   :  { %18 = vsyncpa [#allocation4 + $0x1], 0 }
   0xb   :  { %19 = vsyncpa [#allocation7], 0 }
   0xc   :  { %20 = vsyncpa [#allocation5], 0 }
   0xd   :  { %22 = vsyncpa [#allocation5 + $0x1], 0  ;;  %s3599_s17 = smov 0   ;;  %s3601_s18 = smov 0  }
   0xe   :  { %s3603_s19 = smov 0   ;;  %s3605_s20 = smov 0  }
   0xf   :  { %s3607_s21 = smov 0   ;;  %s3609_s22 = smov 0  }
  0x10   :  { %s3611_s23 = smov 0   ;;  %s3613_s24 = smov 0  }
  0x11 LB: > { %4484 = sst [smem:[#allocation13_spill]] %s3496_s17  ;;  %s2705_s25 = sadd.s32 4294967295, %s3524_s24   ;;  %s3524_s24 = sphi %s3613_s24, %s28_s24   ;;  %s3520_s23 = sphi %s3611_s23, %s4521_s23   ;;  %s3516_s22 = sphi %s3609_s22, %s4520_s22   ;;  %s3512_s21 = sphi %s3607_s21, %s4519_s21   ;;  %s3508_s20 = sphi %s3605_s20, %s4518_s20   ;;  %s3504_s19 = sphi %s3603_s19, %s4517_s19   ;;  %s3500_s18 = sphi %s3601_s18, %s4516_s18   ;;  %s3496_s17 = sphi %s3599_s17, %s4515_s17  }
  0x12   : > { %s2706_s26 = sadd.s32 4294967294, %s3524_s24   ;;  %p62_p0 = scmp.ne.s32.totalorder %s3500_s18, %s3496_s17 }
  0x13   : > { %p3643_p1 = scmp.eq.s32.totalorder %s2705_s25, 0  ;;  %p3647_p2 = scmp.eq.s32.totalorder %s2705_s25, 5 }
  0x14   : > { %p311_p3 = scmp.eq.s32.totalorder %s2706_s26, 5  ;;  %p2707_p5 = scmp.ge.s32.totalorder %s3524_s24, 1 }
  0x15   : > { %s4485_s27 = scalar_select %p3643_p1, 1, 0 }
  0x16   : > { %s4486_s28 = scalar_select %p3647_p2, 1, 0 }
  0x17   : > { %p3653_p4 = por %p3643_p1, %p62_p0  ;;  %p3658_p6 = por %p311_p3, %p62_p0 }
  0x18   : > { %p318_p7 = scmp.lt.s32.totalorder %s3524_s24, 7  ;;  %s3526_s13 = smov [#allocation6]  }
  0x19   : > { %s4487_s29 = scalar_select %p3653_p4, 1, 0 }
  0x1a   : > { %s4488_s30 = scalar_select %p3658_p6, 1, 0 }
  0x1b   : > { %p3663_p8 = pnand %p2707_p5, %p318_p7  ;;  %s342_s14 = sshll.u32 %s3526_s13, 4  ;;  %s343_s14 = int_to_ptr.vmem [resolvable:$true] %s342_s14 }
  0x1c   : > { %4489 = sst [smem:[#allocation14_spill]] %s4488_s30  ;;  %s3527_s16 = smov [#allocation8]  }
  0x1d   : > { %s4490_s12 = scalar_select %p3663_p8, 1, 0 }
  0x1e   : > { %p2996_p9 = pneg %p3663_p8  ;;  %s358_s25 = sshll.u32 %s3527_s16, 4  ;;  %s3675_s25 = int_to_ptr.vmem [resolvable:$true] %s358_s25 }
  0x1f   : > { %s4492_s6 = sld [smem:[#allocation19_spill]] }
  0x20   : > { %p3671_p10 = pnand %p2996_p9, %p3643_p1 }
  0x22   : > { %p3338_p12 = pneg %p3671_p10 }
  0x25   : > { %s3336_s17 = scalar_lea.hbm %s4492_s6, 8192 }
  0x26   : > { %p3337_p11 = scmp.ne.s32.totalorder %s4492_s6, %s3336_s17  ;;  %p3343_p3 = scmp.lt.u32.totalorder %s3336_s17, %s4492_s6 }
  0x28   : > { %p3339_p13 = pnand %p3338_p12, %p3337_p11 }
  0x2a   : > { %p3340_p0 = pneg %p3339_p13 }
  0x2c   : > { %p3345_p5 = pnand %p3343_p3, %p3340_p0 }
  0x2e   : > { %3348 = shalt.err (!%p3345_p5)
}
  0x2f   : > { %s3349_s16 = scalar_lea.vmem %s343_s14, 8192  ;;  %p3357_p1 = scmp.lt.s32.totalorder %s343_s14, %s343_s14 }
  0x30   : > { %p3350_p7 = scmp.ne.s32.totalorder %s343_s14, %s3349_s16  ;;  %p3358_p4 = scmp.lt.s32.totalorder %s3349_s16, %s3349_s16 }
  0x32   : > { %p3352_p9 = pnand %p3350_p7, %p3338_p12  ;;  %p3359_p8 = por %p3358_p4, %p3357_p1 }
  0x34   : > { %p3353_p6 = pneg %p3352_p9 }
  0x36   : > { %p3360_p2 = pnand %p3359_p8, %p3353_p6 }
  0x38   : > { %3363 = shalt.err (!%p3360_p2)
}
  0x39   : > { %s3528_s11 = smov 256   ;;  %s3529_s30 = smov 16  }
  0x3a   : > { %2999 = dma.hbm_to_vmem [thread:$0]  (!%p3671_p10), %s4492_s6, 8192, %s343_s14, [#allocation7], %s3528_s11, %s3528_s11, %s3529_s30  }
  0x3b   : > { %s4493_s8 = sld [smem:[#allocation21_spill]] }
  0x41   : > { %s3364_s13 = scalar_lea.hbm %s4493_s8, 8192 }
  0x42   : > { %p3365_p11 = scmp.ne.s32.totalorder %s4493_s8, %s3364_s13  ;;  %p3371_p4 = scmp.lt.u32.totalorder %s3364_s13, %s4493_s8 }
  0x44   : > { %p3367_p1 = pnand %p3365_p11, %p3338_p12 }
  0x46   : > { %p3368_p2 = pneg %p3367_p1 }
  0x48   : > { %p3373_p6 = pnand %p3371_p4, %p3368_p2 }
  0x4a   : > { %3376 = shalt.err (!%p3373_p6)
}
  0x4b   : > { %s3377_s14 = scalar_lea.vmem %s3675_s25, 8192  ;;  %p3385_p3 = scmp.lt.s32.totalorder %s3675_s25, %s3675_s25 }
  0x4c   : > { %p3378_p8 = scmp.ne.s32.totalorder %s3675_s25, %s3377_s14  ;;  %p3386_p5 = scmp.lt.s32.totalorder %s3377_s14, %s3377_s14 }
  0x4e   : > { %p3380_p13 = pnand %p3378_p8, %p3338_p12  ;;  %p3387_p7 = por %p3386_p5, %p3385_p3 }
  0x50   : > { %p3381_p0 = pneg %p3380_p13 }
  0x52   : > { %p3388_p9 = pnand %p3387_p7, %p3381_p0 }
  0x54   : > { %3391 = shalt.err (!%p3388_p9)
}
  0x55   : > { %s3530_s4 = smov 64   ;;  %s3531_s5 = smov 4  }
  0x56   : > { %3002 = dma.hbm_to_vmem [thread:$0]  (!%p3671_p10), %s4493_s8, 8192, %s3675_s25, [#allocation7], %s3530_s4, %s3530_s4, %s3531_s5  }
  0x57   : > { %s37_s30 = sadd.s32 1, %s3516_s22  ;;  %s40_s9 = sadd.s32 1, %s3520_s23 }
  0x58   : > { %p38_p12 = scmp.ge.s32.totalorder %s37_s30, 3  ;;  %s49_s10 = sadd.s32 1, %s3504_s19 }
  0x59   : > { %p56_p11 = scmp.ne.s32.totalorder %s3504_s19, %s3500_s18  ;;  %p57_p1 = scmp.eq.s32.totalorder %s3524_s24, 0 }
  0x5a   : > { %s4523_s30 = smov (%p38_p12, %s37_s30), 0  ;;  %s4525_s9 = smov (!%p38_p12, %s40_s9), %s3520_s23 }
  0x5b   : > { %4494 = sst [smem:[#allocation15_spill]] %s4523_s30  ;;  %s45_s17 = ssub.s32 %s3516_s22, %s4523_s30 }
  0x5c   : > { %p3735_p2 = por %p57_p1, %p56_p11  ;;  %p42_p10 = scmp.ge.s32.totalorder %s4525_s9, 2 }
  0x5d   : > { %p4496_p4 = scmp.ne.s32.totalorder %s4486_s28, 0  ;;  %p3013_p8 = scmp.lt.s32.totalorder %s3524_s24, 6 }
  0x5e   : > { %s378_s26 = sand.u32 1, %s3504_s19   ;;  %s4527_s9 = smov (%p42_p10, %s4525_s9), 0 }
  0x5f   : > { %p3741_p6 = por %p4496_p4, %p56_p11  ;;  %4498 = sst [smem:[#allocation16_spill]] %s4527_s9 }
  0x60   : > { %s2711_s13 = sshll.u32 %s378_s26, 5  ;;  %s44_s16 = ssub.s32 %s3520_s23, %s4527_s9 }
  0x61   : > { %s46_s14 = sor.u32 %s45_s17, %s44_s16  ;;  %s2712_s4 = sshll.u32 %s3516_s22, 2 }
  0x62   : > { %p47_p13 = scmp.eq.s32.totalorder %s46_s14, 0  ;;  %s2981_s5 = smul.u32 12, %s3520_s23 }
  0x63   : > { %s382_s7 = scalar_lea.vmem [#allocation3], %s2711_s13  ;;  %p3755_p0 = pnand %p3013_p8, %p3735_p2 }
  0x64   : > { %s391_s11 = sshll.u32 %s382_s7, 4  ;;  %s388_s8 = sadd.s32 %s2981_s5, %s2712_s4  ;;  %s3762_s11 = int_to_ptr.vmem [resolvable:$true] %s391_s11 }
  0x65   : > { %s3760_s6 = scalar_select %p47_p13, %s3504_s19, %s49_s10  }
  0x66   : > { %s2713_s30 = sshll.u32 %s388_s8, 7  ;;  %s3769_s15 = scalar_lea.sflag [#allocation4], %s378_s26 }
  0x67   : > { %s3767_s16 = scalar_lea.hbm %s4449_s0, %s2713_s30  ;;  %p3394_p5 = pneg %p3755_p0 }
  0x68   : > { %s3392_s13 = scalar_lea.hbm %s3767_s16, 512  ;;  %s3397_s9 = scalar_lea.hbm %s4449_s0, 3072 }
  0x69   : > { %p3393_p3 = scmp.ne.s32.totalorder %s3767_s16, %s3392_s13  ;;  %p3398_p12 = scmp.lt.u32.totalorder %s3767_s16, %s4449_s0 }
  0x6a   : > { %p3399_p11 = scmp.lt.u32.totalorder %s3397_s9, %s3392_s13  ;;  %p3401_p2 = scmp.lt.u32.totalorder %s3392_s13, %s3767_s16 }
  0x6b   : > { %p3395_p7 = pnand %p3394_p5, %p3393_p3 }
  0x6c   : > { %p3400_p1 = por %p3399_p11, %p3398_p12 }
  0x6d   : > { %p3396_p9 = pneg %p3395_p7 }
  0x6e   : > { %p3402_p10 = por %p3401_p2, %p3400_p1 }
  0x70   : > { %p3403_p4 = pnand %p3402_p10, %p3396_p9 }
  0x72   : > { %3406 = shalt.err (!%p3403_p4)
}
  0x73   : > { %s3407_s26 = scalar_lea.vmem %s3762_s11, 512  ;;  %s3532_s4 = smov [#allocation3]  }
  0x74   : > { %p3408_p8 = scmp.ne.s32.totalorder %s3762_s11, %s3407_s26  ;;  %s3412_s5 = sshll.u32 %s3532_s4, 4  ;;  %s3413_s5 = int_to_ptr.vmem [resolvable:$false] %s3412_s5 }
  0x75   : > { %s3414_s7 = scalar_lea.vmem %s3413_s5, 1024  ;;  %p3415_p7 = scmp.lt.s32.totalorder %s3762_s11, %s3413_s5 }
  0x76   : > { %p3410_p13 = pnand %p3408_p8, %p3394_p5  ;;  %p3416_p12 = scmp.lt.s32.totalorder %s3414_s7, %s3407_s26 }
  0x78   : > { %p3411_p3 = pneg %p3410_p13  ;;  %p3417_p11 = por %p3416_p12, %p3415_p7 }
  0x7a   : > { %p3418_p1 = pnand %p3417_p11, %p3411_p3 }
  0x7c   : > { %3421 = shalt.err (!%p3418_p1)
}
  0x7d   : > { %s3533_s17 = smov 128   ;;  %s3534_s13 = smov 8  }
  0x7e   : > { %3006 = dma.hbm_to_vmem [thread:$0]  (!%p3755_p0), %s3767_s16, 512, %s3762_s11, %s3769_s15, %s3533_s17, %s3533_s17, %s3534_s13  }
  0x7f   : > { %p4500_p5 = scmp.ne.s32.totalorder %s4490_s12, 0 }
  0x80   : > { %s3800_s8 = sand.u32 (!%p4500_p5), 1, %s3500_s18   ;;  %p4501_p9 = scmp.ne.s32.totalorder (!%p4500_p5), %s4487_s29, 0 }
  0x81   : > { %414 = sbr.rel (%p4500_p5) target bundleno = 1279 (0x4ff), region = 64  ;;  %s2715_s10 = sshll.u32 (!%p4500_p5), %s3800_s8, 5 }
  0x82   : > { %s417_s9 = scalar_lea.sflag (!%p4500_p5), [#allocation4], %s3800_s8  ;;  %s420_s30 = scalar_lea.vmem (!%p4500_p5), [#allocation3], %s2715_s10 }
  0x88   : > { %3483 = dma.done.wait (%p4501_p9), %s417_s9, 512  }
  0x89   : > { %3485 = vsyncadd (%p4501_p9), %s417_s9, 4294966784  ;;  %p4502_p0 = scmp.ne.s32.totalorder %s4485_s27, 0 }
  0x8b   : > { %3487 = dma.done.wait (%p4502_p0), [#allocation7], 16384  }
  0x8c   : > { %3489 = vsyncadd (%p4502_p0), [#allocation7], 4294950912  ;;  %p476_p2 = scmp.lt.s32.totalorder %s3512_s21, 1  ;;  %p478_p10 = scmp.lt.s32.totalorder %s3508_s20, 2  ;;  %v503_v0 = vlaneseq  ;;  %v3820_v2 = vld [vmem:[%s420_s30] sm:$0xff]  ;;  %v3822_v3 = vld [vmem:[%s420_s30 + $0x8] sm:$0xff] }
  0x8d   : > { %490 = vst [vmem:[#allocation2 + $0x8] sm:$0xff] %v3820_v2  ;;  %491 = vst [vmem:[#allocation2 + $0x10] sm:$0xff] %v3822_v3  ;;  %v3829_v4 = vld [vmem:[%s420_s30 + $0x10] sm:$0xff]  ;;  %v3831_v5 = vld [vmem:[%s420_s30 + $0x18] sm:$0xff]  ;;  %s4505_s27 = sld [smem:[#allocation18_spill]]  ;;  %s4506_s26 = sld [smem:[#allocation20_spill]] }
  0x8e   : > { %s477_s12 = scalar_select %p476_p2, %s3512_s21, 1  ;;  %v3818_v1 = vshrl.u32 %v503_v0, 7  ;;  %v497_v7 = vld [vmem:[%s4451_s2] sm:$0x7f]  ;;  %492 = vst [vmem:[#allocation2 + $0x18] sm:$0xff] %v3829_v4  ;;  %493 = vst [vmem:[#allocation2 + $0x20] sm:$0xff] %v3831_v5 }
  0x8f   : > { %s479_s11 = scalar_select %p478_p10, %s3508_s20, 2 }
  0x90   : > { %s2982_s28 = smul.u32 3, %s477_s12  ;;  %v3839_v8 = vsub.s32 0, %v3818_v1  ;;  %v3842_v9 = vsub.s32 1, %v3818_v1  ;;  %v3845_v10 = vsub.s32 2, %v3818_v1  ;;  %v3848_v11 = vsub.s32 3, %v3818_v1  ;;  %s4507_s30 = sld [smem:[#allocation22_spill]] }
  0x91   : > { %v617_v12 = vsub.s32 4, %v3818_v1  ;;  %v645_v13 = vsub.s32 5, %v3818_v1  ;;  %v4475_v17 = vsub.s32 6, %v3818_v1  ;;  %s4508_s4 = sld [smem:[#allocation23_spill]]  ;;  %s2983_s17 = smul.u32 12, %s3512_s21 }
  0x92   : > { %s481_s16 = sadd.s32 %s2982_s28, %s479_s11  ;;  %v506_v14 = vrot.slane %v497_v7, %v3839_v8  ;;  %v534_v15 = vrot.slane %v497_v7, %v3842_v9  ;;  %v562_v16 = vrot.slane %v497_v7, %v3845_v10  ;;  %v590_v18 = vrot.slane %v497_v7, %v3848_v11  ;;  %s4504_s28 = sld [smem:[#allocation17_spill]] }
  0x93   : > { %s2719_s29 = sshll.u32 %s481_s16, 3  ;;  %v3859_v19 = vrot.slane %v497_v7, %v617_v12  ;;  %v3875_v26 = vrot.slane %v497_v7, %v645_v13  ;;  %v674_v35 = vrot.slane %v497_v7, %v4475_v17  ;;  %s4380_s13 = scalar_lea.vmem [#allocation9], %s2715_s10 }
  0x94   : > { %s483_s14 = scalar_lea.vmem %s4450_s1, %s2719_s29  ;;  %v3883_v33 = vld [vmem:[#allocation2 + $0x9] sm:$0xff]  ;;  %v591_v37 = vmul.f32 %v590_v18, %v3820_v2  ;;  %v593_v39 = vmul.f32 %v590_v18, %v3829_v4  ;;  %v592_v43 = vmul.f32 %v590_v18, %v3822_v3  ;;  %v594_v58 = vmul.f32 %v590_v18, %v3831_v5  ;;  %s2865_s9 = sshll.u32 %s3508_s20, 2 }
  0x95   : > { %v494_v6 = vld [vmem:[%s483_s14] sm:$0x3f]  ;;  %v3861_v20 = vld [vmem:[#allocation2 + $0x15] sm:$0xff]  ;;  %v3885_v34 = vld [vmem:[#allocation2 + $0xa] sm:$0xff]  ;;  %v619_v52 = vmul.f32 %v3859_v19, %v3883_v33  ;;  %s2575_s21 = sadd.s32 %s2983_s17, %s2865_s9  ;;  %s2578_s10 = sshll.u32 %s4380_s13, 4  ;;  %s4388_s10 = int_to_ptr.vmem [resolvable:$true] %s2578_s10 }
  0x96   : > { %495 = vst [vmem:[#allocation2 + $0x5] sm:$0x7] %v494_v6  ;;  %496 = vst [vmem:[#allocation2 + $0x25] sm:$0x38] %v494_v6  ;;  %v3863_v21 = vld [vmem:[#allocation2 + $0x16] sm:$0xff]  ;;  %v509_v27 = vmul.f32 %v506_v14, %v3861_v20  ;;  %v3893_v40 = vld [vmem:[#allocation2 + $0xd] sm:$0xff]  ;;  %v647_v7 = vmul.f32 %v3875_v26, %v3885_v34 }
  0x97   : > { %v3865_v22 = vld [vmem:[#allocation2 + $0x17] sm:$0xff]  ;;  %v537_v28 = vmul.f32 %v534_v15, %v3863_v21  ;;  %v3895_v41 = vld [vmem:[#allocation2 + $0xe] sm:$0xff]  ;;  %v508_v48 = vmul.f32 %v506_v14, %v3893_v40  ;;  %v3919_v57 = vld [vmem:[#allocation2 + $0x1f] sm:$0xff]  ;;  %s2866_s20 = sshll.u32 %s2575_s21, 7  ;;  %s4509_s16 = sld [smem:[#allocation24_spill]] }
  0x98   : > { %v565_v29 = vmul.f32 %v562_v16, %v3865_v22  ;;  %v3889_v36 = vld [vmem:[#allocation2 + $0x19] sm:$0xff]  ;;  %v3897_v42 = vld [vmem:[#allocation2 + $0xf] sm:$0xff]  ;;  %v536_v49 = vmul.f32 %v534_v15, %v3895_v41  ;;  %v566_v18 = vmul.f32 %v562_v16, %v3919_v57  ;;  %s2563_s15 = scalar_lea.sflag [#allocation5], %s3800_s8  ;;  %s3422_s14 = scalar_lea.vmem %s4388_s10, 512 }
  0x99   : > { %v541_v38 = vadd.f32 %v537_v28, %v509_v27  ;;  %v3900_v45 = vld [vmem:[#allocation2 + $0xb] sm:$0xff]  ;;  %v3902_v46 = vld [vmem:[#allocation2 + $0x1a] sm:$0xff]  ;;  %v564_v50 = vmul.f32 %v562_v16, %v3897_v42  ;;  %v621_v54 = vmul.f32 %v3859_v19, %v3889_v36  ;;  %p3423_p4 = scmp.ne.s32.totalorder %s4388_s10, %s3422_s14  ;;  %s3536_s5 = smov [#allocation9]  }
  0x9a   : > { %v3904_v47 = vld [vmem:[#allocation2 + $0x1b] sm:$0xff]  ;;  %v3909_v51 = vld [vmem:[#allocation2 + $0x11] sm:$0xff]  ;;  %v540_v60 = vadd.f32 %v536_v49, %v508_v48  ;;  %v649_v28 = vmul.f32 %v3875_v26, %v3902_v46  ;;  %s3426_s7 = sshll.u32 %s3536_s5, 4  ;;  %s3427_s7 = int_to_ptr.vmem [resolvable:$false] %s3426_s7 }
  0x9b   : > { %v569_v53 = vadd.f32 %v565_v29, %v541_v38  ;;  %v3915_v55 = vld [vmem:[#allocation2 + $0x1d] sm:$0xff]  ;;  %v3922_v61 = vld [vmem:[#allocation2 + $0x12] sm:$0xff]  ;;  %p3424_p8 = pnand %p3423_p4, %p3741_p6  ;;  %s3428_s17 = scalar_lea.vmem %s3427_s7, 1024 }
  0x9c   : > { %v3917_v56 = vld [vmem:[#allocation2 + $0x1e] sm:$0xff]  ;;  %v3924_v62 = vld [vmem:[#allocation2 + $0x13] sm:$0xff]  ;;  %v510_v63 = vmul.f32 %v506_v14, %v3915_v55  ;;  %p3429_p3 = scmp.lt.s32.totalorder %s4388_s10, %s3427_s7  ;;  %p3430_p7 = scmp.lt.s32.totalorder %s3428_s17, %s3422_s14 }
  0x9d   : > { %v3867_v23 = vld [vmem:[#allocation2 + $0x5] sm:$0xff]  ;;  %v538_v0 = vmul.f32 %v534_v15, %v3917_v56  ;;  %v597_v27 = vadd.f32 %v593_v39, %v569_v53  ;;  %v648_v39 = vmul.f32 %v3875_v26, %v3922_v61  ;;  %s4394_s29 = scalar_lea.hbm %s4509_s16, %s2866_s20  ;;  %p3425_p13 = pneg %p3424_p8 }
  0x9e   : > { %v3869_v24 = vld [vmem:[#allocation2 + $0x6] sm:$0xff]  ;;  %v507_v30 = vmul.f32 %v506_v14, %v3867_v23  ;;  %v620_v14 = vmul.f32 %v3859_v19, %v3909_v51  ;;  %p3431_p12 = por %p3430_p7, %p3429_p3 }
  0x9f   : > { %v3871_v25 = vld [vmem:[#allocation2 + $0x7] sm:$0xff]  ;;  %v535_v31 = vmul.f32 %v534_v15, %v3869_v24  ;;  %v675_v15 = vmul.f32 %v674_v35, %v3900_v45  ;;  %v625_v38 = vadd.f32 %v621_v54, %v597_v27  ;;  %v676_v54 = vmul.f32 %v674_v35, %v3924_v62 }
  0xa0   : > { %v563_v32 = vmul.f32 %v562_v16, %v3871_v25  ;;  %v3928_v6 = vld [vmem:[#allocation2 + $0x21] sm:$0xff]  ;;  %p3432_p11 = pnand %p3431_p12, %p3425_p13 }
  0xa1   : > { %v539_v44 = vadd.f32 %v535_v31, %v507_v30  ;;  %v3935_v29 = vld [vmem:[#allocation2 + $0x22] sm:$0xff]  ;;  %v568_v31 = vadd.f32 %v564_v50, %v540_v60  ;;  %v2720_v50 = vld [vmem:[%s4452_s3] ss:$0 sm:$0xff] }
  0xa2   : > { %v3943_v48 = vld [vmem:[#allocation2 + $0x23] sm:$0xff]  ;;  %v650_v27 = vmul.f32 %v3875_v26, %v3935_v29 }
  0xa3   : > { %v567_v59 = vadd.f32 %v563_v32, %v539_v44  ;;  %v542_v32 = vadd.f32 %v538_v0, %v510_v63  ;;  %v677_v44 = vmul.f32 %v674_v35, %v3904_v47  ;;  %v596_v16 = vadd.f32 %v592_v43, %v568_v31 }
  0xa5   : > { %v595_v30 = vadd.f32 %v591_v37, %v567_v59  ;;  %v570_v53 = vadd.f32 %v566_v18, %v542_v32  ;;  %v622_v37 = vmul.f32 %v3859_v19, %v3928_v6  ;;  %v653_v59 = vadd.f32 %v649_v28, %v625_v38 }
  0xa6   : > { %v624_v63 = vadd.f32 %v620_v14, %v596_v16 }
  0xa7   : > { %v623_v49 = vadd.f32 %v619_v52, %v595_v30  ;;  %v598_v0 = vadd.f32 %v594_v58, %v570_v53  ;;  %v681_v17 = vadd.f32 %v677_v44, %v653_v59  ;;  %v678_v30 = vmul.f32 %v674_v35, %v3943_v48 }
  0xa8   : > { %v652_v43 = vadd.f32 %v648_v39, %v624_v63 }
  0xa9   : > { %v651_v60 = vadd.f32 %v647_v7, %v623_v49  ;;  %v626_v18 = vadd.f32 %v622_v37, %v598_v0  ;;  %v3954_v19 = vadd.f32 %v2720_v50, %v681_v17  ;;  %v498_v17 = vld [vmem:[%s4451_s2 + $0x8] sm:$0x7f] }
  0xaa   : > { %v680_v32 = vadd.f32 %v676_v54, %v652_v43  ;;  %v518_v35 = vrot.slane %v498_v17, %v3839_v8  ;;  %v546_v14 = vrot.slane %v498_v17, %v3842_v9  ;;  %v574_v44 = vrot.slane %v498_v17, %v3845_v10 }
  0xab   : > { %v679_v52 = vadd.f32 %v675_v15, %v651_v60  ;;  %v654_v28 = vadd.f32 %v650_v27, %v626_v18  ;;  %710 = vadd.xlane.f32.xlu1 %v3954_v19  ;;  %v602_v16 = vrot.slane %v498_v17, %v3848_v11 }
  0xac   : > { %v3960_v58 = vadd.f32 %v2720_v50, %v680_v32  ;;  %v519_v15 = vmul.f32 %v518_v35, %v3867_v23  ;;  %v547_v38 = vmul.f32 %v546_v14, %v3869_v24  ;;  %v575_v49 = vmul.f32 %v574_v44, %v3871_v25 }
  0xad   : > { %v3956_v31 = vadd.f32 %v2720_v50, %v679_v52  ;;  %v682_v7 = vadd.f32 %v678_v30, %v654_v28  ;;  %v603_v37 = vmul.f32 %v602_v16, %v3820_v2  ;;  %v521_v59 = vmul.f32 %v518_v35, %v3861_v20 }
  0xae   : > { %v551_v39 = vadd.f32 %v547_v38, %v519_v15  ;;  %v549_v54 = vmul.f32 %v546_v14, %v3863_v21  ;;  %v520_v23 = vmul.f32 %v518_v35, %v3893_v40  ;;  %v548_v24 = vmul.f32 %v546_v14, %v3895_v41 }
  0xaf   : > { %706 = vadd.xlane.f32.xlu0 %v3956_v31  ;;  %v3962_v26 = vadd.f32 %v2720_v50, %v682_v7  ;;  %v630_v50 = vrot.slane %v498_v17, %v617_v12  ;;  %v658_v25 = vrot.slane %v498_v17, %v645_v13  ;;  %v577_v0 = vmul.f32 %v574_v44, %v3865_v22 }
  0xb0   : > { %v579_v53 = vadd.f32 %v575_v49, %v551_v39  ;;  %v553_v2 = vadd.f32 %v549_v54, %v521_v59  ;;  %v552_v27 = vadd.f32 %v548_v24, %v520_v23  ;;  %v576_v12 = vmul.f32 %v574_v44, %v3897_v42  ;;  %v3097_v54 = vld [vmem:[#allocation6 + $0x8] ss:$16 sps:$4 sm:$0xff]   ;;  %v3100_v23 = vld [vmem:[#allocation6 + $0x2c] ss:$16 sps:$4 sm:$0xff]  }
  0xb1   : > { %712 = vadd.xlane.f32.xlu1 %v3962_v26  ;;  %v631_v63 = vmul.f32 %v630_v50, %v3883_v33  ;;  %v659_v20 = vmul.f32 %v658_v25, %v3885_v34  ;;  %v4503_v21 = vsub.s32 6, %v3818_v1  ;;  %v605_v41 = vmul.f32 %v602_v16, %v3829_v4 }
  0xb2   : > { %v607_v60 = vadd.f32 %v603_v37, %v579_v53  ;;  %v581_v43 = vadd.f32 %v577_v0, %v553_v2  ;;  %v580_v18 = vadd.f32 %v576_v12, %v552_v27  ;;  %v604_v33 = vmul.f32 %v602_v16, %v3822_v3 }
  0xb3   : > { %708 = vadd.xlane.f32.xlu0 %v3960_v58  ;;  %v686_v40 = vrot.slane %v498_v17, %v4503_v21  ;;  %v522_v13 = vmul.f32 %v518_v35, %v3915_v55  ;;  %v633_v32 = vmul.f32 %v630_v50, %v3889_v36  ;;  %v632_v42 = vmul.f32 %v630_v50, %v3909_v51 }
  0xb4   : > { %v635_v52 = vadd.f32 %v631_v63, %v607_v60  ;;  %v609_v28 = vadd.f32 %v605_v41, %v581_v43  ;;  %v608_v34 = vadd.f32 %v604_v33, %v580_v18  ;;  %v550_v1 = vmul.f32 %v546_v14, %v3917_v56  ;;  %v3102_v43 = vld [vmem:[#allocation6 + $0x20] ss:$16 sps:$4 sm:$0xff]   ;;  %v3103_v18 = vld [vmem:[#allocation6 + $0x28] ss:$16 sps:$4 sm:$0xff]   ;;  %v3104_v33 = vld [vmem:[#allocation6 + $0x44] ss:$16 sps:$4 sm:$0xff]  }
  0xb5   : > { %v687_v22 = vmul.f32 %v686_v40, %v3900_v45  ;;  %v578_v7 = vmul.f32 %v574_v44, %v3919_v57  ;;  %v661_v17 = vmul.f32 %v658_v25, %v3902_v46  ;;  %v660_v3 = vmul.f32 %v658_v25, %v3922_v61 }
  0xb6   : > { %v663_v30 = vadd.f32 %v659_v20, %v635_v52  ;;  %v637_v15 = vadd.f32 %v633_v32, %v609_v28  ;;  %v636_v55 = vadd.f32 %v632_v42, %v608_v34  ;;  %v554_v35 = vadd.f32 %v550_v1, %v522_v13  ;;  %v3106_v13 = vld [vmem:[#allocation6 + $0x4c] ss:$16 sps:$4 sm:$0xff]   ;;  %v3110_v32 = vld [vmem:[#allocation6 + $0x64] ss:$16 sps:$4 sm:$0xff]   ;;  %v3114_v28 = vld [vmem:[#allocation6 + $0x60] ss:$16 sps:$4 sm:$0xff]  }
  0xb7   : > { %v606_v45 = vmul.f32 %v602_v16, %v3831_v5  ;;  %v689_v36 = vmul.f32 %v686_v40, %v3904_v47  ;;  %v688_v51 = vmul.f32 %v686_v40, %v3924_v62  ;;  %v634_v38 = vmul.f32 %v630_v50, %v3928_v6  ;;  %v3092_v5 = vld [vmem:[#allocation6 + $0x4] ss:$16 sps:$4 sm:$0xff]   ;;  %v3094_v16 = vld [vmem:[#allocation6 + $0xc] ss:$16 sps:$4 sm:$0xff]   ;;  %v3096_v47 = vld [vmem:[#allocation6] ss:$16 sps:$4 sm:$0xff]  }
  0xb8   : > { %v691_v4 = vadd.f32 %v687_v22, %v663_v30  ;;  %v665_v39 = vadd.f32 %v661_v17, %v637_v15  ;;  %v664_v56 = vadd.f32 %v660_v3, %v636_v55  ;;  %v582_v14 = vadd.f32 %v578_v7, %v554_v35  ;;  %v3098_v62 = vld [vmem:[#allocation6 + $0x24] ss:$16 sps:$4 sm:$0xff]   ;;  %989 = vmatprep.subr.bf16.mxu0 %v3092_v5  ;;  %v3108_v30 = vld [vmem:[#allocation6 + $0x40] ss:$16 sps:$4 sm:$0xff]   ;;  %v3109_v22 = vld [vmem:[#allocation6 + $0x48] ss:$16 sps:$4 sm:$0xff]  }
  0xb9   : > { %v662_v57 = vmul.f32 %v658_v25, %v3935_v29  ;;  %v690_v61 = vmul.f32 %v686_v40, %v3943_v48  ;;  %1042 = vmatprep.subr.bf16.mxu1 %v3094_v16  ;;  %990 = vmatpush1.bf16.msra.mxu0 %v3096_v47  ;;  %v3112_v42 = vld [vmem:[#allocation6 + $0x6c] ss:$16 sps:$4 sm:$0xff]   ;;  %v3115_v34 = vld [vmem:[#allocation6 + $0x68] ss:$16 sps:$4 sm:$0xff]   ;;  %v3116_v1 = vld [vmem:[#allocation6 + $0x84] ss:$16 sps:$4 sm:$0xff]  }
  0xba   : > { %v693_v44 = vadd.f32 %v689_v36, %v665_v39  ;;  %v692_v46 = vadd.f32 %v688_v51, %v664_v56  ;;  %v610_v49 = vadd.f32 %v606_v45, %v582_v14  ;;  %1043 = vmatpush1.bf16.msra.mxu1 %v3097_v54  ;;  %991 = vmatprep.subr.bf16.mxu0 %v3098_v62  ;;  %v3118_v7 = vld [vmem:[#allocation6 + $0x8c] ss:$16 sps:$4 sm:$0xff]   ;;  %v3121_v17 = vld [vmem:[#allocation6 + $0x88] ss:$16 sps:$4 sm:$0xff]   ;;  %v3122_v3 = vld [vmem:[#allocation6 + $0xa4] ss:$16 sps:$4 sm:$0xff]  }
  0xbb   : > { %1044 = vmatprep.subr.bf16.mxu1 %v3100_v23  ;;  %v3124_v15 = vld [vmem:[#allocation6 + $0xac] ss:$16 sps:$4 sm:$0xff]   ;;  %v3126_v55 = vld [vmem:[#allocation6 + $0xa0] ss:$16 sps:$4 sm:$0xff]   ;;  %v3127_v35 = vld [vmem:[#allocation6 + $0xa8] ss:$16 sps:$4 sm:$0xff]  }
  0xbc   : > { %v638_v53 = vadd.f32 %v634_v38, %v610_v49  ;;  %v3128_v45 = vld [vmem:[#allocation6 + $0xc4] ss:$16 sps:$4 sm:$0xff]   ;;  %v3130_v36 = vld [vmem:[#allocation6 + $0xcc] ss:$16 sps:$4 sm:$0xff]   ;;  %v3132_v51 = vld [vmem:[#allocation6 + $0xc0] ss:$16 sps:$4 sm:$0xff]  }
  0xbd   : > { %992 = vmatpush1.bf16.msra.mxu0 %v3102_v43  ;;  %v3133_v38 = vld [vmem:[#allocation6 + $0xc8] ss:$16 sps:$4 sm:$0xff]   ;;  %v3134_v39 = vld [vmem:[#allocation6 + $0xe4] ss:$16 sps:$4 sm:$0xff]   ;;  %v3136_v56 = vld [vmem:[#allocation6 + $0xec] ss:$16 sps:$4 sm:$0xff]  }
  0xbe   : > { %v666_v37 = vadd.f32 %v662_v57, %v638_v53  ;;  %1045 = vmatpush1.bf16.msra.mxu1 %v3103_v18  ;;  %993 = vmatprep.subr.bf16.mxu0 %v3104_v33  ;;  %v3138_v14 = vld [vmem:[#allocation6 + $0xe0] ss:$16 sps:$4 sm:$0xff]   ;;  %v3139_v57 = vld [vmem:[#allocation6 + $0xe8] ss:$16 sps:$4 sm:$0xff]  }
  0xbf   : > { %1046 = vmatprep.subr.bf16.mxu1 %v3106_v13  ;;  %v2721_v33 = vld [vmem:[%s4504_s28] ss:$0 sm:$0xff] }
  0xc0   : > { %v694_v59 = vadd.f32 %v690_v61, %v666_v37 }
  0xc1   : > { %994 = vmatpush1.bf16.msra.mxu0 %v3108_v30 }
  0xc2   : > { %1047 = vmatpush1.bf16.msra.mxu1 %v3109_v22  ;;  %995 = vmatprep.subr.bf16.mxu0 %v3110_v32  ;;  %v2722_v32 = vld [vmem:[%s4505_s27] ss:$0 sm:$0xff] }
  0xc3   : > { %1048 = vmatprep.subr.bf16.mxu1 %v3112_v42 }
  0xc5   : > { %996 = vmatpush1.bf16.msra.mxu0 %v3114_v28 }
  0xc6   : > { %1049 = vmatpush1.bf16.msra.mxu1 %v3115_v34  ;;  %997 = vmatprep.subr.bf16.mxu0 %v3116_v1 }
  0xc7   : > { %1050 = vmatprep.subr.bf16.mxu1 %v3118_v7 }
  0xca   : > { %1051 = vmatpush1.bf16.msra.mxu1 %v3121_v17 }
  0xcb   : > { %1052 = vmatprep.subr.bf16.mxu1 %v3124_v15 }
  0xce   : > { %1053 = vmatpush1.bf16.msra.mxu1 %v3127_v35  ;;  %v3140_v35 = vld [vmem:[#allocation8 + $0x40] sm:$0xff]  }
  0xcf   : > { %1054 = vmatprep.subr.bf16.mxu1 %v3130_v36  ;;  %v3144_v36 = vld [vmem:[#allocation8 + $0x48] sm:$0xff]  }
  0xd2   : > { %1055 = vmatpush1.bf16.msra.mxu1 %v3133_v38  ;;  %v3146_v38 = vld [vmem:[#allocation8 + $0x8] sm:$0xff]  }
  0xd3   : > { %1056 = vmatprep.subr.bf16.mxu1 %v3136_v56  ;;  %v3148_v56 = vld [vmem:[#allocation8 + $0x50] sm:$0xff]  }
  0xd6   : > { %1057 = vmatpush1.bf16.msra.mxu1 %v3139_v57  ;;  %v3150_v57 = vld [vmem:[#allocation8 + $0x10] sm:$0xff]  }
 0x138   : > { %v711_v6 = vpop.xlane.xlu1 %710 }
 0x139   : > { %v717_v50 = vmul.f32 0.0078125, %v711_v6 }
 0x13b   : > { %v4011_v60 = vsub.f32 %v3954_v19, %v717_v50  ;;  %v2790_v19 = vld [vmem:[%s4452_s3 + $0x1] ss:$0 sm:$0xff] }
 0x13c   : > { %v707_v29 = vpop.xlane.xlu0 %706  ;;  %v4028_v21 = vadd.f32 %v2790_v19, %v691_v4  ;;  %v4035_v40 = vadd.f32 %v2790_v19, %v692_v46  ;;  %v4039_v41 = vadd.f32 %v2790_v19, %v694_v59  ;;  %v3120_v4 = vld [vmem:[#allocation6 + $0x80] ss:$16 sps:$4 sm:$0xff]  }
 0x13d   : > { %v715_v24 = vmul.f32 0.0078125, %v707_v29  ;;  %998 = vmatpush1.bf16.msra.mxu0 %v3120_v4 }
 0x13e   : > { %v713_v25 = vpop.xlane.xlu1 %712  ;;  %999 = vmatprep.subr.bf16.mxu0 %v3122_v3 }
 0x13f   : > { %v4008_v48 = vsub.f32 %v3956_v31, %v715_v24  ;;  %v718_v27 = vmul.f32 0.0078125, %v713_v25  ;;  %v725_v31 = vmul.f32 %v4011_v60, %v4011_v60 }
 0x140   : > { %v709_v63 = vpop.xlane.xlu0 %708 }
 0x141   : > { %v716_v0 = vmul.f32 0.0078125, %v709_v63  ;;  %v723_v2 = vmul.f32 %v4008_v48, %v4008_v48  ;;  %v4019_v52 = vsub.f32 %v3962_v26, %v718_v27  ;;  %v4033_v26 = vadd.f32 %v2790_v19, %v693_v44  ;;  %1000 = vmatpush1.bf16.msra.mxu0 %v3126_v55 }
 0x142   : > { %1001 = vmatprep.subr.bf16.mxu0 %v3128_v45  ;;  %v3535_v44 = vmov 0   ;;  %v3141_v45 = vld [vmem:[#allocation8 + $0xc0] sm:$0xff]  }
 0x143   : > { %v4016_v12 = vsub.f32 %v3960_v58, %v716_v0  ;;  %727 = vadd.xlane.f32.xlu0 %v723_v2  ;;  %v726_v58 = vmul.f32 %v4019_v52, %v4019_v52  ;;  %1021 = vmatprep.mubr.bf16.mxu0 %v3535_v44 }
 0x144   : > { %1074 = vmatprep.mubr.bf16.mxu1 %v3535_v44  ;;  %2897 = vmatprep.subr.bf16.mxu1 %v3141_v45 }
 0x145   : > { %v724_v20 = vmul.f32 %v4016_v12, %v4016_v12  ;;  %1002 = vmatpush1.bf16.msra.mxu0 %v3132_v51  ;;  %v3145_v51 = vld [vmem:[#allocation8 + $0xc8] sm:$0xff]  }
 0x146   : > { %1003 = vmatprep.subr.bf16.mxu0 %v3134_v39  ;;  %v3147_v39 = vld [vmem:[#allocation8 + $0x88] sm:$0xff]  }
 0x147   : > { %731 = vadd.xlane.f32.xlu0 %v725_v31  ;;  %729 = vadd.xlane.f32.xlu1 %v724_v20 }
 0x149   : > { %1004 = vmatpush1.bf16.msra.mxu0 %v3138_v14  ;;  %v3149_v14 = vld [vmem:[#allocation8 + $0xd0] sm:$0xff]  }
 0x14a   : > { %2869 = vmatprep.subr.bf16.mxu0 %v3140_v35 }
 0x14b   : > { %1635 = vadd.xlane.f32.xlu0 %v4028_v21  ;;  %733 = vadd.xlane.f32.xlu1 %v726_v58 }
 0x14f   : > { %1639 = vadd.xlane.f32.xlu0 %v4033_v26  ;;  %1637 = vadd.xlane.f32.xlu1 %v4035_v40 }
 0x153   : > { %1641 = vadd.xlane.f32.xlu1 %v4039_v41 }
 0x1d0   : > { %v728_v46 = vpop.xlane.xlu0 %727 }
 0x1d1   : > { %v735_v49 = vmul.f32 0.0078125, %v728_v46  ;;  %v3151_v46 = vld [vmem:[#allocation8 + $0x90] sm:$0xff]  }
 0x1d3   : > { %v739_v61 = vadd.f32 1e-06, %v735_v49  ;;  %v3152_v49 = vld [vmem:[#allocation8 + $0x58] sm:$0xff]  }
 0x1d4   : > { %v730_v53 = vpop.xlane.xlu1 %729  ;;  %v732_v37 = vpop.xlane.xlu0 %731 }
 0x1d5   : > { %3252 = vrsqrt.f32 %v739_v61  ;;  %v736_v59 = vmul.f32 0.0078125, %v730_v53  ;;  %v737_v5 = vmul.f32 0.0078125, %v732_v37  ;;  %v3153_v61 = vld [vmem:[#allocation8 + $0xd8] sm:$0xff]  }
 0x1d6   : > { %v3154_v53 = vld [vmem:[#allocation8 + $0x18] sm:$0xff]  }
 0x1d7   : > { %v740_v16 = vadd.f32 1e-06, %v736_v59  ;;  %v741_v47 = vadd.f32 1e-06, %v737_v5  ;;  %v3155_v37 = vld [vmem:[#allocation8 + $0x98] sm:$0xff]   ;;  %v3156_v59 = vld [vmem:[#allocation8 + $0x60] sm:$0xff]  }
 0x1d8   : > { %v734_v54 = vpop.xlane.xlu1 %733  ;;  %v1636_v62 = vpop.xlane.xlu0 %1635  ;;  %v3157_v5 = vld [vmem:[#allocation8 + $0xe0] sm:$0xff]  }
 0x1d9   : > { %3254 = vrsqrt.f32 %v740_v16  ;;  %v738_v23 = vmul.f32 0.0078125, %v734_v54  ;;  %v1643_v6 = vmul.f32 0.0078125, %v1636_v62  ;;  %v3158_v16 = vld [vmem:[#allocation8 + $0x20] sm:$0xff]   ;;  %v3160_v54 = vld [vmem:[#allocation8 + $0x68] sm:$0xff]  }
 0x1da   : > { %3256 = vrsqrt.f32 %v741_v47  ;;  %v3159_v47 = vld [vmem:[#allocation8 + $0xa0] sm:$0xff]   ;;  %v3161_v62 = vld [vmem:[#allocation8 + $0xe8] sm:$0xff]  }
 0x1db   : > { %v742_v29 = vadd.f32 1e-06, %v738_v23  ;;  %v4045_v50 = vsub.f32 %v4028_v21, %v1643_v6  ;;  %v3162_v23 = vld [vmem:[#allocation8 + $0x28] sm:$0xff]  }
 0x1dc   : > { %v1638_v24 = vpop.xlane.xlu1 %1637  ;;  %v1640_v63 = vpop.xlane.xlu0 %1639  ;;  %v3163_v6 = vld [vmem:[#allocation8 + $0xa8] sm:$0xff]  }
 0x1dd   : > { %3258 = vrsqrt.f32 %v742_v29  ;;  %v1644_v25 = vmul.f32 0.0078125, %v1638_v24  ;;  %v1645_v0 = vmul.f32 0.0078125, %v1640_v63  ;;  %v1651_v2 = vmul.f32 %v4045_v50, %v4045_v50  ;;  %v3164_v29 = vld [vmem:[#allocation8 + $0x70] sm:$0xff]  }
 0x1de   : > { %v3165_v24 = vld [vmem:[#allocation8 + $0xf0] sm:$0xff]  }
 0x1df   : > { %v3253_v27 = vpop.eup %3252  ;;  %v4050_v31 = vsub.f32 %v4035_v40, %v1644_v25  ;;  %v4053_v19 = vsub.f32 %v4033_v26, %v1645_v0  ;;  %1655 = vadd.xlane.f32.xlu0 %v1651_v2  ;;  %v3166_v63 = vld [vmem:[#allocation8 + $0x30] sm:$0xff]   ;;  %v3168_v0 = vld [vmem:[#allocation8 + $0x78] sm:$0xff]  }
 0x1e0   : > { %v1642_v20 = vpop.xlane.xlu1 %1641  ;;  %v747_v21 = vmul.f32 %v3253_v27, %v4008_v48  ;;  %v3167_v25 = vld [vmem:[#allocation8 + $0xb0] sm:$0xff]   ;;  %v3169_v2 = vld [vmem:[#allocation8 + $0xf8] sm:$0xff]  }
 0x1e1   : > { %v1646_v58 = vmul.f32 0.0078125, %v1642_v20  ;;  %v1652_v43 = vmul.f32 %v4050_v31, %v4050_v31  ;;  %v1653_v18 = vmul.f32 %v4053_v19, %v4053_v19  ;;  %v3170_v27 = vld [vmem:[#allocation8 + $0x38] sm:$0xff]  }
 0x1e2   : > { %v758_v48 = vmul.f32 %v2721_v33, %v747_v21  ;;  %v3171_v20 = vld [vmem:[#allocation8 + $0xb8] sm:$0xff]   ;;  %v3174_v21 = vld [vmem:[#allocation6 + $0x104] ss:$16 sps:$4 sm:$0xff]  }
 0x1e3   : > { %v3255_v40 = vpop.eup %3254  ;;  %v4064_v13 = vsub.f32 %v4039_v41, %v1646_v58  ;;  %1657 = vadd.xlane.f32.xlu1 %v1652_v43  ;;  %1659 = vadd.xlane.f32.xlu0 %v1653_v18  ;;  %v3177_v58 = vld [vmem:[#allocation6 + $0x10c] ss:$16 sps:$4 sm:$0xff]   ;;  %v807_v43 = vld [vmem:[%s4506_s26] sm:$0xf] }
 0x1e4   : > { %v748_v26 = vmul.f32 %v3255_v40, %v4016_v12  ;;  %v3257_v30 = vpop.eup %3256  ;;  %v769_v34 = vadd.f32 %v2722_v32, %v758_v48  ;;  %v4080_v18 = vrot.slane %v807_v43, %v3839_v8  ;;  %v4086_v48 = vrot.slane %v807_v43, %v3842_v9 }
 0x1e5   : > { %v1654_v22 = vmul.f32 %v4064_v13, %v4064_v13  ;;  %v749_v41 = vmul.f32 %v3257_v30, %v4011_v60  ;;  %v3142_v60 = vld [vmem:[#allocation8] sm:$0xff]  }
 0x1e6   : > { %v759_v42 = vmul.f32 %v2721_v33, %v748_v26 }
 0x1e7   : > { %v3259_v28 = vpop.eup %3258  ;;  %1661 = vadd.xlane.f32.xlu1 %v1654_v22  ;;  %v760_v17 = vmul.f32 %v2721_v33, %v749_v41 }
 0x1e8   : > { %v770_v1 = vadd.f32 %v2722_v32, %v759_v42  ;;  %v750_v7 = vmul.f32 %v3259_v28, %v4019_v52  ;;  %v3143_v52 = vld [vmem:[#allocation8 + $0x80] sm:$0xff]   ;;  %v4091_v28 = vrot.slane %v807_v43, %v3848_v11 }
 0x1e9   : > { %v771_v15 = vadd.f32 %v2722_v32, %v760_v17 }
 0x1ea   : > { %v773_v4 = vpack.c.bf16 %v770_v1, %v769_v34  ;;  %v761_v12 = vmul.f32 %v2721_v33, %v750_v7  ;;  %v4083_v33 = vrot.slane %v807_v43, %v3845_v10 }
 0x1ec   : > { %1022 = vmatmul.mubr.bf16.vlgmr.msra.gmra.mrb[0].mxu0 %v773_v4  ;;  %1075 = vmatmul.mubr.bf16.vlgmr.msra.gmra.mrb[0].mxu1 %v773_v4  ;;  %v772_v3 = vadd.f32 %v2722_v32, %v761_v12 }
 0x1ed   : > { %1031 = vmatprep.mubr.bf16.mxu0 %v3535_v44  ;;  %1084 = vmatprep.mubr.bf16.mxu1 %v3535_v44 }
 0x1ee   : > { %v774_v55 = vpack.c.bf16 %v772_v3, %v771_v15  ;;  %2870 = vmatpush3.bf16.msra.mxu0 %v3142_v60  ;;  %2898 = vmatpush3.bf16.msra.mxu1 %v3143_v52 }
 0x1ef   : > { %2871 = vmatprep.subr.bf16.mxu0 %v3144_v36  ;;  %2899 = vmatprep.subr.bf16.mxu1 %v3145_v51 }
 0x1f2   : > { %2872 = vmatpush3.bf16.msra.mxu0 %v3146_v38  ;;  %2900 = vmatpush3.bf16.msra.mxu1 %v3147_v39 }
 0x1f3   : > { %2873 = vmatprep.subr.bf16.mxu0 %v3148_v56  ;;  %2901 = vmatprep.subr.bf16.mxu1 %v3149_v14 }
 0x1f4   : > { %1032 = vmatmul.mubr.bf16.gmra.mrb[4].mxu0 %v774_v55  ;;  %1085 = vmatmul.mubr.bf16.gmra.mrb[4].mxu1 %v774_v55 }
 0x1f6   : > { %2874 = vmatpush3.bf16.msra.mxu0 %v3150_v57  ;;  %2902 = vmatpush3.bf16.msra.mxu1 %v3151_v46 }
 0x1f7   : > { %2875 = vmatprep.subr.bf16.mxu0 %v3152_v49  ;;  %2903 = vmatprep.subr.bf16.mxu1 %v3153_v61 }
 0x1fa   : > { %2876 = vmatpush3.bf16.msra.mxu0 %v3154_v53  ;;  %2904 = vmatpush3.bf16.msra.mxu1 %v3155_v37 }
 0x1fb   : > { %2877 = vmatprep.subr.bf16.mxu0 %v3156_v59  ;;  %2905 = vmatprep.subr.bf16.mxu1 %v3157_v5 }
 0x1fe   : > { %2878 = vmatpush3.bf16.msra.mxu0 %v3158_v16  ;;  %2906 = vmatpush3.bf16.msra.mxu1 %v3159_v47 }
 0x1ff   : > { %2879 = vmatprep.subr.bf16.mxu0 %v3160_v54  ;;  %2907 = vmatprep.subr.bf16.mxu1 %v3161_v62 }
 0x202   : > { %2880 = vmatpush3.bf16.msra.mxu0 %v3162_v23  ;;  %2908 = vmatpush3.bf16.msra.mxu1 %v3163_v6 }
 0x203   : > { %2881 = vmatprep.subr.bf16.mxu0 %v3164_v29  ;;  %2909 = vmatprep.subr.bf16.mxu1 %v3165_v24 }
 0x206   : > { %2882 = vmatpush3.bf16.msra.mxu0 %v3166_v63  ;;  %2910 = vmatpush3.bf16.msra.mxu1 %v3167_v25 }
 0x207   : > { %2883 = vmatprep.subr.bf16.mxu0 %v3168_v0  ;;  %2911 = vmatprep.subr.bf16.mxu1 %v3169_v2 }
 0x20a   : > { %2884 = vmatpush3.bf16.msra.mxu0 %v3170_v27  ;;  %2912 = vmatpush3.bf16.msra.mxu1 %v3171_v20 }
 0x20b   : > { %1921 = vmatprep.subr.bf16.mxu0 %v3174_v21  ;;  %1974 = vmatprep.subr.bf16.mxu1 %v3177_v58 }
 0x2bf   : > { %v1023_v40 = vpop.f32.mrb[0].mxu0  ;;  %v1076_v26 = vpop.f32.mrb[0].mxu1 }
 0x2c0   : > { %v1024_v30 = vadd.f32 %v1023_v40, %v4080_v18  ;;  %v1077_v22 = vadd.f32 %v1076_v26, %v4083_v33  ;;  %v1025_v32 = vpop.f32.mrb[1].mxu0  ;;  %v1078_v42 = vpop.f32.mrb[1].mxu1 }
 0x2c1   : > { %v1027_v34 = vpop.f32.mrb[2].mxu0  ;;  %v1080_v1 = vpop.f32.mrb[2].mxu1  ;;  %v4094_v4 = vadd.f32 %v1025_v32, %v4086_v48  ;;  %v4104_v60 = vadd.f32 %v1078_v42, %v4091_v28 }
 0x2c2   : > { %v1111_v41 = vmul.f32 0.044715, %v1024_v30  ;;  %v1113_v7 = vmul.f32 0.044715, %v1077_v22  ;;  %v1028_v12 = vadd.f32 %v1027_v34, %v4080_v18  ;;  %v4098_v17 = vadd.f32 %v1080_v1, %v4083_v33  ;;  %v1029_v3 = vpop.f32.mrb[3].mxu0  ;;  %v1082_v15 = vpop.f32.mrb[3].mxu1 }
 0x2c3   : > { %v4101_v45 = vadd.f32 %v1029_v3, %v4086_v48  ;;  %v4107_v36 = vadd.f32 %v1082_v15, %v4091_v28  ;;  %v4109_v51 = vmul.f32 0.5, %v1024_v30  ;;  %v1112_v14 = vmul.f32 0.044715, %v4094_v4 }
 0x2c4   : > { %v1127_v55 = vmul.f32 %v1111_v41, %v1024_v30  ;;  %v1129_v35 = vmul.f32 %v1113_v7, %v1077_v22  ;;  %v1115_v52 = vmul.f32 0.044715, %v1028_v12  ;;  %v1117_v56 = vmul.f32 0.044715, %v4098_v17 }
 0x2c5   : > { %v1116_v46 = vmul.f32 0.044715, %v4101_v45  ;;  %v4114_v37 = vmul.f32 0.5, %v1077_v22  ;;  %v1114_v54 = vmul.f32 0.044715, %v4104_v60  ;;  %v1128_v20 = vmul.f32 %v1112_v14, %v4094_v4 }
 0x2c6   : > { %v1143_v38 = vmul.f32 %v1127_v55, %v1024_v30  ;;  %v1145_v39 = vmul.f32 %v1129_v35, %v1077_v22  ;;  %v1131_v57 = vmul.f32 %v1115_v52, %v1028_v12  ;;  %v1133_v5 = vmul.f32 %v1117_v56, %v4098_v17 }
 0x2c7   : > { %v1033_v49 = vpop.f32.mrb[4].mxu0  ;;  %v1086_v61 = vpop.f32.mrb[4].mxu1  ;;  %v1118_v23 = vmul.f32 0.044715, %v4107_v36  ;;  %v1132_v58 = vmul.f32 %v1116_v46, %v4101_v45  ;;  %v1144_v3 = vmul.f32 %v1128_v20, %v4094_v4 }
 0x2c8   : > { %v1159_v53 = vadd.f32 %v1143_v38, %v1024_v30  ;;  %v1161_v59 = vadd.f32 %v1145_v39, %v1077_v22  ;;  %v1035_v16 = vpop.f32.mrb[5].mxu0  ;;  %v1088_v47 = vpop.f32.mrb[5].mxu1  ;;  %v1147_v62 = vmul.f32 %v1131_v57, %v1028_v12  ;;  %v4120_v6 = vadd.f32 %v1033_v49, %v4080_v18 }
 0x2c9   : > { %v1037_v29 = vpop.f32.mrb[6].mxu0  ;;  %v1090_v24 = vpop.f32.mrb[6].mxu1  ;;  %v1149_v0 = vmul.f32 %v1133_v5, %v4098_v17  ;;  %v4126_v43 = vadd.f32 %v1086_v61, %v4083_v33  ;;  %v4131_v30 = vadd.f32 %v1035_v16, %v4086_v48  ;;  %v1130_v22 = vmul.f32 %v1114_v54, %v4104_v60 }
 0x2ca   : > { %v1175_v63 = vmul.f32 0.7978846, %v1159_v53  ;;  %v1177_v25 = vmul.f32 0.7978846, %v1161_v59  ;;  %v1039_v2 = vpop.f32.mrb[7].mxu0  ;;  %v1092_v27 = vpop.f32.mrb[7].mxu1  ;;  %v1163_v21 = vadd.f32 %v1147_v62, %v1028_v12  ;;  %v1134_v42 = vmul.f32 %v1118_v23, %v4107_v36 }
 0x2cb   : > { %v1165_v40 = vadd.f32 %v1149_v0, %v4098_v17  ;;  %v1119_v26 = vmul.f32 0.044715, %v4120_v6  ;;  %v1120_v1 = vmul.f32 0.044715, %v4131_v30  ;;  %v4137_v41 = vadd.f32 %v1088_v47, %v4091_v28 }
 0x2cc   : > { %3260 = vtanh.f32 %v1175_v63  ;;  %v1179_v32 = vmul.f32 0.7978846, %v1163_v21  ;;  %v4140_v7 = vadd.f32 %v1037_v29, %v4080_v18  ;;  %v1148_v15 = vmul.f32 %v1132_v58, %v4101_v45 }
 0x2cd   : > { %3262 = vtanh.f32 %v1177_v25  ;;  %v1181_v34 = vmul.f32 0.7978846, %v1165_v40  ;;  %v4145_v55 = vadd.f32 %v1090_v24, %v4083_v33  ;;  %v1135_v35 = vmul.f32 %v1119_v26, %v4120_v6 }
 0x2ce   : > { %3264 = vtanh.f32 %v1179_v32  ;;  %v1121_v52 = vmul.f32 0.044715, %v4126_v43  ;;  %v1122_v38 = vmul.f32 0.044715, %v4137_v41  ;;  %v1099_v39 = vmul.f32 0.5, %v1028_v12 }
 0x2cf   : > { %3266 = vtanh.f32 %v1181_v34  ;;  %v1136_v56 = vmul.f32 %v1120_v1, %v4131_v30  ;;  %v4152_v18 = vadd.f32 %v1039_v2, %v4086_v48  ;;  %v4155_v14 = vadd.f32 %v1092_v27, %v4091_v28 }
 0x2d0   : > { %v1146_v57 = vmul.f32 %v1130_v22, %v4104_v60  ;;  %v1150_v33 = vmul.f32 %v1134_v42, %v4107_v36  ;;  %v1123_v46 = vmul.f32 0.044715, %v4140_v7  ;;  %v1125_v49 = vmul.f32 0.044715, %v4145_v55 }
 0x2d1   : > { %v1138_v61 = vmul.f32 %v1122_v38, %v4137_v41  ;;  %v1124_v12 = vmul.f32 0.044715, %v4152_v18  ;;  %v1126_v53 = vmul.f32 0.044715, %v4155_v14  ;;  %v1160_v48 = vadd.f32 %v1144_v3, %v4094_v4 }
 0x2d2   : > { %v1101_v59 = vmul.f32 0.5, %v4098_v17  ;;  %v1151_v28 = vmul.f32 %v1135_v35, %v4120_v6  ;;  %v1137_v5 = vmul.f32 %v1121_v52, %v4126_v43  ;;  %v1164_v16 = vadd.f32 %v1148_v15, %v4101_v45 }
 0x2d3   : > { %v1152_v47 = vmul.f32 %v1136_v56, %v4131_v30  ;;  %v1140_v54 = vmul.f32 %v1124_v12, %v4152_v18  ;;  %v1142_v62 = vmul.f32 %v1126_v53, %v4155_v14  ;;  %v1176_v23 = vmul.f32 0.7978846, %v1160_v48 }
 0x2d4   : > { %v1139_v24 = vmul.f32 %v1123_v46, %v4140_v7  ;;  %v1180_v63 = vmul.f32 0.7978846, %v1164_v16  ;;  %v1162_v25 = vadd.f32 %v1146_v57, %v4104_v60  ;;  %v1166_v17 = vadd.f32 %v1150_v33, %v4107_v36 }
 0x2d5   : > { %v1154_v2 = vmul.f32 %v1138_v61, %v4137_v41  ;;  %v1141_v27 = vmul.f32 %v1125_v49, %v4145_v55  ;;  %v1156_v20 = vmul.f32 %v1140_v54, %v4152_v18  ;;  %3268 = vtanh.f32 %v1176_v23 }
 0x2d6   : > { %v3261_v29 = vpop.eup %3260  ;;  %3270 = vtanh.f32 %v1180_v63  ;;  %v1178_v21 = vmul.f32 0.7978846, %v1162_v25  ;;  %v1182_v58 = vmul.f32 0.7978846, %v1166_v17  ;;  %v1153_v22 = vmul.f32 %v1137_v5, %v4126_v43 }
 0x2d7   : > { %v3263_v0 = vpop.eup %3262  ;;  %v1207_v40 = vadd.f32 1.0, %v3261_v29  ;;  %v1158_v32 = vmul.f32 %v1142_v62, %v4155_v14  ;;  %v1168_v34 = vadd.f32 %v1152_v47, %v4131_v30  ;;  %v1155_v3 = vmul.f32 %v1139_v24, %v4140_v7 }
 0x2d8   : > { %v3265_v26 = vpop.eup %3264  ;;  %v1209_v42 = vadd.f32 1.0, %v3263_v0  ;;  %3272 = vtanh.f32 %v1178_v21  ;;  %v1172_v35 = vadd.f32 %v1156_v20, %v4152_v18  ;;  %v1157_v52 = vmul.f32 %v1141_v27, %v4145_v55  ;;  %v1658_v27 = vpop.xlane.xlu1 %1657 }
 0x2d9   : > { %v3267_v1 = vpop.eup %3266  ;;  %v1211_v15 = vadd.f32 1.0, %v3265_v26  ;;  %3274 = vtanh.f32 %v1182_v58  ;;  %v1184_v56 = vmul.f32 0.7978846, %v1168_v34  ;;  %v1223_v57 = vmul.f32 %v1207_v40, %v4109_v51 }
 0x2da   : > { %v1213_v38 = vadd.f32 1.0, %v3267_v1  ;;  %v1188_v46 = vmul.f32 0.7978846, %v1172_v35  ;;  %v1170_v49 = vadd.f32 %v1154_v2, %v4137_v41  ;;  %v4187_v61 = vmul.f32 %v1209_v42, %v4114_v37  ;;  %v1656_v42 = vpop.xlane.xlu0 %1655  ;;  %v3172_v1 = vld [vmem:[#allocation6 + $0x100] ss:$16 sps:$4 sm:$0xff]  }
 0x2db   : > { %v1227_v33 = vmul.f32 %v1211_v15, %v1099_v39  ;;  %3276 = vtanh.f32 %v1184_v56  ;;  %v1174_v53 = vadd.f32 %v1158_v32, %v4155_v14  ;;  %v1167_v51 = vadd.f32 %v1151_v28, %v4120_v6 }
 0x2dc   : > { %v4189_v12 = vmul.f32 %v1213_v38, %v1101_v59  ;;  %3278 = vtanh.f32 %v1188_v46  ;;  %v1186_v5 = vmul.f32 0.7978846, %v1170_v49  ;;  %v1171_v39 = vadd.f32 %v1155_v3, %v4140_v7  ;;  %v3175_v49 = vld [vmem:[#allocation6 + $0x108] ss:$16 sps:$4 sm:$0xff]  }
 0x2dd   : > { %v1239_v48 = vpack.c.bf16 %v1227_v33, %v1223_v57  ;;  %v1190_v47 = vmul.f32 0.7978846, %v1174_v53  ;;  %v1169_v37 = vadd.f32 %v1153_v22, %v4126_v43  ;;  %v1183_v59 = vmul.f32 0.7978846, %v1167_v51  ;;  %v3178_v53 = vld [vmem:[#allocation6 + $0x120] ss:$16 sps:$4 sm:$0xff]  }
 0x2de   : > { %v1241_v16 = vpack.c.bf16 %v4189_v12, %v4187_v61  ;;  %3280 = vtanh.f32 %v1186_v5  ;;  %v1187_v62 = vmul.f32 0.7978846, %v1171_v39  ;;  %v1173_v23 = vadd.f32 %v1157_v52, %v4145_v55  ;;  %v3180_v52 = vld [vmem:[#allocation6 + $0x124] ss:$16 sps:$4 sm:$0xff]   ;;  %v3183_v51 = vld [vmem:[#allocation6 + $0x12c] ss:$16 sps:$4 sm:$0xff]  }
 0x2df   : > { %v3269_v54 = vpop.eup %3268  ;;  %3282 = vtanh.f32 %v1190_v47  ;;  %v1096_v24 = vmul.f32 0.5, %v4094_v4  ;;  %v1185_v25 = vmul.f32 0.7978846, %v1169_v37  ;;  %v1100_v17 = vmul.f32 0.5, %v4101_v45 }
 0x2e0   : > { %v3271_v29 = vpop.eup %3270  ;;  %v1208_v63 = vadd.f32 1.0, %v3269_v54  ;;  %3284 = vtanh.f32 %v1183_v59  ;;  %v1189_v28 = vmul.f32 0.7978846, %v1173_v23  ;;  %v1098_v26 = vmul.f32 0.5, %v4104_v60 }
 0x2e1   : > { %v1212_v0 = vadd.f32 1.0, %v3271_v29  ;;  %3286 = vtanh.f32 %v1187_v62  ;;  %v1102_v22 = vmul.f32 0.5, %v4107_v36  ;;  %v1664_v45 = vmul.f32 0.0078125, %v1658_v27  ;;  %v3186_v62 = vld [vmem:[#allocation6 + $0x144] ss:$16 sps:$4 sm:$0xff]   ;;  %v1662_v29 = vpop.xlane.xlu1 %1661 }
 0x2e2   : > { %v3273_v2 = vpop.eup %3272  ;;  %v1224_v21 = vmul.f32 %v1208_v63, %v1096_v24  ;;  %3288 = vtanh.f32 %v1185_v25  ;;  %v1104_v56 = vmul.f32 0.5, %v4131_v30  ;;  %v1108_v57 = vmul.f32 0.5, %v4152_v18  ;;  %v3189_v27 = vld [vmem:[#allocation6 + $0x14c] ss:$16 sps:$4 sm:$0xff]  }
 0x2e3   : > { %v3275_v20 = vpop.eup %3274  ;;  %v1228_v58 = vmul.f32 %v1212_v0, %v1100_v17  ;;  %v1210_v40 = vadd.f32 1.0, %v3273_v2  ;;  %3290 = vtanh.f32 %v1189_v28  ;;  %v1663_v36 = vmul.f32 0.0078125, %v1656_v42  ;;  %v3184_v28 = vld [vmem:[#allocation6 + $0x140] ss:$16 sps:$4 sm:$0xff]  }
 0x2e4   : > { %v1214_v4 = vadd.f32 1.0, %v3275_v20  ;;  %v1668_v47 = vadd.f32 1e-06, %v1664_v45  ;;  %v1106_v30 = vmul.f32 0.5, %v4137_v41  ;;  %v1110_v18 = vmul.f32 0.5, %v4155_v14  ;;  %v1660_v14 = vpop.xlane.xlu0 %1659 }
 0x2e5   : > { %v3277_v32 = vpop.eup %3276  ;;  %v1240_v34 = vpack.c.bf16 %v1228_v58, %v1224_v21  ;;  %v1226_v15 = vmul.f32 %v1210_v40, %v1098_v26  ;;  %v1667_v25 = vadd.f32 1e-06, %v1663_v36  ;;  %v1103_v20 = vmul.f32 0.5, %v4120_v6  ;;  %v3187_v6 = vld [vmem:[#allocation6 + $0x148] ss:$16 sps:$4 sm:$0xff]  }
 0x2e6   : > { %v3279_v3 = vpop.eup %3278  ;;  %v1230_v35 = vmul.f32 %v1214_v4, %v1102_v22  ;;  %v1216_v38 = vadd.f32 1.0, %v3277_v32  ;;  %3292 = vrsqrt.f32 %v1668_v47  ;;  %v1107_v61 = vmul.f32 0.5, %v4140_v7  ;;  %v3192_v22 = vld [vmem:[#allocation6 + $0x164] ss:$16 sps:$4 sm:$0xff]  }
 0x2e7   : > { %1542 = vmatprep.mubr.bf16.mxu0 %v1240_v34  ;;  %v1220_v60 = vadd.f32 1.0, %v3279_v3  ;;  %v1666_v21 = vmul.f32 0.0078125, %v1662_v29  ;;  %v1105_v40 = vmul.f32 0.5, %v4126_v43  ;;  %v1109_v42 = vmul.f32 0.5, %v4145_v55  ;;  %v3190_v43 = vld [vmem:[#allocation6 + $0x160] ss:$16 sps:$4 sm:$0xff]  }
 0x2e8   : > { %v3281_v33 = vpop.eup %3280  ;;  %v1242_v46 = vpack.c.bf16 %v1230_v35, %v1226_v15  ;;  %1543 = vmatmul.mubr.bf16.vlgmr.msra.gmra.mrb[8].mxu0 %v1239_v48  ;;  %v1232_v39 = vmul.f32 %v1216_v38, %v1104_v56  ;;  %v3181_v48 = vld [vmem:[#allocation6 + $0x128] ss:$16 sps:$4 sm:$0xff]   ;;  %3294 = vrsqrt.f32 %v1667_v25  ;;  %v1665_v34 = vmul.f32 0.0078125, %v1660_v14  ;;  %v3195_v15 = vld [vmem:[#allocation6 + $0x16c] ss:$16 sps:$4 sm:$0xff]  }
 0x2e9   : > { %v3283_v5 = vpop.eup %3282  ;;  %1922 = vmatpush1.bf16.msra.mxu0 %v3172_v1  ;;  %v1236_v37 = vmul.f32 %v1220_v60, %v1108_v57  ;;  %v1218_v54 = vadd.f32 1.0, %v3281_v33  ;;  %v1670_v35 = vadd.f32 1e-06, %v1666_v21  ;;  %v3198_v38 = vld [vmem:[#allocation6 + $0x184] ss:$16 sps:$4 sm:$0xff]  }
 0x2ea   : > { %1591 = vmatprep.mubr.bf16.mxu1 %v1242_v46  ;;  %1923 = vmatprep.subr.bf16.mxu0 %v3180_v52  ;;  %v1222_v59 = vadd.f32 1.0, %v3283_v5  ;;  %v3285_v23 = vpop.eup %3284  ;;  %v1669_v56 = vadd.f32 1e-06, %v1665_v34  ;;  %v3193_v55 = vld [vmem:[#allocation6 + $0x168] ss:$16 sps:$4 sm:$0xff]   ;;  %v3222_v21 = vld [vmem:[#allocation8 + $0x100] sm:$0xff]  }
 0x2eb   : > { %1592 = vmatmul.mubr.bf16.vlgmr.msra.gmra.mrb[8].mxu1 %v1241_v16  ;;  %v1244_v24 = vpack.c.bf16 %v1236_v37, %v1232_v39  ;;  %v3287_v63 = vpop.eup %3286  ;;  %v1234_v17 = vmul.f32 %v1218_v54, %v1106_v30  ;;  %v1215_v2 = vadd.f32 1.0, %v3285_v23  ;;  %v3201_v57 = vld [vmem:[#allocation6 + $0x18c] ss:$16 sps:$4 sm:$0xff]   ;;  %3296 = vrsqrt.f32 %v1670_v35  ;;  %v3196_v60 = vld [vmem:[#allocation6 + $0x180] ss:$16 sps:$4 sm:$0xff]  }
 0x2ec   : > { %1975 = vmatpush1.bf16.msra.mxu1 %v3175_v49  ;;  %v1238_v0 = vmul.f32 %v1222_v59, %v1110_v18  ;;  %v3289_v41 = vpop.eup %3288  ;;  %v1219_v12 = vadd.f32 1.0, %v3287_v63  ;;  %v3204_v36 = vld [vmem:[#allocation6 + $0x1a4] ss:$16 sps:$4 sm:$0xff]   ;;  %3298 = vrsqrt.f32 %v1669_v56  ;;  %v3199_v46 = vld [vmem:[#allocation6 + $0x188] ss:$16 sps:$4 sm:$0xff]  }
 0x2ed   : > { %1976 = vmatprep.subr.bf16.mxu1 %v3183_v51  ;;  %1924 = vmatpush1.bf16.msra.mxu0 %v3178_v53  ;;  %v3291_v16 = vpop.eup %3290  ;;  %v1217_v26 = vadd.f32 1.0, %v3289_v41  ;;  %v1231_v4 = vmul.f32 %v1215_v2, %v1103_v20  ;;  %v3207_v49 = vld [vmem:[#allocation6 + $0x1ac] ss:$16 sps:$4 sm:$0xff]   ;;  %v3202_v5 = vld [vmem:[#allocation6 + $0x1a0] ss:$16 sps:$4 sm:$0xff]  }
 0x2ee   : > { %1550 = vmatprep.mubr.bf16.mxu0 %v1244_v24  ;;  %v1246_v58 = vpack.c.bf16 %v1238_v0, %v1234_v17  ;;  %1925 = vmatprep.subr.bf16.mxu0 %v3186_v62  ;;  %v1235_v32 = vmul.f32 %v1219_v12, %v1107_v61  ;;  %v1221_v45 = vadd.f32 1.0, %v3291_v16  ;;  %v3210_v51 = vld [vmem:[#allocation6 + $0x1c4] ss:$16 sps:$4 sm:$0xff]   ;;  %v3205_v39 = vld [vmem:[#allocation6 + $0x1a8] ss:$16 sps:$4 sm:$0xff]  }
 0x2ef   : > { %v1233_v1 = vmul.f32 %v1217_v26, %v1105_v40  ;;  %v3213_v54 = vld [vmem:[#allocation6 + $0x1cc] ss:$16 sps:$4 sm:$0xff]   ;;  %v2792_v30 = vld [vmem:[%s4504_s28 + $0x1] ss:$0 sm:$0xff]  ;;  %v3216_v62 = vld [vmem:[#allocation6 + $0x1e4] ss:$16 sps:$4 sm:$0xff]  }
 0x2f0   : > { %1977 = vmatpush1.bf16.msra.mxu1 %v3181_v48  ;;  %1599 = vmatprep.mubr.bf16.mxu1 %v1246_v58  ;;  %v1243_v7 = vpack.c.bf16 %v1235_v32, %v1231_v4  ;;  %v1237_v3 = vmul.f32 %v1221_v45, %v1109_v42  ;;  %v3293_v33 = vpop.eup %3292  ;;  %v3208_v18 = vld [vmem:[#allocation6 + $0x1c0] ss:$16 sps:$4 sm:$0xff]   ;;  %v3219_v48 = vld [vmem:[#allocation6 + $0x1ec] ss:$16 sps:$4 sm:$0xff]   ;;  %v3217_v0 = vld [vmem:[#allocation6 + $0x1e8] ss:$16 sps:$4 sm:$0xff]  }
 0x2f1   : > { %1978 = vmatprep.subr.bf16.mxu1 %v3189_v27  ;;  %1926 = vmatpush1.bf16.msra.mxu0 %v3184_v28  ;;  %v1676_v47 = vmul.f32 %v3293_v33, %v4050_v31  ;;  %v3211_v31 = vld [vmem:[#allocation6 + $0x1c8] ss:$16 sps:$4 sm:$0xff]   ;;  %v2794_v63 = vld [vmem:[%s4505_s27 + $0x1] ss:$0 sm:$0xff]  ;;  %v3220_v12 = vld [vmem:[#allocation8 + $0x140] sm:$0xff]  }
 0x2f2   : > { %1927 = vmatprep.subr.bf16.mxu0 %v3192_v22  ;;  %1551 = vmatmul.mubr.bf16.gmra.mrb[12].mxu0 %v1243_v7  ;;  %v1245_v52 = vpack.c.bf16 %v1237_v3, %v1233_v1  ;;  %v3295_v53 = vpop.eup %3294  ;;  %v3221_v16 = vld [vmem:[#allocation8 + $0x1c0] sm:$0xff]   ;;  %v3224_v58 = vld [vmem:[#allocation8 + $0x148] sm:$0xff]   ;;  %v3229_v4 = vld [vmem:[#allocation8 + $0x1d0] sm:$0xff]  }
 0x2f3   : > { %1953 = vmatprep.mubr.bf16.mxu0 %v3535_v44  ;;  %v1675_v37 = vmul.f32 %v3295_v53, %v4045_v50  ;;  %v1688_v59 = vmul.f32 %v2792_v30, %v1676_v47  ;;  %v3214_v50 = vld [vmem:[#allocation6 + $0x1e0] ss:$16 sps:$4 sm:$0xff]   ;;  %v3225_v40 = vld [vmem:[#allocation8 + $0x1c8] sm:$0xff]   ;;  %v3232_v45 = vld [vmem:[#allocation8 + $0x158] sm:$0xff]  }
 0x2f4   : > { %1979 = vmatpush1.bf16.msra.mxu1 %v3187_v6  ;;  %v3226_v26 = vld [vmem:[#allocation8 + $0x108] sm:$0xff]   ;;  %v3230_v32 = vld [vmem:[#allocation8 + $0x110] sm:$0xff]   ;;  %v3233_v34 = vld [vmem:[#allocation8 + $0x1d8] sm:$0xff]  }
 0x2f5   : > { %1600 = vmatmul.mubr.bf16.gmra.mrb[12].mxu1 %v1245_v52  ;;  %1980 = vmatprep.subr.bf16.mxu1 %v3195_v15  ;;  %v3297_v23 = vpop.eup %3296  ;;  %v1687_v29 = vmul.f32 %v2792_v30, %v1675_v37  ;;  %v1700_v25 = vadd.f32 %v2794_v63, %v1688_v59  ;;  %v3227_v22 = vld [vmem:[#allocation8 + $0x188] sm:$0xff]   ;;  %v3231_v42 = vld [vmem:[#allocation8 + $0x190] sm:$0xff]   ;;  %v3234_v6 = vld [vmem:[#allocation8 + $0x118] sm:$0xff]  }
 0x2f6   : > { %1928 = vmatpush1.bf16.msra.mxu0 %v3190_v43  ;;  %2006 = vmatprep.mubr.bf16.mxu1 %v3535_v44  ;;  %v3299_v24 = vpop.eup %3298  ;;  %v1678_v17 = vmul.f32 %v3297_v23, %v4064_v13  ;;  %v3235_v7 = vld [vmem:[#allocation8 + $0x198] sm:$0xff]   ;;  %v3236_v1 = vld [vmem:[#allocation8 + $0x160] sm:$0xff]   ;;  %v3240_v43 = vld [vmem:[#allocation8 + $0x168] sm:$0xff]  }
 0x2f7   : > { %1929 = vmatprep.subr.bf16.mxu0 %v3198_v38  ;;  %v1699_v28 = vadd.f32 %v2794_v63, %v1687_v29  ;;  %v1677_v2 = vmul.f32 %v3299_v24, %v4053_v19  ;;  %v3223_v19 = vld [vmem:[#allocation8 + $0x180] sm:$0xff]   ;;  %v3241_v52 = vld [vmem:[#allocation8 + $0x1e8] sm:$0xff]   ;;  %v3247_v33 = vld [vmem:[#allocation8 + $0x1b0] sm:$0xff]  }
 0x2f8   : > { %1981 = vmatpush1.bf16.msra.mxu1 %v3193_v55  ;;  %v1690_v14 = vmul.f32 %v2792_v30, %v1678_v17  ;;  %v3237_v3 = vld [vmem:[#allocation8 + $0x1e0] sm:$0xff]   ;;  %v3242_v38 = vld [vmem:[#allocation8 + $0x128] sm:$0xff]   ;;  %v3244_v55 = vld [vmem:[#allocation8 + $0x170] sm:$0xff]  }
 0x2f9   : > { %1982 = vmatprep.subr.bf16.mxu1 %v3201_v57  ;;  %v1703_v41 = vpack.c.bf16 %v1700_v25, %v1699_v28  ;;  %v1689_v27 = vmul.f32 %v2792_v30, %v1677_v2  ;;  %v3238_v15 = vld [vmem:[#allocation8 + $0x120] sm:$0xff]   ;;  %v3243_v56 = vld [vmem:[#allocation8 + $0x1a8] sm:$0xff]   ;;  %v3245_v57 = vld [vmem:[#allocation8 + $0x1f0] sm:$0xff]  }
 0x2fa   : > { %1930 = vmatpush1.bf16.msra.mxu0 %v3196_v60  ;;  %v1702_v20 = vadd.f32 %v2794_v63, %v1690_v14  ;;  %v3239_v35 = vld [vmem:[#allocation8 + $0x1a0] sm:$0xff]   ;;  %v3246_v60 = vld [vmem:[#allocation8 + $0x130] sm:$0xff]   ;;  %v3251_v53 = vld [vmem:[#allocation8 + $0x1b8] sm:$0xff]  }
 0x2fb   : > { %1931 = vmatprep.subr.bf16.mxu0 %v3204_v36  ;;  %v1701_v61 = vadd.f32 %v2794_v63, %v1689_v27  ;;  %v3248_v36 = vld [vmem:[#allocation8 + $0x178] sm:$0xff]   ;;  %v2755_v47 = vld [vmem:[%s4507_s30] ss:$0 sm:$0xff] }
 0x2fc   : > { %1983 = vmatpush1.bf16.msra.mxu1 %v3199_v46  ;;  %v3249_v46 = vld [vmem:[#allocation8 + $0x1f8] sm:$0xff]  }
 0x2fd   : > { %1984 = vmatprep.subr.bf16.mxu1 %v3207_v49  ;;  %v1704_v13 = vpack.c.bf16 %v1702_v20, %v1701_v61  ;;  %v3250_v49 = vld [vmem:[#allocation8 + $0x138] sm:$0xff]  }
 0x2fe   : > { %1932 = vmatpush1.bf16.msra.mxu0 %v3202_v5 }
 0x2ff   : > { %1933 = vmatprep.subr.bf16.mxu0 %v3210_v51 }
 0x300   : > { %1985 = vmatpush1.bf16.msra.mxu1 %v3205_v39 }
 0x301   : > { %1986 = vmatprep.subr.bf16.mxu1 %v3213_v54 }
 0x302   : > { %1934 = vmatpush1.bf16.msra.mxu0 %v3208_v18 }
 0x303   : > { %1935 = vmatprep.subr.bf16.mxu0 %v3216_v62 }
 0x304   : > { %1987 = vmatpush1.bf16.msra.mxu1 %v3211_v31 }
 0x305   : > { %1988 = vmatprep.subr.bf16.mxu1 %v3219_v48 }
 0x306   : > { %1936 = vmatpush1.bf16.msra.mxu0 %v3214_v50 }
 0x307   : > { %2925 = vmatprep.subr.bf16.mxu0 %v3220_v12 }
 0x308   : > { %1989 = vmatpush1.bf16.msra.mxu1 %v3217_v0 }
 0x309   : > { %1954 = vmatmul.mubr.bf16.vlgmr.msra.gmra.mrb[16].mxu0 %v1703_v41  ;;  %2953 = vmatprep.subr.bf16.mxu1 %v3221_v16 }
 0x30a   : > { %1963 = vmatprep.mubr.bf16.mxu0 %v3535_v44  ;;  %2926 = vmatpush3.bf16.msra.mxu0 %v3222_v21 }
 0x30b   : > { %2007 = vmatmul.mubr.bf16.vlgmr.msra.gmra.mrb[16].mxu1 %v1703_v41  ;;  %2927 = vmatprep.subr.bf16.mxu0 %v3224_v58 }
 0x30c   : > { %2016 = vmatprep.mubr.bf16.mxu1 %v3535_v44  ;;  %2954 = vmatpush3.bf16.msra.mxu1 %v3223_v19  ;;  %v3228_v44 = vld [vmem:[#allocation8 + $0x150] sm:$0xff]  }
 0x30d   : > { %2955 = vmatprep.subr.bf16.mxu1 %v3225_v40  ;;  %v2795_v40 = vld [vmem:[%s4506_s26 + $0x4] sm:$0xf] }
 0x30e   : > { %2928 = vmatpush3.bf16.msra.mxu0 %v3226_v26  ;;  %v4242_v26 = vrot.slane %v2795_v40, %v3839_v8 }
 0x30f   : > { %2929 = vmatprep.subr.bf16.mxu0 %v3228_v44 }
 0x310   : > { %2956 = vmatpush3.bf16.msra.mxu1 %v3227_v22  ;;  %v4245_v22 = vrot.slane %v2795_v40, %v3845_v10 }
 0x311   : > { %1964 = vmatmul.mubr.bf16.gmra.mrb[20].mxu0 %v1704_v13  ;;  %2957 = vmatprep.subr.bf16.mxu1 %v3229_v4  ;;  %v4248_v4 = vrot.slane %v2795_v40, %v3842_v9 }
 0x312   : > { %2930 = vmatpush3.bf16.msra.mxu0 %v3230_v32 }
 0x313   : > { %2017 = vmatmul.mubr.bf16.gmra.mrb[20].mxu1 %v1704_v13  ;;  %2931 = vmatprep.subr.bf16.mxu0 %v3232_v45 }
 0x314   : > { %2958 = vmatpush3.bf16.msra.mxu1 %v3231_v42 }
 0x315   : > { %2959 = vmatprep.subr.bf16.mxu1 %v3233_v34  ;;  %v4252_v34 = vrot.slane %v2795_v40, %v3848_v11 }
 0x316   : > { %2932 = vmatpush3.bf16.msra.mxu0 %v3234_v6 }
 0x317   : > { %2933 = vmatprep.subr.bf16.mxu0 %v3236_v1 }
 0x318   : > { %2960 = vmatpush3.bf16.msra.mxu1 %v3235_v7 }
 0x319   : > { %2961 = vmatprep.subr.bf16.mxu1 %v3237_v3 }
 0x31a   : > { %2934 = vmatpush3.bf16.msra.mxu0 %v3238_v15 }
 0x31b   : > { %2935 = vmatprep.subr.bf16.mxu0 %v3240_v43 }
 0x31c   : > { %2962 = vmatpush3.bf16.msra.mxu1 %v3239_v35 }
 0x31d   : > { %2963 = vmatprep.subr.bf16.mxu1 %v3241_v52 }
 0x31e   : > { %2936 = vmatpush3.bf16.msra.mxu0 %v3242_v38 }
 0x31f   : > { %2937 = vmatprep.subr.bf16.mxu0 %v3244_v55 }
 0x320   : > { %2964 = vmatpush3.bf16.msra.mxu1 %v3243_v56 }
 0x321   : > { %2965 = vmatprep.subr.bf16.mxu1 %v3245_v57 }
 0x322   : > { %2938 = vmatpush3.bf16.msra.mxu0 %v3246_v60 }
 0x323   : > { %2939 = vmatprep.subr.bf16.mxu0 %v3248_v36 }
 0x324   : > { %2966 = vmatpush3.bf16.msra.mxu1 %v3247_v33 }
 0x325   : > { %2967 = vmatprep.subr.bf16.mxu1 %v3249_v46 }
 0x326   : > { %2940 = vmatpush3.bf16.msra.mxu0 %v3250_v49 }
 0x328   : > { %2968 = vmatpush3.bf16.msra.mxu1 %v3251_v53 }
 0x3bb   : > { %v2885_v5 = vpop.f32.mrb[8].mxu0 }
 0x3bc   : > { %v2886_v51 = vpop.f32.mrb[9].mxu0 }
 0x3bd   : > { %v2887_v39 = vadd.f32 %v2886_v51, %v2885_v5  ;;  %v2888_v37 = vpop.f32.mrb[10].mxu0 }
 0x3be   : > { %v2913_v54 = vpop.f32.mrb[8].mxu1  ;;  %v2889_v30 = vpop.f32.mrb[11].mxu0 }
 0x3bf   : > { %v1545_v18 = vadd.f32 %v2887_v39, %v2755_v47  ;;  %v2914_v59 = vpop.f32.mrb[9].mxu1  ;;  %v2890_v62 = vadd.f32 %v2889_v30, %v2888_v37 }
 0x3c0   : > { %v2915_v23 = vadd.f32 %v2914_v59, %v2913_v54  ;;  %v2916_v31 = vpop.f32.mrb[10].mxu1 }
 0x3c1   : > { %v1548_v29 = vadd.f32 %v2890_v62, %v2755_v47  ;;  %v2917_v48 = vpop.f32.mrb[11].mxu1 }
 0x3c2   : > { %v4230_v24 = vadd.f32 %v2915_v23, %v1545_v18  ;;  %v2918_v50 = vadd.f32 %v2917_v48, %v2916_v31 }
 0x3c4   : > { %v4232_v63 = vadd.f32 %v2918_v50, %v1548_v29 }
 0x3c5   : > { %v2891_v25 = vpop.f32.mrb[12].mxu0 }
 0x3c6   : > { %v2892_v17 = vpop.f32.mrb[13].mxu0 }
 0x3c7   : > { %v2893_v28 = vadd.f32 %v2892_v17, %v2891_v25  ;;  %v2894_v2 = vpop.f32.mrb[14].mxu0 }
 0x3c8   : > { %v2919_v0 = vpop.f32.mrb[12].mxu1  ;;  %v2895_v14 = vpop.f32.mrb[15].mxu0 }
 0x3c9   : > { %v2920_v41 = vpop.f32.mrb[13].mxu1  ;;  %v1553_v27 = vadd.f32 %v2893_v28, %v2755_v47  ;;  %v2896_v13 = vadd.f32 %v2895_v14, %v2894_v2 }
 0x3ca   : > { %v2921_v20 = vadd.f32 %v2920_v41, %v2919_v0  ;;  %v2922_v61 = vpop.f32.mrb[14].mxu1 }
 0x3cb   : > { %v2923_v12 = vpop.f32.mrb[15].mxu1  ;;  %v1556_v21 = vadd.f32 %v2896_v13, %v2755_v47 }
 0x3cc   : > { %v4234_v16 = vadd.f32 %v2921_v20, %v1553_v27  ;;  %v2924_v19 = vadd.f32 %v2923_v12, %v2922_v61 }
 0x3ce   : > { %v4236_v58 = vadd.f32 %v2924_v19, %v1556_v21 }
 0x3dc   : > { %v1955_v44 = vpop.f32.mrb[16].mxu0 }
 0x3dd   : > { %v1956_v32 = vadd.f32 %v1955_v44, %v4242_v26  ;;  %v1957_v42 = vpop.f32.mrb[17].mxu0 }
 0x3de   : > { %v2008_v45 = vpop.f32.mrb[16].mxu1  ;;  %v1959_v6 = vpop.f32.mrb[18].mxu0  ;;  %v4257_v15 = vadd.f32 %v1957_v42, %v4248_v4 }
 0x3df   : > { %v2043_v7 = vmul.f32 0.044715, %v1956_v32  ;;  %v2009_v1 = vadd.f32 %v2008_v45, %v4245_v22  ;;  %v2010_v8 = vpop.f32.mrb[17].mxu1  ;;  %v1960_v3 = vadd.f32 %v1959_v6, %v4242_v26  ;;  %v1961_v10 = vpop.f32.mrb[19].mxu0  ;;  %v4274_v37 = vmul.f32 0.5, %v1956_v32 }
 0x3e0   : > { %v2012_v9 = vpop.f32.mrb[18].mxu1  ;;  %v4260_v35 = vadd.f32 %v1961_v10, %v4248_v4  ;;  %v4263_v11 = vadd.f32 %v2010_v8, %v4252_v34  ;;  %v2044_v33 = vmul.f32 0.044715, %v4257_v15 }
 0x3e1   : > { %v2059_v43 = vmul.f32 %v2043_v7, %v1956_v32  ;;  %v2045_v52 = vmul.f32 0.044715, %v2009_v1  ;;  %v2014_v38 = vpop.f32.mrb[19].mxu1  ;;  %v2047_v56 = vmul.f32 0.044715, %v1960_v3  ;;  %v4266_v55 = vadd.f32 %v2012_v9, %v4245_v22 }
 0x3e2   : > { %v2048_v46 = vmul.f32 0.044715, %v4260_v35  ;;  %v4271_v49 = vadd.f32 %v2014_v38, %v4252_v34  ;;  %v2046_v54 = vmul.f32 0.044715, %v4263_v11  ;;  %v4280_v31 = vmul.f32 0.5, %v2009_v1 }
 0x3e3   : > { %v2075_v57 = vmul.f32 %v2059_v43, %v1956_v32  ;;  %v2061_v60 = vmul.f32 %v2045_v52, %v2009_v1  ;;  %v2063_v36 = vmul.f32 %v2047_v56, %v1960_v3  ;;  %v2049_v51 = vmul.f32 0.044715, %v4266_v55 }
 0x3e4   : > { %v1965_v53 = vpop.f32.mrb[20].mxu0  ;;  %v2060_v17 = vmul.f32 %v2044_v33, %v4257_v15  ;;  %v2064_v28 = vmul.f32 %v2048_v46, %v4260_v35  ;;  %v2050_v2 = vmul.f32 0.044715, %v4271_v49  ;;  %v2062_v13 = vmul.f32 %v2046_v54, %v4263_v11 }
 0x3e5   : > { %v2091_v5 = vadd.f32 %v2075_v57, %v1956_v32  ;;  %v2077_v47 = vmul.f32 %v2061_v60, %v2009_v1  ;;  %v1967_v39 = vpop.f32.mrb[21].mxu0  ;;  %v2079_v30 = vmul.f32 %v2063_v36, %v1960_v3  ;;  %v4278_v18 = vadd.f32 %v1965_v53, %v4242_v26 }
 0x3e6   : > { %v2018_v59 = vpop.f32.mrb[20].mxu1  ;;  %v1969_v62 = vpop.f32.mrb[22].mxu0  ;;  %v2065_v48 = vmul.f32 %v2049_v51, %v4266_v55  ;;  %v4288_v20 = vadd.f32 %v1967_v39, %v4248_v4  ;;  %v2076_v42 = vmul.f32 %v2060_v17, %v4257_v15  ;;  %v2066_v45 = vmul.f32 %v2050_v2, %v4271_v49 }
 0x3e7   : > { %v2107_v23 = vmul.f32 0.7978846, %v2091_v5  ;;  %v2093_v29 = vadd.f32 %v2077_v47, %v2009_v1  ;;  %v2020_v50 = vpop.f32.mrb[21].mxu1  ;;  %v1971_v25 = vpop.f32.mrb[23].mxu0  ;;  %v2095_v0 = vadd.f32 %v2079_v30, %v1960_v3  ;;  %v2051_v21 = vmul.f32 0.044715, %v4278_v18 }
 0x3e8   : > { %v2022_v41 = vpop.f32.mrb[22].mxu1  ;;  %v2081_v27 = vmul.f32 %v2065_v48, %v4266_v55  ;;  %v4293_v19 = vadd.f32 %v2018_v59, %v4245_v22  ;;  %v2052_v44 = vmul.f32 0.044715, %v4288_v20  ;;  %v4298_v32 = vadd.f32 %v2020_v50, %v4252_v34 }
 0x3e9   : > { %3300 = vtanh.f32 %v2107_v23  ;;  %v2109_v14 = vmul.f32 0.7978846, %v2093_v29  ;;  %v2024_v61 = vpop.f32.mrb[23].mxu1  ;;  %v2111_v12 = vmul.f32 0.7978846, %v2095_v0  ;;  %v4303_v6 = vadd.f32 %v1969_v62, %v4242_v26 }
 0x3ea   : > { %v2097_v40 = vadd.f32 %v2081_v27, %v4266_v55  ;;  %v2080_v1 = vmul.f32 %v2064_v28, %v4260_v35  ;;  %v2054_v8 = vmul.f32 0.044715, %v4298_v32  ;;  %v4308_v10 = vadd.f32 %v2022_v41, %v4245_v22 }
 0x3eb   : > { %3302 = vtanh.f32 %v2109_v14  ;;  %v2031_v9 = vmul.f32 0.5, %v1960_v3  ;;  %v2067_v43 = vmul.f32 %v2051_v21, %v4278_v18  ;;  %v4312_v52 = vadd.f32 %v1971_v25, %v4248_v4 }
 0x3ec   : > { %3304 = vtanh.f32 %v2111_v12  ;;  %v2113_v7 = vmul.f32 0.7978846, %v2097_v40  ;;  %v4315_v38 = vadd.f32 %v2024_v61, %v4252_v34  ;;  %v2078_v26 = vmul.f32 %v2062_v13, %v4263_v11 }
 0x3ed   : > { %v2053_v56 = vmul.f32 0.044715, %v4293_v19  ;;  %v2068_v57 = vmul.f32 %v2052_v44, %v4288_v20  ;;  %v2082_v60 = vmul.f32 %v2066_v45, %v4271_v49  ;;  %v2055_v22 = vmul.f32 0.044715, %v4303_v6 }
 0x3ee   : > { %3306 = vtanh.f32 %v2113_v7  ;;  %v2056_v3 = vmul.f32 0.044715, %v4312_v52  ;;  %v2058_v33 = vmul.f32 0.044715, %v4315_v38  ;;  %v2070_v4 = vmul.f32 %v2054_v8, %v4298_v32 }
 0x3ef   : > { %v2057_v34 = vmul.f32 0.044715, %v4308_v10  ;;  %v2092_v36 = vadd.f32 %v2076_v42, %v4257_v15  ;;  %v2096_v46 = vadd.f32 %v2080_v1, %v4260_v35  ;;  %v2033_v53 = vmul.f32 0.5, %v4266_v55 }
 0x3f0   : > { %v2083_v5 = vmul.f32 %v2067_v43, %v4278_v18  ;;  %v2072_v47 = vmul.f32 %v2056_v3, %v4312_v52  ;;  %v2074_v51 = vmul.f32 %v2058_v33, %v4315_v38  ;;  %v2069_v54 = vmul.f32 %v2053_v56, %v4293_v19 }
 0x3f1   : > { %v2084_v30 = vmul.f32 %v2068_v57, %v4288_v20  ;;  %v2108_v59 = vmul.f32 0.7978846, %v2092_v36  ;;  %v2112_v62 = vmul.f32 0.7978846, %v2096_v46  ;;  %v2071_v23 = vmul.f32 %v2055_v22, %v4303_v6 }
 0x3f2   : > { %v2088_v29 = vmul.f32 %v2072_v47, %v4312_v52  ;;  %v2094_v48 = vadd.f32 %v2078_v26, %v4263_v11  ;;  %v2098_v55 = vadd.f32 %v2082_v60, %v4271_v49  ;;  %v2086_v25 = vmul.f32 %v2070_v4, %v4298_v32 }
 0x3f3   : > { %v3301_v39 = vpop.eup %3300  ;;  %v2073_v17 = vmul.f32 %v2057_v34, %v4308_v10  ;;  %3308 = vtanh.f32 %v2108_v59  ;;  %v2090_v2 = vmul.f32 %v2074_v51, %v4315_v38  ;;  %v2100_v13 = vadd.f32 %v2084_v30, %v4288_v20 }
 0x3f4   : > { %v2139_v0 = vadd.f32 1.0, %v3301_v39  ;;  %3310 = vtanh.f32 %v2112_v62  ;;  %v2110_v41 = vmul.f32 0.7978846, %v2094_v48  ;;  %v2114_v14 = vmul.f32 0.7978846, %v2098_v55 }
 0x3f5   : > { %v3303_v50 = vpop.eup %3302  ;;  %v2104_v12 = vadd.f32 %v2088_v29, %v4312_v52  ;;  %v2085_v21 = vmul.f32 %v2069_v54, %v4293_v19  ;;  %v2087_v40 = vmul.f32 %v2071_v23, %v4303_v6  ;;  %v2116_v7 = vmul.f32 0.7978846, %v2100_v13 }
 0x3f6   : > { %v3305_v28 = vpop.eup %3304  ;;  %v2141_v61 = vadd.f32 1.0, %v3303_v50  ;;  %3312 = vtanh.f32 %v2110_v41  ;;  %v2155_v44 = vmul.f32 %v2139_v0, %v4274_v37  ;;  %v2089_v8 = vmul.f32 %v2073_v17, %v4308_v10 }
 0x3f7   : > { %v2143_v27 = vadd.f32 1.0, %v3305_v28  ;;  %3314 = vtanh.f32 %v2114_v14  ;;  %v2120_v1 = vmul.f32 0.7978846, %v2104_v12  ;;  %v2102_v26 = vadd.f32 %v2086_v25, %v4298_v32 }
 0x3f8   : > { %v3307_v42 = vpop.eup %3306  ;;  %v2106_v56 = vadd.f32 %v2090_v2, %v4315_v38  ;;  %v2157_v60 = vmul.f32 %v2141_v61, %v4280_v31  ;;  %3316 = vtanh.f32 %v2116_v7  ;;  %v2099_v22 = vadd.f32 %v2083_v5, %v4278_v18 }
 0x3f9   : > { %v2159_v45 = vmul.f32 %v2143_v27, %v2031_v9  ;;  %v2145_v43 = vadd.f32 1.0, %v3307_v42  ;;  %3318 = vtanh.f32 %v2120_v1  ;;  %v2118_v37 = vmul.f32 0.7978846, %v2102_v26 }
 0x3fa   : > { %v2122_v33 = vmul.f32 0.7978846, %v2106_v56  ;;  %v2103_v9 = vadd.f32 %v2087_v40, %v4303_v6  ;;  %v2115_v4 = vmul.f32 0.7978846, %v2099_v22  ;;  %v2101_v36 = vadd.f32 %v2085_v21, %v4293_v19 }
 0x3fb   : > { %v2171_v57 = vpack.c.bf16 %v2159_v45, %v2155_v44  ;;  %v2161_v3 = vmul.f32 %v2145_v43, %v2033_v53  ;;  %3320 = vtanh.f32 %v2118_v37  ;;  %v2105_v46 = vadd.f32 %v2089_v8, %v4308_v10 }
 0x3fc   : > { %3322 = vtanh.f32 %v2122_v33  ;;  %v2119_v51 = vmul.f32 0.7978846, %v2103_v9  ;;  %v2117_v5 = vmul.f32 0.7978846, %v2101_v36  ;;  %v2028_v54 = vmul.f32 0.5, %v4257_v15 }
 0x3fd   : > { %v2173_v34 = vpack.c.bf16 %v2161_v3, %v2157_v60  ;;  %v3309_v47 = vpop.eup %3308  ;;  %3324 = vtanh.f32 %v2115_v4  ;;  %v2121_v53 = vmul.f32 0.7978846, %v2105_v46  ;;  %v2032_v30 = vmul.f32 0.5, %v4260_v35 }
 0x3fe   : > { %v3311_v31 = vpop.eup %3310  ;;  %v2140_v39 = vadd.f32 1.0, %v3309_v47  ;;  %3326 = vtanh.f32 %v2119_v51  ;;  %v2030_v50 = vmul.f32 0.5, %v4263_v11  ;;  %v2034_v25 = vmul.f32 0.5, %v4271_v49  ;;  %v2829_v47 = vld [vmem:[%s4507_s30 + $0x1] ss:$0 sm:$0xff] }
 0x3ff   : > { %v2144_v59 = vadd.f32 1.0, %v3311_v31  ;;  %3328 = vtanh.f32 %v2117_v5  ;;  %v2036_v14 = vmul.f32 0.5, %v4288_v20  ;;  %v2040_v27 = vmul.f32 0.5, %v4312_v52 }
 0x400   : > { %v3313_v62 = vpop.eup %3312  ;;  %v2156_v29 = vmul.f32 %v2140_v39, %v2028_v54  ;;  %3330 = vtanh.f32 %v2121_v53  ;;  %v2038_v42 = vmul.f32 0.5, %v4298_v32  ;;  %v2042_v45 = vmul.f32 0.5, %v4315_v38 }
 0x401   : > { %v3315_v23 = vpop.eup %3314  ;;  %v2160_v48 = vmul.f32 %v2144_v59, %v2032_v30  ;;  %v2142_v55 = vadd.f32 1.0, %v3313_v62  ;;  %v2035_v52 = vmul.f32 0.5, %v4278_v18  ;;  %v2037_v3 = vmul.f32 0.5, %v4293_v19 }
 0x402   : > { %v2146_v17 = vadd.f32 1.0, %v3315_v23  ;;  %v3317_v0 = vpop.eup %3316  ;;  %v2041_v32 = vmul.f32 0.5, %v4308_v10  ;;  %v2788_v10 = vld [vmem:[%s4508_s4] ss:$0 sm:$0xff] }
 0x403   : > { %v2172_v28 = vpack.c.bf16 %v2160_v48, %v2156_v29  ;;  %v3319_v2 = vpop.eup %3318  ;;  %v2158_v15 = vmul.f32 %v2142_v55, %v2030_v50  ;;  %v2148_v35 = vadd.f32 1.0, %v3317_v0  ;;  %v1615_v59 = vmul.f32 %v2788_v10, %v4230_v24  ;;  %v2863_v29 = vld [vmem:[%s4508_s4 + $0x1] ss:$0 sm:$0xff]  ;;  %v3332_v0 = vld [vmem:[#allocation2 + $0x8] sm:$0xff] }
 0x404   : > { %v2162_v41 = vmul.f32 %v2146_v17, %v2034_v25  ;;  %v2152_v61 = vadd.f32 1.0, %v3319_v2  ;;  %v1616_v50 = vmul.f32 %v2788_v10, %v4232_v63 }
 0x405   : > { %2476 = vmatprep.mubr.bf16.mxu0 %v2172_v28  ;;  %v3321_v13 = vpop.eup %3320  ;;  %v2164_v11 = vmul.f32 %v2148_v35, %v2036_v14  ;;  %v1619_v28 = vadd.f32 %v3332_v0, %v1615_v59 }
 0x406   : > { %v2174_v12 = vpack.c.bf16 %v2162_v41, %v2158_v15  ;;  %2477 = vmatmul.mubr.bf16.vlgmr.msra.gmra.mrb[24].mxu0 %v2171_v57  ;;  %v3323_v21 = vpop.eup %3322  ;;  %v2168_v40 = vmul.f32 %v2152_v61, %v2040_v27  ;;  %v2150_v49 = vadd.f32 1.0, %v3321_v13  ;;  %v2039_v57 = vmul.f32 0.5, %v4303_v6  ;;  %v3333_v41 = vld [vmem:[#allocation2 + $0x10] sm:$0xff] }
 0x407   : > { %v3325_v44 = vpop.eup %3324  ;;  %v2154_v7 = vadd.f32 1.0, %v3323_v21  ;;  %v1620_v35 = vadd.f32 %v3333_v41, %v1616_v50 }
 0x408   : > { %2525 = vmatprep.mubr.bf16.mxu1 %v2174_v12  ;;  %v3327_v1 = vpop.eup %3326  ;;  %v2176_v20 = vpack.c.bf16 %v2168_v40, %v2164_v11  ;;  %v2147_v8 = vadd.f32 1.0, %v3325_v44  ;;  %v2166_v26 = vmul.f32 %v2150_v49, %v2038_v42  ;;  %v1617_v49 = vmul.f32 %v2788_v10, %v4234_v16 }
 0x409   : > { %2526 = vmatmul.mubr.bf16.vlgmr.msra.gmra.mrb[24].mxu1 %v2173_v34  ;;  %v3329_v43 = vpop.eup %3328  ;;  %v2170_v56 = vmul.f32 %v2154_v7, %v2042_v45  ;;  %v2151_v60 = vadd.f32 1.0, %v3327_v1 }
 0x40a   : > { %v3331_v22 = vpop.eup %3330  ;;  %2484 = vmatprep.mubr.bf16.mxu0 %v2176_v20  ;;  %v2149_v38 = vadd.f32 1.0, %v3329_v43  ;;  %v2163_v33 = vmul.f32 %v2147_v8, %v2035_v52  ;;  %v1618_v20 = vmul.f32 %v2788_v10, %v4236_v58 }
 0x40b   : > { %v2178_v37 = vpack.c.bf16 %v2170_v56, %v2166_v26  ;;  %v2167_v9 = vmul.f32 %v2151_v60, %v2039_v57  ;;  %v2153_v4 = vadd.f32 1.0, %v3331_v22  ;;  %v3334_v26 = vld [vmem:[#allocation2 + $0x18] sm:$0xff]  ;;  %v3335_v60 = vld [vmem:[#allocation2 + $0x20] sm:$0xff] }
 0x40c   : > { %v2165_v34 = vmul.f32 %v2149_v38, %v2037_v3  ;;  %v1621_v56 = vadd.f32 %v3334_v26, %v1617_v49  ;;  %v1622_v22 = vadd.f32 %v3335_v60, %v1618_v20 }
 0x40d   : > { %2533 = vmatprep.mubr.bf16.mxu1 %v2178_v37  ;;  %v2175_v18 = vpack.c.bf16 %v2167_v9, %v2163_v33  ;;  %v2169_v36 = vmul.f32 %v2153_v4, %v2041_v32 }
 0x40f   : > { %2485 = vmatmul.mubr.bf16.gmra.mrb[28].mxu0 %v2175_v18  ;;  %v2177_v46 = vpack.c.bf16 %v2169_v36, %v2165_v34 }
 0x411   : > { %2534 = vmatmul.mubr.bf16.gmra.mrb[28].mxu1 %v2177_v46 }
 0x4d9   : > { %v2941_v6 = vpop.f32.mrb[24].mxu0 }
 0x4da   : > { %v2942_v19 = vpop.f32.mrb[25].mxu0 }
 0x4db   : > { %v2943_v51 = vadd.f32 %v2942_v19, %v2941_v6  ;;  %v2944_v31 = vpop.f32.mrb[26].mxu0 }
 0x4dc   : > { %v2969_v39 = vpop.f32.mrb[24].mxu1  ;;  %v2945_v5 = vpop.f32.mrb[27].mxu0 }
 0x4dd   : > { %v2479_v53 = vadd.f32 %v2943_v51, %v2829_v47  ;;  %v2970_v54 = vpop.f32.mrb[25].mxu1  ;;  %v2946_v30 = vadd.f32 %v2945_v5, %v2944_v31 }
 0x4de   : > { %v2971_v62 = vadd.f32 %v2970_v54, %v2969_v39  ;;  %v2972_v23 = vpop.f32.mrb[26].mxu1 }
 0x4df   : > { %v2482_v48 = vadd.f32 %v2946_v30, %v2829_v47  ;;  %v2973_v55 = vpop.f32.mrb[27].mxu1 }
 0x4e0   : > { %v2528_v25 = vadd.f32 %v2971_v62, %v2479_v53  ;;  %v2974_v17 = vadd.f32 %v2973_v55, %v2972_v23 }
 0x4e2   : > { %v2550_v2 = vmul.f32 %v2863_v29, %v2528_v25  ;;  %v2531_v15 = vadd.f32 %v2974_v17, %v2482_v48  ;;  %v2947_v24 = vpop.f32.mrb[28].mxu0 }
 0x4e3   : > { %v2948_v61 = vpop.f32.mrb[29].mxu0 }
 0x4e4   : > { %v2554_v14 = vadd.f32 %v2550_v2, %v1619_v28  ;;  %v2551_v27 = vmul.f32 %v2863_v29, %v2531_v15  ;;  %v2975_v13 = vpop.f32.mrb[28].mxu1  ;;  %v2949_v12 = vadd.f32 %v2948_v61, %v2947_v24  ;;  %v2950_v21 = vpop.f32.mrb[30].mxu0 }
 0x4e5   : > { %v2976_v11 = vpop.f32.mrb[29].mxu1  ;;  %v2951_v40 = vpop.f32.mrb[31].mxu0 }
 0x4e6   : > { %2558 = vst [vmem:[%s4380_s13] sm:$0xff] %v2554_v14  ;;  %v2555_v63 = vadd.f32 %v2551_v27, %v1620_v35  ;;  %v2487_v44 = vadd.f32 %v2949_v12, %v2829_v47  ;;  %v2977_v42 = vadd.f32 %v2976_v11, %v2975_v13  ;;  %v2978_v45 = vpop.f32.mrb[30].mxu1  ;;  %v2952_v7 = vadd.f32 %v2951_v40, %v2950_v21 }
 0x4e7   : > { %v2979_v1 = vpop.f32.mrb[31].mxu1 }
 0x4e8   : > { %2559 = vst [vmem:[%s4380_s13 + $0x8] sm:$0xff] %v2555_v63  ;;  %v2536_v52 = vadd.f32 %v2977_v42, %v2487_v44  ;;  %v2490_v8 = vadd.f32 %v2952_v7, %v2829_v47  ;;  %v2980_v43 = vadd.f32 %v2979_v1, %v2978_v45 }
 0x4ea   : > { %v2552_v16 = vmul.f32 %v2863_v29, %v2536_v52  ;;  %v2539_v57 = vadd.f32 %v2980_v43, %v2490_v8 }
 0x4ec   : > { %v2556_v58 = vadd.f32 %v2552_v16, %v1621_v56  ;;  %v2553_v3 = vmul.f32 %v2863_v29, %v2539_v57 }
 0x4ee   : > { %2560 = vst [vmem:[%s4380_s13 + $0x10] sm:$0xff] %v2556_v58  ;;  %v2557_v32 = vadd.f32 %v2553_v3, %v1622_v22 }
 0x4f0   : > { %2561 = vst [vmem:[%s4380_s13 + $0x18] sm:$0xff] %v2557_v32 }
 0x4f1   : > { %3435 = shalt.err (!%p3432_p11)
}
 0x4f2   : > { %s3436_s13 = scalar_lea.hbm %s4394_s29, 512  ;;  %s3440_s20 = scalar_lea.hbm %s4509_s16, 3072 }
 0x4f3   : > { %p3437_p1 = scmp.ne.s32.totalorder %s4394_s29, %s3436_s13  ;;  %p3441_p0 = scmp.lt.u32.totalorder %s4394_s29, %s4509_s16 }
 0x4f4   : > { %p3442_p2 = scmp.lt.u32.totalorder %s3440_s20, %s3436_s13  ;;  %p3444_p4 = scmp.lt.u32.totalorder %s3436_s13, %s4394_s29 }
 0x4f5   : > { %p3438_p5 = pnand %p3437_p1, %p3741_p6 }
 0x4f6   : > { %p3443_p10 = por %p3442_p2, %p3441_p0 }
 0x4f7   : > { %p3439_p9 = pneg %p3438_p5 }
 0x4f8   : > { %p3445_p8 = por %p3444_p4, %p3443_p10 }
 0x4fa   : > { %p3446_p13 = pnand %p3445_p8, %p3439_p9 }
 0x4fc   : > { %3449 = shalt.err (!%p3446_p13)
}
 0x4fd   : > { %s3537_s14 = smov 128   ;;  %s3538_s5 = smov 8  }
 0x4fe   : > { %2994 = dma.vmem_to_hbm [thread:$0]  (%p3741_p6), %s4388_s10, 512, %s4394_s29, %s2563_s15, %s3537_s14, %s3537_s14, %s3538_s5  }
 0x4ff PF: > { %s4510_s7 = sld [smem:[#allocation13_spill]]  ;;  %s4511_s17 = sld [smem:[#allocation14_spill]] }
 0x500   : > { %p3016_p3 = scmp.ge.s32.totalorder %s3524_s24, 2 }
 0x505   : > { %s2593_s9 = sand.u32 1, %s4510_s7   ;;  %p4512_p7 = scmp.ne.s32.totalorder %s4511_s17, 0 }
 0x506   : > { %s2594_s13 = scalar_lea.sflag [#allocation5], %s2593_s9 }
 0x507   : > { %p3008_p12 = pnand %p3016_p3, %p4512_p7 }
 0x509   : > { %3491 = dma.done.wait (!%p3008_p12), %s2594_s13, 512  }
 0x50a   : > { %3493 = vsyncadd (!%p3008_p12), %s2594_s13, 4294966784  ;;  %s28_s24 = sadd.s32 1, %s3524_s24   ;;  %s4513_s25 = sld [smem:[#allocation15_spill]] }
 0x50b   : > { %p25_p11 = scmp.ge.s32.totalorder %s28_s24, 8   ;;  %s4514_s8 = sld [smem:[#allocation16_spill]] }
 0x50c   : > { %s4515_s17 = smov %s3500_s18  ;;  %s4516_s18 = smov %s3504_s19 }
 0x50d   : > { %s4517_s19 = smov %s3760_s6  ;;  %s4518_s20 = smov %s3516_s22 }
 0x50e   : > { %s4519_s21 = smov %s3520_s23  ;;  %27 = sbr.rel (!%p25_p11) target bundleno = 17 (0x11), region = 128 }
 0x510   : > { %s4520_s22 = smov %s4513_s25 }
 0x511   : > { %s4521_s23 = smov %s4514_s8 }
 0x515   :  { %2599 = vsyncpa [#allocation4], 1 }
 0x516   :  { %2601 = vsyncpa [#allocation4 + $0x1], 1 }
 0x517   :  { %2602 = vsyncpa [#allocation7], 1 }
 0x518   :  { %2603 = vsyncpa [#allocation5], 1 }
 0x519   :  { %2605 = vsyncpa [#allocation5 + $0x1], 1 }

</bundles_post_ra>
